<compile_context>
chip_gen: v7x
topology: tpu7x:2x2x1
jax: 0.10.0
libtpu: 0.0.40
codegen_flags: <defaults>
</compile_context>

<pallas_src>
import jax
import jax.numpy as jnp
from jax.experimental import pallas as pl
from jax.experimental.pallas import tpu as pltpu


# ----------------------------- Pallas kernels ------------------------------ #

def _conv_relu_pool_kernel(p_ref, w_ref, b_ref, o_ref, acc_ref):
    """One pooling quadrant of conv-as-matmul, max-accumulated into acc_ref.

    Grid = (row_tiles, 4). Axis 1 ("arbitrary") walks the four 2x2-pool
    quadrants; the output block is revisited across it and written only on the
    last quadrant. ReLU commutes with max, so relu-then-max == pool(relu(conv)).
    """
    q = pl.program_id(1)
    val = jnp.dot(p_ref[...], w_ref[...], preferred_element_type=jnp.float32)
    val = jnp.maximum(val + b_ref[...], 0.0)            # bias + ReLU (f32 epilogue)

    @pl.when(q == 0)
    def _():
        acc_ref[...] = val

    @pl.when(q != 0)
    def _():
        acc_ref[...] = jnp.maximum(acc_ref[...], val)   # 2x2 max-pool accumulation

    @pl.when(q == pl.num_programs(1) - 1)
    def _():
        o_ref[...] = acc_ref[...].astype(o_ref.dtype)


def _fc_head_kernel(x_ref, w1_ref, b1_ref, w2_ref, b2_ref, w3_ref, b3_ref, o_ref):
    """Fused fc1+ReLU -> fc2+ReLU -> fc3 -> softmax (single kernel)."""
    h = jnp.dot(x_ref[...], w1_ref[...], preferred_element_type=jnp.float32)
    h = jnp.maximum(h + b1_ref[...], 0.0).astype(jnp.bfloat16)
    h = jnp.dot(h, w2_ref[...], preferred_element_type=jnp.float32)
    h = jnp.maximum(h + b2_ref[...], 0.0).astype(jnp.bfloat16)
    logits = jnp.dot(h, w3_ref[...], preferred_element_type=jnp.float32) + b3_ref[...]
    m = jnp.max(logits, axis=-1, keepdims=True)
    e = jnp.exp(logits - m)
    o_ref[...] = (e / jnp.sum(e, axis=-1, keepdims=True)).astype(o_ref.dtype)


# ------------------------------ kernel wrappers ----------------------------- #

def _pick_row_tile(m, row_bytes, budget_bytes=8 << 20):
    """Largest row tile giving >=2 grid tiles (parallel axis -> both v7x TCs)
    that is a multiple of 8 and fits a conservative VMEM budget; otherwise a
    single full-dim tile (full-dim blocks are exempt from the (8,128) rule)."""
    for nt in (2, 4, 8, 16, 32):
        if m % nt == 0:
            tm = m // nt
            if tm % 8 == 0 and tm * row_bytes <= budget_bytes:
                return tm
    return m


def _pool_quadrant_patches(x):
    """x: (B,H,W,C) NHWC -> (4, B*(H//2)*(W//2), 9*C) im2col patches, one slab
    per 2x2-pool quadrant; patch columns ordered (ky, kx, cin)."""
    b, h, w, c = x.shape
    ho, wo = h // 2, w // 2
    xp = jnp.pad(x, ((0, 0), (1, 1), (1, 1), (0, 0)))
    quads = []
    for dy in (0, 1):
        for dx in (0, 1):
            taps = [xp[:, dy + ky: dy + ky + h - 1: 2,
                       dx + kx: dx + kx + w - 1: 2, :]
                    for ky in range(3) for kx in range(3)]
            quads.append(jnp.concatenate(taps, axis=-1).reshape(b * ho * wo, 9 * c))
    return jnp.stack(quads)


def conv3x3_relu_pool(x, wmat, bias_row):
    """x: (B,H,W,Cin) bf16 NHWC; wmat: (9*Cin,Cout) bf16; bias_row: (1,Cout) f32.
    Returns maxpool2x2(relu(conv3x3(x) + b)) as (B, H//2, W//2, Cout) bf16."""
    b, h, w, cin = x.shape
    k, cout = wmat.shape
    ho, wo = h // 2, w // 2
    m = b * ho * wo

    patches = _pool_quadrant_patches(x)                 # (4, m, 9*Cin), XLA glue
    tm = _pick_row_tile(m, 4 * (k + 2 * cout))

    out = pl.pallas_call(
        _conv_relu_pool_kernel,
        out_shape=jax.ShapeDtypeStruct((m, cout), jnp.bfloat16),
        grid_spec=pltpu.PrefetchScalarGridSpec(
            num_scalar_prefetch=0,
            grid=(m // tm, 4),
            in_specs=[
                pl.BlockSpec((None, tm, k), lambda i, q: (q, i, 0)),
                pl.BlockSpec((k, cout), lambda i, q: (0, 0)),
                pl.BlockSpec((1, cout), lambda i, q: (0, 0)),
            ],
            out_specs=pl.BlockSpec((tm, cout), lambda i, q: (i, 0)),
            scratch_shapes=[pltpu.VMEM((tm, cout), jnp.float32)],
        ),
        compiler_params=pltpu.CompilerParams(
            dimension_semantics=("parallel", "arbitrary")),
    )(patches, wmat, bias_row)
    return out.reshape(b, ho, wo, cout)


def fc_head(x, w1, b1, w2, b2, w3, b3):
    """Fused fc1/fc2/fc3 + softmax. x: (B, 2304) bf16 -> (B, 7) f32."""
    return pl.pallas_call(
        _fc_head_kernel,
        out_shape=jax.ShapeDtypeStruct((x.shape[0], w3.shape[1]), jnp.float32),
    )(x, w1, b1, w2, b2, w3, b3)


# ------------------------------ parameters / model -------------------------- #

def init_params(key):
    """PyTorch-layout parameters with PyTorch-style uniform init."""
    def u(k, shape, fan_in):
        bound = 1.0 / jnp.sqrt(jnp.float32(fan_in))
        return jax.random.uniform(k, shape, jnp.float32, -bound, bound)

    ks = jax.random.split(key, 12)
    return {
        "conv1_w": u(ks[0], (16, 3, 3, 3), 3 * 9),
        "conv1_b": u(ks[1], (16,), 3 * 9),
        "conv2_w": u(ks[2], (32, 16, 3, 3), 16 * 9),
        "conv2_b": u(ks[3], (32,), 16 * 9),
        "conv3_w": u(ks[4], (64, 32, 3, 3), 32 * 9),
        "conv3_b": u(ks[5], (64,), 32 * 9),
        "fc1_w": u(ks[6], (128, 64 * 6 * 6), 64 * 6 * 6),
        "fc1_b": u(ks[7], (128,), 64 * 6 * 6),
        "fc2_w": u(ks[8], (64, 128), 128),
        "fc2_b": u(ks[9], (64,), 128),
        "fc3_w": u(ks[10], (7, 64), 64),
        "fc3_b": u(ks[11], (7,), 64),
    }


def prepare_params(p):
    """Hoist all weight transposes / layout changes out of the forward pass.

    * conv weights -> (9*Cin, Cout) matmul matrices (rows ordered ky,kx,cin), bf16.
    * fc1 weight rows permuted so it consumes an NHWC (h,w,c) flatten directly;
      this is exactly equivalent to torch.flatten on NCHW followed by fc1.
    * fc2/fc3 pre-transposed to (in, out), bf16. Biases stay f32 as (1, N) rows.
    """
    def conv_mat(w):
        cout = w.shape[0]
        return jnp.transpose(w, (2, 3, 1, 0)).reshape(-1, cout).astype(jnp.bfloat16)

    f1 = p["fc1_w"].reshape(128, 64, 6, 6)                          # [out, c, h, w]
    f1 = jnp.transpose(f1, (2, 3, 1, 0)).reshape(6 * 6 * 64, 128)   # rows (h, w, c)
    row = lambda v: v.reshape(1, -1).astype(jnp.float32)
    return {
        "c1w": conv_mat(p["conv1_w"]), "c1b": row(p["conv1_b"]),
        "c2w": conv_mat(p["conv2_w"]), "c2b": row(p["conv2_b"]),
        "c3w": conv_mat(p["conv3_w"]), "c3b": row(p["conv3_b"]),
        "f1w": f1.astype(jnp.bfloat16), "f1b": row(p["fc1_b"]),
        "f2w": p["fc2_w"].T.astype(jnp.bfloat16), "f2b": row(p["fc2_b"]),
        "f3w": p["fc3_w"].T.astype(jnp.bfloat16), "f3b": row(p["fc3_b"]),
    }


def cnn_forward(prep, x_nchw):
    # NCHW (torch) -> NHWC (kernel layout); bf16 matmul operands, f32 epilogues.
    x = jnp.transpose(x_nchw, (0, 2, 3, 1)).astype(jnp.bfloat16)

    x = conv3x3_relu_pool(x, prep["c1w"], prep["c1b"])   # 48 -> 24, C=16
    x = conv3x3_relu_pool(x, prep["c2w"], prep["c2b"])   # 24 -> 12, C=32
    x = conv3x3_relu_pool(x, prep["c3w"], prep["c3b"])   # 12 ->  6, C=64

    b = x.shape[0]
    x = x.reshape(b, -1)   # (B, 6*6*64) in (h,w,c) order; f1w pre-permuted to match
    return fc_head(x, prep["f1w"], prep["f1b"], prep["f2w"], prep["f2b"],
                   prep["f3w"], prep["f3b"])


# ----------------------------------- main ----------------------------------- #

if __name__ == "__main__":
    key = jax.random.PRNGKey(0)
    pkey, xkey = jax.random.split(key)
    prep = prepare_params(init_params(pkey))   # weight-layout hoisting: done once

    # Spatial size must be 48 so three 2x2 pools give 6x6 (matches fc1: 64*6*6).
    x = jax.random.normal(xkey, (2, 3, 48, 48), dtype=jnp.float32)

    out = jax.block_until_ready(jax.jit(cnn_forward)(prep, x))

    assert out.shape == (2, 7), out.shape
    row_sums = jnp.sum(out, axis=1)
    assert jnp.allclose(row_sums, jnp.ones_like(row_sums), atol=1e-4), row_sums
    print("KERNEL_OK")
</pallas_src>

<mosaic_0001>
module attributes {stable_mosaic.version = 11 : i64} {
  func.func @_conv_relu_pool_kernel(%arg0: i32, %arg1: i32, %arg2: memref<1x576x27xbf16, #tpu.memory_space<vmem>>, %arg3: memref<27x16xbf16, #tpu.memory_space<vmem>>, %arg4: memref<1x16xf32, #tpu.memory_space<vmem>>, %arg5: memref<576x16xbf16, #tpu.memory_space<vmem>>, %arg6: memref<576x16xf32, #tpu.memory_space<vmem>>) attributes {dimension_semantics = [#tpu.dimension_semantics<parallel>, #tpu.dimension_semantics<arbitrary>], iteration_bounds = array<i64: 2, 4>, scalar_prefetch = 0 : i64, scratch_operands = 1 : i64, tpu.core_type = #tpu.core_type<tc>, window_params = [{transform_indices = @transform_0, window_bounds = array<i64: 1, 576, 27>}, {pipeline_mode = #tpu.pipeline_mode<synchronous>, transform_indices = @transform_1, window_bounds = array<i64: 27, 16>}, {pipeline_mode = #tpu.pipeline_mode<synchronous>, transform_indices = @transform_2, window_bounds = array<i64: 1, 16>}, {transform_indices = @transform_3, window_bounds = array<i64: 576, 16>}]} {
    %c0 = arith.constant 0 : index
    %c0_0 = arith.constant 0 : index
    %c0_1 = arith.constant 0 : index
    %0 = vector.load %arg2[%c0, %c0_0, %c0_1] : memref<1x576x27xbf16, #tpu.memory_space<vmem>>, vector<1x576x27xbf16>
    %1 = vector.shape_cast %0 : vector<1x576x27xbf16> to vector<576x27xbf16>
    %c0_2 = arith.constant 0 : index
    %c0_3 = arith.constant 0 : index
    %2 = vector.load %arg3[%c0_2, %c0_3] : memref<27x16xbf16, #tpu.memory_space<vmem>>, vector<27x16xbf16>
    %cst = arith.constant dense<0.000000e+00> : vector<576x16xf32>
    %3 = tpu.matmul %1, %2, %cst {dimension_numbers = #tpu.dot_dimension_numbers<[1], [0], [0], [1], [0, 0, 1, 1], [], []>} : vector<576x27xbf16>, vector<27x16xbf16>, vector<576x16xf32> -> vector<576x16xf32>
    %c0_4 = arith.constant 0 : index
    %c0_5 = arith.constant 0 : index
    %4 = vector.load %arg4[%c0_4, %c0_5] : memref<1x16xf32, #tpu.memory_space<vmem>>, vector<1x16xf32>
    %5 = vector.broadcast %4 : vector<1x16xf32> to vector<576x16xf32>
    %6 = arith.addf %3, %5 : vector<576x16xf32>
    %cst_6 = arith.constant 0.000000e+00 : f32
    %7 = vector.broadcast %cst_6 : f32 to vector<576x16xf32>
    %8 = arith.maximumf %6, %7 : vector<576x16xf32>
    %c0_i32 = arith.constant 0 : i32
    %9 = arith.cmpi eq, %arg1, %c0_i32 : i32
    %10 = arith.extui %9 : i1 to i32
    %c0_i32_7 = arith.constant 0 : i32
    %11 = arith.cmpi ne, %10, %c0_i32_7 : i32
    scf.if %11 {
      %c0_11 = arith.constant 0 : index
      %c0_12 = arith.constant 0 : index
      %18 = vector.load %arg6[%c0_11, %c0_12] : memref<576x16xf32, #tpu.memory_space<vmem>>, vector<576x16xf32>
      tpu.vector_store %arg6[%c0_11, %c0_12], %8 {strides = array<i32>} : memref<576x16xf32, #tpu.memory_space<vmem>>, vector<576x16xf32>,
    } else {
    }
    %c0_i32_8 = arith.constant 0 : i32
    %12 = arith.cmpi ne, %arg1, %c0_i32_8 : i32
    %13 = arith.extui %12 : i1 to i32
    %c0_i32_9 = arith.constant 0 : i32
    %14 = arith.cmpi ne, %13, %c0_i32_9 : i32
    scf.if %14 {
      %c0_11 = arith.constant 0 : index
      %c0_12 = arith.constant 0 : index
      %18 = vector.load %arg6[%c0_11, %c0_12] : memref<576x16xf32, #tpu.memory_space<vmem>>, vector<576x16xf32>
      %19 = arith.maximumf %18, %8 : vector<576x16xf32>
      %c0_13 = arith.constant 0 : index
      %c0_14 = arith.constant 0 : index
      %20 = vector.load %arg6[%c0_13, %c0_14] : memref<576x16xf32, #tpu.memory_space<vmem>>, vector<576x16xf32>
      tpu.vector_store %arg6[%c0_13, %c0_14], %19 {strides = array<i32>} : memref<576x16xf32, #tpu.memory_space<vmem>>, vector<576x16xf32>,
    } else {
    }
    %c3_i32 = arith.constant 3 : i32
    %15 = arith.cmpi eq, %arg1, %c3_i32 : i32
    %16 = arith.extui %15 : i1 to i32
    %c0_i32_10 = arith.constant 0 : i32
    %17 = arith.cmpi ne, %16, %c0_i32_10 : i32
    scf.if %17 {
      %c0_11 = arith.constant 0 : index
      %c0_12 = arith.constant 0 : index
      %18 = vector.load %arg6[%c0_11, %c0_12] : memref<576x16xf32, #tpu.memory_space<vmem>>, vector<576x16xf32>
      %19 = arith.truncf %18 : vector<576x16xf32> to vector<576x16xbf16>
      %c0_13 = arith.constant 0 : index
      %c0_14 = arith.constant 0 : index
      %20 = vector.load %arg5[%c0_13, %c0_14] : memref<576x16xbf16, #tpu.memory_space<vmem>>, vector<576x16xbf16>
      tpu.vector_store %arg5[%c0_13, %c0_14], %19 {strides = array<i32>} : memref<576x16xbf16, #tpu.memory_space<vmem>>, vector<576x16xbf16>,
    } else {
    }
    return
  }
  func.func @transform_0(%arg0: i32, %arg1: i32) -> (i32, i32, i32) {
    %c0_i32 = arith.constant 0 : i32
    %c0_i32_0 = arith.constant 0 : i32
    return %arg1, %arg0, %c0_i32 : i32, i32, i32
  }
  func.func @transform_1(%arg0: i32, %arg1: i32) -> (i32, i32) {
    %c0_i32 = arith.constant 0 : i32
    %c0_i32_0 = arith.constant 0 : i32
    %c0_i32_1 = arith.constant 0 : i32
    return %c0_i32, %c0_i32_0 : i32, i32
  }
  func.func @transform_2(%arg0: i32, %arg1: i32) -> (i32, i32) {
    %c0_i32 = arith.constant 0 : i32
    %c0_i32_0 = arith.constant 0 : i32
    %c0_i32_1 = arith.constant 0 : i32
    return %c0_i32, %c0_i32_0 : i32, i32
  }
  func.func @transform_3(%arg0: i32, %arg1: i32) -> (i32, i32) {
    %c0_i32 = arith.constant 0 : i32
    %c0_i32_0 = arith.constant 0 : i32
    return %arg0, %c0_i32 : i32, i32
  }
}

module attributes {stable_mosaic.version = 11 : i64} {
  func.func @_conv_relu_pool_kernel(%arg0: i32, %arg1: i32, %arg2: memref<1x144x144xbf16, #tpu.memory_space<vmem>>, %arg3: memref<144x32xbf16, #tpu.memory_space<vmem>>, %arg4: memref<1x32xf32, #tpu.memory_space<vmem>>, %arg5: memref<144x32xbf16, #tpu.memory_space<vmem>>, %arg6: memref<144x32xf32, #tpu.memory_space<vmem>>) attributes {dimension_semantics = [#tpu.dimension_semantics<parallel>, #tpu.dimension_semantics<arbitrary>], iteration_bounds = array<i64: 2, 4>, scalar_prefetch = 0 : i64, scratch_operands = 1 : i64, tpu.core_type = #tpu.core_type<tc>, window_params = [{transform_indices = @transform_0, window_bounds = array<i64: 1, 144, 144>}, {pipeline_mode = #tpu.pipeline_mode<synchronous>, transform_indices = @transform_1, window_bounds = array<i64: 144, 32>}, {pipeline_mode = #tpu.pipeline_mode<synchronous>, transform_indices = @transform_2, window_bounds = array<i64: 1, 32>}, {transform_indices = @transform_3, window_bounds = array<i64: 144, 32>}]} {
    %c0 = arith.constant 0 : index
    %c0_0 = arith.constant 0 : index
    %c0_1 = arith.constant 0 : index
    %0 = vector.load %arg2[%c0, %c0_0, %c0_1] : memref<1x144x144xbf16, #tpu.memory_space<vmem>>, vector<1x144x144xbf16>
    %1 = vector.shape_cast %0 : vector<1x144x144xbf16> to vector<144x144xbf16>
    %c0_2 = arith.constant 0 : index
    %c0_3 = arith.constant 0 : index
    %2 = vector.load %arg3[%c0_2, %c0_3] : memref<144x32xbf16, #tpu.memory_space<vmem>>, vector<144x32xbf16>
    %cst = arith.constant dense<0.000000e+00> : vector<144x32xf32>
    %3 = tpu.matmul %1, %2, %cst {dimension_numbers = #tpu.dot_dimension_numbers<[1], [0], [0], [1], [0, 0, 1, 1], [], []>} : vector<144x144xbf16>, vector<144x32xbf16>, vector<144x32xf32> -> vector<144x32xf32>
    %c0_4 = arith.constant 0 : index
    %c0_5 = arith.constant 0 : index
    %4 = vector.load %arg4[%c0_4, %c0_5] : memref<1x32xf32, #tpu.memory_space<vmem>>, vector<1x32xf32>
    %5 = vector.broadcast %4 : vector<1x32xf32> to vector<144x32xf32>
    %6 = arith.addf %3, %5 : vector<144x32xf32>
    %cst_6 = arith.constant 0.000000e+00 : f32
    %7 = vector.broadcast %cst_6 : f32 to vector<144x32xf32>
    %8 = arith.maximumf %6, %7 : vector<144x32xf32>
    %c0_i32 = arith.constant 0 : i32
    %9 = arith.cmpi eq, %arg1, %c0_i32 : i32
    %10 = arith.extui %9 : i1 to i32
    %c0_i32_7 = arith.constant 0 : i32
    %11 = arith.cmpi ne, %10, %c0_i32_7 : i32
    scf.if %11 {
      %c0_11 = arith.constant 0 : index
      %c0_12 = arith.constant 0 : index
      %18 = vector.load %arg6[%c0_11, %c0_12] : memref<144x32xf32, #tpu.memory_space<vmem>>, vector<144x32xf32>
      tpu.vector_store %arg6[%c0_11, %c0_12], %8 {strides = array<i32>} : memref<144x32xf32, #tpu.memory_space<vmem>>, vector<144x32xf32>,
    } else {
    }
    %c0_i32_8 = arith.constant 0 : i32
    %12 = arith.cmpi ne, %arg1, %c0_i32_8 : i32
    %13 = arith.extui %12 : i1 to i32
    %c0_i32_9 = arith.constant 0 : i32
    %14 = arith.cmpi ne, %13, %c0_i32_9 : i32
    scf.if %14 {
      %c0_11 = arith.constant 0 : index
      %c0_12 = arith.constant 0 : index
      %18 = vector.load %arg6[%c0_11, %c0_12] : memref<144x32xf32, #tpu.memory_space<vmem>>, vector<144x32xf32>
      %19 = arith.maximumf %18, %8 : vector<144x32xf32>
      %c0_13 = arith.constant 0 : index
      %c0_14 = arith.constant 0 : index
      %20 = vector.load %arg6[%c0_13, %c0_14] : memref<144x32xf32, #tpu.memory_space<vmem>>, vector<144x32xf32>
      tpu.vector_store %arg6[%c0_13, %c0_14], %19 {strides = array<i32>} : memref<144x32xf32, #tpu.memory_space<vmem>>, vector<144x32xf32>,
    } else {
    }
    %c3_i32 = arith.constant 3 : i32
    %15 = arith.cmpi eq, %arg1, %c3_i32 : i32
    %16 = arith.extui %15 : i1 to i32
    %c0_i32_10 = arith.constant 0 : i32
    %17 = arith.cmpi ne, %16, %c0_i32_10 : i32
    scf.if %17 {
      %c0_11 = arith.constant 0 : index
      %c0_12 = arith.constant 0 : index
      %18 = vector.load %arg6[%c0_11, %c0_12] : memref<144x32xf32, #tpu.memory_space<vmem>>, vector<144x32xf32>
      %19 = arith.truncf %18 : vector<144x32xf32> to vector<144x32xbf16>
      %c0_13 = arith.constant 0 : index
      %c0_14 = arith.constant 0 : index
      %20 = vector.load %arg5[%c0_13, %c0_14] : memref<144x32xbf16, #tpu.memory_space<vmem>>, vector<144x32xbf16>
      tpu.vector_store %arg5[%c0_13, %c0_14], %19 {strides = array<i32>} : memref<144x32xbf16, #tpu.memory_space<vmem>>, vector<144x32xbf16>,
    } else {
    }
    return
  }
  func.func @transform_0(%arg0: i32, %arg1: i32) -> (i32, i32, i32) {
    %c0_i32 = arith.constant 0 : i32
    %c0_i32_0 = arith.constant 0 : i32
    return %arg1, %arg0, %c0_i32 : i32, i32, i32
  }
  func.func @transform_1(%arg0: i32, %arg1: i32) -> (i32, i32) {
    %c0_i32 = arith.constant 0 : i32
    %c0_i32_0 = arith.constant 0 : i32
    %c0_i32_1 = arith.constant 0 : i32
    return %c0_i32, %c0_i32_0 : i32, i32
  }
  func.func @transform_2(%arg0: i32, %arg1: i32) -> (i32, i32) {
    %c0_i32 = arith.constant 0 : i32
    %c0_i32_0 = arith.constant 0 : i32
    %c0_i32_1 = arith.constant 0 : i32
    return %c0_i32, %c0_i32_0 : i32, i32
  }
  func.func @transform_3(%arg0: i32, %arg1: i32) -> (i32, i32) {
    %c0_i32 = arith.constant 0 : i32
    %c0_i32_0 = arith.constant 0 : i32
    return %arg0, %c0_i32 : i32, i32
  }
}

module attributes {stable_mosaic.version = 11 : i64} {
  func.func @_fc_head_kernel(%arg0: memref<2x2304xbf16, #tpu.memory_space<vmem>>, %arg1: memref<2304x128xbf16, #tpu.memory_space<vmem>>, %arg2: memref<1x128xf32, #tpu.memory_space<vmem>>, %arg3: memref<128x64xbf16, #tpu.memory_space<vmem>>, %arg4: memref<1x64xf32, #tpu.memory_space<vmem>>, %arg5: memref<64x7xbf16, #tpu.memory_space<vmem>>, %arg6: memref<1x7xf32, #tpu.memory_space<vmem>>, %arg7: memref<2x7xf32, #tpu.memory_space<vmem>>) attributes {dimension_semantics = [], scalar_prefetch = 0 : i64, scratch_operands = 0 : i64, tpu.core_type = #tpu.core_type<tc>} {
    %c0 = arith.constant 0 : index
    %c0_0 = arith.constant 0 : index
    %0 = vector.load %arg0[%c0, %c0_0] : memref<2x2304xbf16, #tpu.memory_space<vmem>>, vector<2x2304xbf16>
    %c0_1 = arith.constant 0 : index
    %c0_2 = arith.constant 0 : index
    %1 = vector.load %arg1[%c0_1, %c0_2] : memref<2304x128xbf16, #tpu.memory_space<vmem>>, vector<2304x128xbf16>
    %cst = arith.constant dense<0.000000e+00> : vector<2x128xf32>
    %2 = tpu.matmul %0, %1, %cst {dimension_numbers = #tpu.dot_dimension_numbers<[1], [0], [0], [1], [0, 0, 1, 1], [], []>} : vector<2x2304xbf16>, vector<2304x128xbf16>, vector<2x128xf32> -> vector<2x128xf32>
    %c0_3 = arith.constant 0 : index
    %c0_4 = arith.constant 0 : index
    %3 = vector.load %arg2[%c0_3, %c0_4] : memref<1x128xf32, #tpu.memory_space<vmem>>, vector<1x128xf32>
    %4 = vector.broadcast %3 : vector<1x128xf32> to vector<2x128xf32>
    %5 = arith.addf %2, %4 : vector<2x128xf32>
    %cst_5 = arith.constant 0.000000e+00 : f32
    %6 = vector.broadcast %cst_5 : f32 to vector<2x128xf32>
    %7 = arith.maximumf %5, %6 : vector<2x128xf32>
    %8 = arith.truncf %7 : vector<2x128xf32> to vector<2x128xbf16>
    %c0_6 = arith.constant 0 : index
    %c0_7 = arith.constant 0 : index
    %9 = vector.load %arg3[%c0_6, %c0_7] : memref<128x64xbf16, #tpu.memory_space<vmem>>, vector<128x64xbf16>
    %cst_8 = arith.constant dense<0.000000e+00> : vector<2x64xf32>
    %10 = tpu.matmul %8, %9, %cst_8 {dimension_numbers = #tpu.dot_dimension_numbers<[1], [0], [0], [1], [0, 0, 1, 1], [], []>} : vector<2x128xbf16>, vector<128x64xbf16>, vector<2x64xf32> -> vector<2x64xf32>
    %c0_9 = arith.constant 0 : index
    %c0_10 = arith.constant 0 : index
    %11 = vector.load %arg4[%c0_9, %c0_10] : memref<1x64xf32, #tpu.memory_space<vmem>>, vector<1x64xf32>
    %12 = vector.broadcast %11 : vector<1x64xf32> to vector<2x64xf32>
    %13 = arith.addf %10, %12 : vector<2x64xf32>
    %cst_11 = arith.constant 0.000000e+00 : f32
    %14 = vector.broadcast %cst_11 : f32 to vector<2x64xf32>
    %15 = arith.maximumf %13, %14 : vector<2x64xf32>
    %16 = arith.truncf %15 : vector<2x64xf32> to vector<2x64xbf16>
    %c0_12 = arith.constant 0 : index
    %c0_13 = arith.constant 0 : index
    %17 = vector.load %arg5[%c0_12, %c0_13] : memref<64x7xbf16, #tpu.memory_space<vmem>>, vector<64x7xbf16>
    %cst_14 = arith.constant dense<0.000000e+00> : vector<2x7xf32>
    %18 = tpu.matmul %16, %17, %cst_14 {dimension_numbers = #tpu.dot_dimension_numbers<[1], [0], [0], [1], [0, 0, 1, 1], [], []>} : vector<2x64xbf16>, vector<64x7xbf16>, vector<2x7xf32> -> vector<2x7xf32>
    %c0_15 = arith.constant 0 : index
    %c0_16 = arith.constant 0 : index
    %19 = vector.load %arg6[%c0_15, %c0_16] : memref<1x7xf32, #tpu.memory_space<vmem>>, vector<1x7xf32>
    %20 = vector.broadcast %19 : vector<1x7xf32> to vector<2x7xf32>
    %21 = arith.addf %18, %20 : vector<2x7xf32>
    %cst_17 = arith.constant dense<0xFF800000> : vector<2xf32>
    %22 = vector.multi_reduction <maximumf>, %21, %cst_17 [1] : vector<2x7xf32> to vector<2xf32>
    %23 = vector.shape_cast %22 : vector<2xf32> to vector<2x1xf32>
    %24 = vector.broadcast %23 : vector<2x1xf32> to vector<2x7xf32>
    %25 = arith.subf %21, %24 : vector<2x7xf32>
    %26 = math.exp %25 : vector<2x7xf32>
    %cst_18 = arith.constant dense<0.000000e+00> : vector<2xf32>
    %27 = vector.multi_reduction <add>, %26, %cst_18 [1] : vector<2x7xf32> to vector<2xf32>
    %28 = vector.shape_cast %27 : vector<2xf32> to vector<2x1xf32>
    %29 = vector.broadcast %28 : vector<2x1xf32> to vector<2x7xf32>
    %30 = arith.divf %26, %29 : vector<2x7xf32>
    %c0_19 = arith.constant 0 : index
    %c0_20 = arith.constant 0 : index
    %31 = vector.load %arg7[%c0_19, %c0_20] : memref<2x7xf32, #tpu.memory_space<vmem>>, vector<2x7xf32>
    tpu.vector_store %arg7[%c0_19, %c0_20], %30 {strides = array<i32>} : memref<2x7xf32, #tpu.memory_space<vmem>>, vector<2x7xf32>,
    return
  }
}

module attributes {stable_mosaic.version = 11 : i64} {
  func.func @_conv_relu_pool_kernel(%arg0: i32, %arg1: i32, %arg2: memref<1x72x288xbf16, #tpu.memory_space<vmem>>, %arg3: memref<288x64xbf16, #tpu.memory_space<vmem>>, %arg4: memref<1x64xf32, #tpu.memory_space<vmem>>, %arg5: memref<72x64xbf16, #tpu.memory_space<vmem>>, %arg6: memref<72x64xf32, #tpu.memory_space<vmem>>) attributes {dimension_semantics = [#tpu.dimension_semantics<parallel>, #tpu.dimension_semantics<arbitrary>], iteration_bounds = array<i64: 1, 4>, scalar_prefetch = 0 : i64, scratch_operands = 1 : i64, tpu.core_type = #tpu.core_type<tc>, window_params = [{transform_indices = @transform_0, window_bounds = array<i64: 1, 72, 288>}, {pipeline_mode = #tpu.pipeline_mode<synchronous>, transform_indices = @transform_1, window_bounds = array<i64: 288, 64>}, {pipeline_mode = #tpu.pipeline_mode<synchronous>, transform_indices = @transform_2, window_bounds = array<i64: 1, 64>}, {transform_indices = @transform_3, window_bounds = array<i64: 72, 64>}]} {
    %c0 = arith.constant 0 : index
    %c0_0 = arith.constant 0 : index
    %c0_1 = arith.constant 0 : index
    %0 = vector.load %arg2[%c0, %c0_0, %c0_1] : memref<1x72x288xbf16, #tpu.memory_space<vmem>>, vector<1x72x288xbf16>
    %1 = vector.shape_cast %0 : vector<1x72x288xbf16> to vector<72x288xbf16>
    %c0_2 = arith.constant 0 : index
    %c0_3 = arith.constant 0 : index
    %2 = vector.load %arg3[%c0_2, %c0_3] : memref<288x64xbf16, #tpu.memory_space<vmem>>, vector<288x64xbf16>
    %cst = arith.constant dense<0.000000e+00> : vector<72x64xf32>
    %3 = tpu.matmul %1, %2, %cst {dimension_numbers = #tpu.dot_dimension_numbers<[1], [0], [0], [1], [0, 0, 1, 1], [], []>} : vector<72x288xbf16>, vector<288x64xbf16>, vector<72x64xf32> -> vector<72x64xf32>
    %c0_4 = arith.constant 0 : index
    %c0_5 = arith.constant 0 : index
    %4 = vector.load %arg4[%c0_4, %c0_5] : memref<1x64xf32, #tpu.memory_space<vmem>>, vector<1x64xf32>
    %5 = vector.broadcast %4 : vector<1x64xf32> to vector<72x64xf32>
    %6 = arith.addf %3, %5 : vector<72x64xf32>
    %cst_6 = arith.constant 0.000000e+00 : f32
    %7 = vector.broadcast %cst_6 : f32 to vector<72x64xf32>
    %8 = arith.maximumf %6, %7 : vector<72x64xf32>
    %c0_i32 = arith.constant 0 : i32
    %9 = arith.cmpi eq, %arg1, %c0_i32 : i32
    %10 = arith.extui %9 : i1 to i32
    %c0_i32_7 = arith.constant 0 : i32
    %11 = arith.cmpi ne, %10, %c0_i32_7 : i32
    scf.if %11 {
      %c0_11 = arith.constant 0 : index
      %c0_12 = arith.constant 0 : index
      %18 = vector.load %arg6[%c0_11, %c0_12] : memref<72x64xf32, #tpu.memory_space<vmem>>, vector<72x64xf32>
      tpu.vector_store %arg6[%c0_11, %c0_12], %8 {strides = array<i32>} : memref<72x64xf32, #tpu.memory_space<vmem>>, vector<72x64xf32>,
    } else {
    }
    %c0_i32_8 = arith.constant 0 : i32
    %12 = arith.cmpi ne, %arg1, %c0_i32_8 : i32
    %13 = arith.extui %12 : i1 to i32
    %c0_i32_9 = arith.constant 0 : i32
    %14 = arith.cmpi ne, %13, %c0_i32_9 : i32
    scf.if %14 {
      %c0_11 = arith.constant 0 : index
      %c0_12 = arith.constant 0 : index
      %18 = vector.load %arg6[%c0_11, %c0_12] : memref<72x64xf32, #tpu.memory_space<vmem>>, vector<72x64xf32>
      %19 = arith.maximumf %18, %8 : vector<72x64xf32>
      %c0_13 = arith.constant 0 : index
      %c0_14 = arith.constant 0 : index
      %20 = vector.load %arg6[%c0_13, %c0_14] : memref<72x64xf32, #tpu.memory_space<vmem>>, vector<72x64xf32>
      tpu.vector_store %arg6[%c0_13, %c0_14], %19 {strides = array<i32>} : memref<72x64xf32, #tpu.memory_space<vmem>>, vector<72x64xf32>,
    } else {
    }
    %c3_i32 = arith.constant 3 : i32
    %15 = arith.cmpi eq, %arg1, %c3_i32 : i32
    %16 = arith.extui %15 : i1 to i32
    %c0_i32_10 = arith.constant 0 : i32
    %17 = arith.cmpi ne, %16, %c0_i32_10 : i32
    scf.if %17 {
      %c0_11 = arith.constant 0 : index
      %c0_12 = arith.constant 0 : index
      %18 = vector.load %arg6[%c0_11, %c0_12] : memref<72x64xf32, #tpu.memory_space<vmem>>, vector<72x64xf32>
      %19 = arith.truncf %18 : vector<72x64xf32> to vector<72x64xbf16>
      %c0_13 = arith.constant 0 : index
      %c0_14 = arith.constant 0 : index
      %20 = vector.load %arg5[%c0_13, %c0_14] : memref<72x64xbf16, #tpu.memory_space<vmem>>, vector<72x64xbf16>
      tpu.vector_store %arg5[%c0_13, %c0_14], %19 {strides = array<i32>} : memref<72x64xbf16, #tpu.memory_space<vmem>>, vector<72x64xbf16>,
    } else {
    }
    return
  }
  func.func @transform_0(%arg0: i32, %arg1: i32) -> (i32, i32, i32) {
    %c0_i32 = arith.constant 0 : i32
    %c0_i32_0 = arith.constant 0 : i32
    return %arg1, %arg0, %c0_i32 : i32, i32, i32
  }
  func.func @transform_1(%arg0: i32, %arg1: i32) -> (i32, i32) {
    %c0_i32 = arith.constant 0 : i32
    %c0_i32_0 = arith.constant 0 : i32
    %c0_i32_1 = arith.constant 0 : i32
    return %c0_i32, %c0_i32_0 : i32, i32
  }
  func.func @transform_2(%arg0: i32, %arg1: i32) -> (i32, i32) {
    %c0_i32 = arith.constant 0 : i32
    %c0_i32_0 = arith.constant 0 : i32
    %c0_i32_1 = arith.constant 0 : i32
    return %c0_i32, %c0_i32_0 : i32, i32
  }
  func.func @transform_3(%arg0: i32, %arg1: i32) -> (i32, i32) {
    %c0_i32 = arith.constant 0 : i32
    %c0_i32_0 = arith.constant 0 : i32
    return %arg0, %c0_i32 : i32, i32
  }
}

</mosaic_0001>

<bundles_post_ra>
// kernel: cnn_forward.4
= control target key start
LH: loop header
LB: loop body
LE: loop exit
PB: predicated region body
PF: predicated region fallthrough
CT: control target
= control target key end

     0   :  { %s2283_s12 = smov 0   ;;  %s2285_s13 = smov 0   ;;  %s3295_s0 = inlined_call_operand.vmem [shape: bf16[4,1152,27], index: 0, kind: input, shape index: {}]   ;;  %s3296_s1 = inlined_call_operand.vmem [shape: bf16[27,16], index: 1, kind: input, shape index: {}]   ;;  %s3297_s2 = inlined_call_operand.vmem [shape: f32[1,16], index: 2, kind: input, shape index: {}]   ;;  %s3298_s3 = inlined_call_operand.vmem [shape: bf16[1152,16], index: 3, kind: output, shape index: {}]  }
   0x1   :  { %s2287_s14 = smov 0   ;;  %s2289_s15 = smov 0  }
   0x2   :  { %s2291_s16 = smov 0  }
   0x3 LB: > { %s22_s17 = sadd.s32 1, %s2252_s14  ;;  %s25_s18 = sadd.s32 1, %s2256_s15  ;;  %s2260_s16 = sphi %s2291_s16, %s13_s16   ;;  %s2256_s15 = sphi %s2289_s15, %s3541_s15   ;;  %s2252_s14 = sphi %s2287_s14, %s3540_s14   ;;  %s2248_s13 = sphi %s2285_s13, %s3539_s13   ;;  %s2244_s12 = sphi %s2283_s12, %s3538_s12  }
   0x4   : > { %p23_p0 = scmp.ge.s32.totalorder %s22_s17, 4  ;;  %p1797_p1 = scmp.ge.s32.totalorder %s2260_s16, 1 }
   0x5   : > { %p156_p2 = scmp.lt.s32.totalorder %s2260_s16, 9 }
   0x6   : > { %s3543_s17 = smov (%p23_p0, %s22_s17), 0  ;;  %s3545_s18 = smov (!%p23_p0, %s25_s18), %s2256_s15 }
   0x7   : > { %p157_p3 = pnand %p1797_p1, %p156_p2  ;;  %p27_p4 = scmp.ge.s32.totalorder %s3545_s18, 2 }
   0x9   : > { %s3547_s18 = smov (%p27_p4, %s3545_s18), 0  ;;  %160 = sbr.rel (%p157_p3) target bundleno = 432 (0x1b0), region = 32 }
  0x10   : > { %v2184_v0 = vld [vmem:[%s3296_s1] sm:$0xff]   ;;  %vm584_vm0 = vcmask 1044480   ;;  %v2185_v1 = vld [vmem:[%s3296_s1 + $0x8] sm:$0x3f]   ;;  %vm585_vm1 = vcmask 1045504   ;;  %s184_s23 = smul.u32 72, %s2248_s13 }
  0x11   : > { %2062 = vmatprep.subr.bf16.mxu0 %v2184_v0  ;;  %2138 = vmatprep.subr.bf16.mxu1 %v2184_v0  ;;  %p185_p5 = scmp.lt.s32.totalorder %s2244_s12, 3  ;;  %v2262_v2 = vmov 65535   ;;  %vm475_vm2 = vcmask 220160   ;;  %v2411_v42 = vld [vmem:[%s3297_s2] ss:$0 sm:$0xff]  ;;  %p1875_p7 = scmp.ne.s32.totalorder %s2244_s12, 0 }
  0x12   : > { %2063 = vmatpush3.bf16.msra.mxu0 %v2184_v0  ;;  %2140 = vmatpush3.bf16.msra.mxu1 %v2184_v0  ;;  %v586_v3 = vsel %vm584_vm0, 4294967295, %v2262_v2  ;;  %p187_p6 = scmp.lt.s32.totalorder %s184_s23, 143  ;;  %vm988_vm3 = vcmask (!%p1875_p7), 130048  }
  0x13   : > { %v587_v4 = vsel %vm585_vm1, %v586_v3, 0  ;;  %s186_s24 = scalar_select %p185_p5, %s2244_s12, 3 }
  0x14   : > { %v589_v5 = vand.u32 %v2185_v1, %v587_v4  ;;  %s3549_s23 = smov (!%p187_p6, %s184_s23), 143 }
  0x15   : > { %s2142_s25 = smul.u32 144, %s186_s24  ;;  %s1799_s27 = sshll.u32 %s3549_s23, 2 }
  0x16   : > { %2064 = vmatprep.subr.bf16.mxu0 %v589_v5  ;;  %2139 = vmatprep.subr.bf16.mxu1 %v589_v5  ;;  %s2329_s4 = scalar_lea.vmem %s3298_s3, %s1799_s27 }
  0x17   : > { %2065 = vmatpush3.bf16.msra.mxu0 %v589_v5  ;;  %2141 = vmatpush3.bf16.msra.mxu1 %v589_v5  ;;  %s190_s26 = sadd.s32 %s2142_s25, %s3549_s23 }
  0x18   : > { %s1798_s28 = sshll.u32 %s190_s26, 2 }
  0x19   : > { %s2334_s7 = scalar_lea.vmem %s3295_s0, %s1798_s28 }
  0x1a   : > { %v2186_v6 = vld [vmem:[%s2334_s7] sm:$0xff]   ;;  %v2187_v7 = vld [vmem:[%s2334_s7 + $0x90] sm:$0xff]   ;;  %v2188_v8 = vld [vmem:[%s2334_s7 + $0x8] sm:$0xff]  }
  0x1b   : > { %2066 = vmatprep.mubr.msk.bf16.mxu0 %vm475_vm2, %v2186_v6  ;;  %2102 = vmatprep.mubr.msk.bf16.mxu1 %vm475_vm2, %v2187_v7  ;;  %v2189_v9 = vld [vmem:[%s2334_s7 + $0x98] sm:$0xff]   ;;  %v2190_v10 = vld [vmem:[%s2334_s7 + $0x10] sm:$0xff]   ;;  %v2191_v11 = vld [vmem:[%s2334_s7 + $0xa0] sm:$0xff]  }
  0x1c   : > { %2067 = vmatmul.mubr.msk.bf16.vlgmr.msra.gmra.mrb[0].mxu0 %vm475_vm2, %v2188_v8  ;;  %2103 = vmatmul.mubr.msk.bf16.vlgmr.msra.gmra.mrb[0].mxu1 %vm475_vm2, %v2189_v9  ;;  %v2192_v12 = vld [vmem:[%s2334_s7 + $0x18] sm:$0xff]   ;;  %v2193_v13 = vld [vmem:[%s2334_s7 + $0xa8] sm:$0xff]   ;;  %v2194_v14 = vld [vmem:[%s2334_s7 + $0x20] sm:$0xff]  }
  0x1d   : > { %2070 = vmatprep.mubr.msk.bf16.mxu0 %vm475_vm2, %v2190_v10  ;;  %2106 = vmatprep.mubr.msk.bf16.mxu1 %vm475_vm2, %v2191_v11  ;;  %v2195_v15 = vld [vmem:[%s2334_s7 + $0xb0] sm:$0xff]   ;;  %v2196_v16 = vld [vmem:[%s2334_s7 + $0x28] sm:$0xff]   ;;  %v2197_v17 = vld [vmem:[%s2334_s7 + $0xb8] sm:$0xff]  }
  0x1e   : > { %v2198_v18 = vld [vmem:[%s2334_s7 + $0x30] sm:$0xff]   ;;  %v2199_v19 = vld [vmem:[%s2334_s7 + $0xc0] sm:$0xff]   ;;  %v2200_v20 = vld [vmem:[%s2334_s7 + $0x38] sm:$0xff]  }
  0x1f   : > { %v2201_v21 = vld [vmem:[%s2334_s7 + $0xc8] sm:$0xff]   ;;  %v2202_v22 = vld [vmem:[%s2334_s7 + $0x40] sm:$0xff]   ;;  %v2203_v23 = vld [vmem:[%s2334_s7 + $0xd0] sm:$0xff]  }
  0x20   : > { %v2204_v24 = vld [vmem:[%s2334_s7 + $0x48] sm:$0xff]   ;;  %v2205_v25 = vld [vmem:[%s2334_s7 + $0xd8] sm:$0xff]   ;;  %v2206_v26 = vld [vmem:[%s2334_s7 + $0x50] sm:$0xff]  }
  0x21   : > { %v2207_v27 = vld [vmem:[%s2334_s7 + $0xe0] sm:$0xff]   ;;  %v2208_v28 = vld [vmem:[%s2334_s7 + $0x58] sm:$0xff]   ;;  %v2209_v29 = vld [vmem:[%s2334_s7 + $0xe8] sm:$0xff]  }
  0x22   : > { %v2210_v30 = vld [vmem:[%s2334_s7 + $0x60] sm:$0xff]   ;;  %v2211_v31 = vld [vmem:[%s2334_s7 + $0xf0] sm:$0xff]   ;;  %v2212_v32 = vld [vmem:[%s2334_s7 + $0x68] sm:$0xff]  }
  0x23   : > { %v2213_v33 = vld [vmem:[%s2334_s7 + $0xf8] sm:$0xff]   ;;  %v2214_v34 = vld [vmem:[%s2334_s7 + $0x70] sm:$0xff]   ;;  %v2215_v35 = vld [vmem:[%s2334_s7 + $0x100] sm:$0xff]  }
  0x24   : > { %2071 = vmatmul.mubr.msk.bf16.gmra.mrb[4].mxu0 %vm475_vm2, %v2192_v12  ;;  %2107 = vmatmul.mubr.msk.bf16.gmra.mrb[4].mxu1 %vm475_vm2, %v2193_v13  ;;  %v2216_v36 = vld [vmem:[%s2334_s7 + $0x78] sm:$0xff]   ;;  %v2217_v37 = vld [vmem:[%s2334_s7 + $0x108] sm:$0xff]   ;;  %v2218_v38 = vld [vmem:[%s2334_s7 + $0x80] sm:$0xff]  }
  0x25   : > { %2074 = vmatprep.mubr.msk.bf16.mxu0 %vm475_vm2, %v2194_v14  ;;  %2110 = vmatprep.mubr.msk.bf16.mxu1 %vm475_vm2, %v2195_v15  ;;  %v2219_v39 = vld [vmem:[%s2334_s7 + $0x110] sm:$0xff]   ;;  %v2220_v40 = vld [vmem:[%s2334_s7 + $0x88] sm:$0xff]   ;;  %v2221_v41 = vld [vmem:[%s2334_s7 + $0x118] sm:$0xff]  }
  0x2c   : > { %2075 = vmatmul.mubr.msk.bf16.gmra.mrb[8].mxu0 %vm475_vm2, %v2196_v16  ;;  %2111 = vmatmul.mubr.msk.bf16.gmra.mrb[8].mxu1 %vm475_vm2, %v2197_v17 }
  0x2d   : > { %2078 = vmatprep.mubr.msk.bf16.mxu0 %vm475_vm2, %v2198_v18  ;;  %2114 = vmatprep.mubr.msk.bf16.mxu1 %vm475_vm2, %v2199_v19 }
  0x34   : > { %2079 = vmatmul.mubr.msk.bf16.gmra.mrb[12].mxu0 %vm475_vm2, %v2200_v20  ;;  %2115 = vmatmul.mubr.msk.bf16.gmra.mrb[12].mxu1 %vm475_vm2, %v2201_v21 }
  0x35   : > { %2082 = vmatprep.mubr.msk.bf16.mxu0 %vm475_vm2, %v2202_v22  ;;  %2118 = vmatprep.mubr.msk.bf16.mxu1 %vm475_vm2, %v2203_v23 }
  0x3c   : > { %2083 = vmatmul.mubr.msk.bf16.gmra.mrb[16].mxu0 %vm475_vm2, %v2204_v24  ;;  %2119 = vmatmul.mubr.msk.bf16.gmra.mrb[16].mxu1 %vm475_vm2, %v2205_v25 }
  0x3d   : > { %2086 = vmatprep.mubr.msk.bf16.mxu0 %vm475_vm2, %v2206_v26  ;;  %2122 = vmatprep.mubr.msk.bf16.mxu1 %vm475_vm2, %v2207_v27 }
  0x44   : > { %2087 = vmatmul.mubr.msk.bf16.gmra.mrb[20].mxu0 %vm475_vm2, %v2208_v28  ;;  %2123 = vmatmul.mubr.msk.bf16.gmra.mrb[20].mxu1 %vm475_vm2, %v2209_v29 }
  0x45   : > { %2090 = vmatprep.mubr.msk.bf16.mxu0 %vm475_vm2, %v2210_v30  ;;  %2126 = vmatprep.mubr.msk.bf16.mxu1 %vm475_vm2, %v2211_v31 }
  0x4c   : > { %2091 = vmatmul.mubr.msk.bf16.gmra.mrb[24].mxu0 %vm475_vm2, %v2212_v32  ;;  %2127 = vmatmul.mubr.msk.bf16.gmra.mrb[24].mxu1 %vm475_vm2, %v2213_v33 }
  0x4d   : > { %2094 = vmatprep.mubr.msk.bf16.mxu0 %vm475_vm2, %v2214_v34  ;;  %2130 = vmatprep.mubr.msk.bf16.mxu1 %vm475_vm2, %v2215_v35 }
  0x54   : > { %2095 = vmatmul.mubr.msk.bf16.gmra.mrb[28].mxu0 %vm475_vm2, %v2216_v36  ;;  %2131 = vmatmul.mubr.msk.bf16.gmra.mrb[28].mxu1 %vm475_vm2, %v2217_v37 }
  0x55   : > { %2098 = vmatprep.mubr.msk.bf16.mxu0 %vm475_vm2, %v2218_v38  ;;  %2134 = vmatprep.mubr.msk.bf16.mxu1 %vm475_vm2, %v2219_v39 }
  0x5c   : > { %2099 = vmatmul.mubr.msk.bf16.gmra.mrb[32].mxu0 %vm475_vm2, %v2220_v40  ;;  %2135 = vmatmul.mubr.msk.bf16.gmra.mrb[32].mxu1 %vm475_vm2, %v2221_v41 }
  0xef   : > { %v2068_v43 = vpop.f32.mrb[0].mxu0  ;;  %v2104_v45 = vpop.f32.mrb[0].mxu1 }
  0xf0   : > { %v2414_v44 = vadd.f32 %v2068_v43, %v2411_v42  ;;  %v625_v46 = vpop.f32.mrb[1].mxu0  ;;  %v2417_v47 = vadd.f32 %v2104_v45, %v2411_v42  ;;  %v769_v49 = vpop.f32.mrb[1].mxu1 }
  0xf1   : > { %v2420_v48 = vadd.f32 %v2411_v42, %v625_v46  ;;  %v2069_v50 = vpop.f32.mrb[2].mxu0  ;;  %v2424_v52 = vadd.f32 %v2411_v42, %v769_v49  ;;  %v2105_v54 = vpop.f32.mrb[2].mxu1 }
  0xf2   : > { %v2427_v53 = vadd.f32 %v2069_v50, %v2411_v42  ;;  %v628_v55 = vpop.f32.mrb[3].mxu0  ;;  %v2432_v58 = vadd.f32 %v2105_v54, %v2411_v42  ;;  %v772_v60 = vpop.f32.mrb[3].mxu1 }
  0xf3   : > { %v2435_v59 = vadd.f32 %v2411_v42, %v628_v55  ;;  %v2440_v63 = vadd.f32 %v2411_v42, %v772_v60 }
  0xf7   : > { %v2072_v3 = vpop.f32.mrb[4].mxu0  ;;  %v2108_v5 = vpop.f32.mrb[4].mxu1 }
  0xf8   : > { %v2446_v4 = vadd.f32 %v2072_v3, %v2411_v42  ;;  %v641_v6 = vpop.f32.mrb[5].mxu0  ;;  %v2449_v7 = vadd.f32 %v2108_v5, %v2411_v42  ;;  %v785_v9 = vpop.f32.mrb[5].mxu1 }
  0xf9   : > { %v2452_v8 = vadd.f32 %v2411_v42, %v641_v6  ;;  %v2073_v10 = vpop.f32.mrb[6].mxu0  ;;  %v2456_v12 = vadd.f32 %v2411_v42, %v785_v9  ;;  %v2109_v14 = vpop.f32.mrb[6].mxu1 }
  0xfa   : > { %v2459_v13 = vadd.f32 %v2073_v10, %v2411_v42  ;;  %v644_v15 = vpop.f32.mrb[7].mxu0  ;;  %v2464_v18 = vadd.f32 %v2109_v14, %v2411_v42  ;;  %v788_v20 = vpop.f32.mrb[7].mxu1 }
  0xfb   : > { %v2467_v19 = vadd.f32 %v2411_v42, %v644_v15  ;;  %v2472_v23 = vadd.f32 %v2411_v42, %v788_v20 }
  0xff   : > { %v2076_v27 = vpop.f32.mrb[8].mxu0  ;;  %v2112_v29 = vpop.f32.mrb[8].mxu1 }
 0x100   : > { %v2478_v28 = vadd.f32 %v2076_v27, %v2411_v42  ;;  %v657_v30 = vpop.f32.mrb[9].mxu0  ;;  %v2481_v31 = vadd.f32 %v2112_v29, %v2411_v42  ;;  %v801_v33 = vpop.f32.mrb[9].mxu1 }
 0x101   : > { %v2484_v32 = vadd.f32 %v2411_v42, %v657_v30  ;;  %v2077_v34 = vpop.f32.mrb[10].mxu0  ;;  %v2488_v36 = vadd.f32 %v2411_v42, %v801_v33  ;;  %v2113_v38 = vpop.f32.mrb[10].mxu1 }
 0x102   : > { %3327 = vst [vmem:[#allocation3_spill] sm:$0xff] %v2481_v31  ;;  %v2491_v37 = vadd.f32 %v2077_v34, %v2411_v42  ;;  %v660_v39 = vpop.f32.mrb[11].mxu0  ;;  %v2496_v43 = vadd.f32 %v2113_v38, %v2411_v42  ;;  %v804_v46 = vpop.f32.mrb[11].mxu1 }
 0x103   : > { %v2499_v45 = vadd.f32 %v2411_v42, %v660_v39  ;;  %v2504_v54 = vadd.f32 %v2411_v42, %v804_v46 }
 0x104   : > { %3328 = vst [vmem:[#allocation4_spill] sm:$0xff] %v2496_v43 }
 0x107   : > { %v2080_v5 = vpop.f32.mrb[12].mxu0  ;;  %v2116_v9 = vpop.f32.mrb[12].mxu1 }
 0x108   : > { %v2510_v6 = vadd.f32 %v2080_v5, %v2411_v42  ;;  %v673_v10 = vpop.f32.mrb[13].mxu0  ;;  %v2513_v14 = vadd.f32 %v2116_v9, %v2411_v42  ;;  %v817_v20 = vpop.f32.mrb[13].mxu1 }
 0x109   : > { %v2516_v15 = vadd.f32 %v2411_v42, %v673_v10  ;;  %v2081_v27 = vpop.f32.mrb[14].mxu0  ;;  %v2520_v30 = vadd.f32 %v2411_v42, %v817_v20  ;;  %v2117_v34 = vpop.f32.mrb[14].mxu1 }
 0x10a   : > { %3329 = vst [vmem:[#allocation5_spill] sm:$0xff] %v2513_v14  ;;  %v2523_v33 = vadd.f32 %v2081_v27, %v2411_v42  ;;  %v676_v38 = vpop.f32.mrb[15].mxu0  ;;  %v2528_v5 = vadd.f32 %v2117_v34, %v2411_v42  ;;  %v820_v10 = vpop.f32.mrb[15].mxu1 }
 0x10b   : > { %3330 = vst [vmem:[#allocation6_spill] sm:$0xff] %v2520_v30  ;;  %v2531_v9 = vadd.f32 %v2411_v42, %v676_v38  ;;  %v2536_v27 = vadd.f32 %v2411_v42, %v820_v10 }
 0x10c   : > { %3331 = vst [vmem:[#allocation7_spill] sm:$0xff] %v2528_v5  ;;  %v3357_v5 = vmax.f32 (!%p1875_p7), %v2452_v8, 0.0 }
 0x10d   : > { %3332 = vst [vmem:[#allocation8_spill] sm:$0xff] %v2536_v27 }
 0x10e   : > { %993 = vst.msk [vmem:[#allocation2 + $0x20] sm:$0xff] (!%p1875_p7), %vm988_vm3, %v3357_v5  ;;  %v3363_v5 = vmax.f32 (!%p1875_p7), %v2478_v28, 0.0 }
 0x10f   : > { %v2084_v49 = vpop.f32.mrb[16].mxu0  ;;  %v2120_v38 = vpop.f32.mrb[16].mxu1 }
 0x110   : > { %v2542_v34 = vadd.f32 %v2084_v49, %v2411_v42  ;;  %v689_v24 = vpop.f32.mrb[17].mxu0  ;;  %v2545_v16 = vadd.f32 %v2120_v38, %v2411_v42  ;;  %v833_v10 = vpop.f32.mrb[17].mxu1  ;;  %999 = vst.msk [vmem:[#allocation2 + $0x50] sm:$0xff] (!%p1875_p7), %vm988_vm3, %v3363_v5 }
 0x111   : > { %v2548_v55 = vadd.f32 %v2411_v42, %v689_v24  ;;  %v2085_v26 = vpop.f32.mrb[18].mxu0  ;;  %v2552_v21 = vadd.f32 %v2411_v42, %v833_v10  ;;  %v2121_v49 = vpop.f32.mrb[18].mxu1 }
 0x112   : > { %3333 = vst [vmem:[#allocation9_spill] sm:$0xff] %v2545_v16  ;;  %v2555_v3 = vadd.f32 %v2085_v26, %v2411_v42  ;;  %v692_v0 = vpop.f32.mrb[19].mxu0  ;;  %v2560_v2 = vadd.f32 %v2121_v49, %v2411_v42  ;;  %v836_v61 = vpop.f32.mrb[19].mxu1 }
 0x113   : > { %3334 = vst [vmem:[#allocation10_spill] sm:$0xff] %v2552_v21  ;;  %v2563_v24 = vadd.f32 %v2411_v42, %v692_v0  ;;  %v2568_v26 = vadd.f32 %v2411_v42, %v836_v61  ;;  %v3369_v5 = vmax.f32 (!%p1875_p7), %v2548_v55, 0.0 }
 0x114   : > { %3335 = vst [vmem:[#allocation11_spill] sm:$0xff] %v2560_v2 }
 0x115   : > { %3336 = vst [vmem:[#allocation12_spill] sm:$0xff] %v2568_v26  ;;  %1005 = vst.msk [vmem:[#allocation2 + $0x80] sm:$0xff] (!%p1875_p7), %vm988_vm3, %v3369_v5 }
 0x117   : > { %v2088_v29 = vpop.f32.mrb[20].mxu0  ;;  %v2124_v0 = vpop.f32.mrb[20].mxu1 }
 0x118   : > { %v2574_v49 = vadd.f32 %v2088_v29, %v2411_v42  ;;  %v705_v39 = vpop.f32.mrb[21].mxu0  ;;  %v2577_v46 = vadd.f32 %v2124_v0, %v2411_v42  ;;  %v849_v61 = vpop.f32.mrb[21].mxu1 }
 0x119   : > { %v2580_v40 = vadd.f32 %v2411_v42, %v705_v39  ;;  %v2089_v10 = vpop.f32.mrb[22].mxu0  ;;  %v2584_v56 = vadd.f32 %v2411_v42, %v849_v61  ;;  %v2125_v29 = vpop.f32.mrb[22].mxu1 }
 0x11a   : > { %3337 = vst [vmem:[#allocation13_spill] sm:$0xff] %v2577_v46  ;;  %v2587_v38 = vadd.f32 %v2089_v10, %v2411_v42  ;;  %v708_v50 = vpop.f32.mrb[23].mxu0  ;;  %v2592_v60 = vadd.f32 %v2125_v29, %v2411_v42  ;;  %v852_v41 = vpop.f32.mrb[23].mxu1  ;;  %v3375_v5 = vmax.f32 (!%p1875_p7), %v2574_v49, 0.0 }
 0x11b   : > { %3338 = vst [vmem:[#allocation14_spill] sm:$0xff] %v2584_v56  ;;  %v2595_v39 = vadd.f32 %v2411_v42, %v708_v50  ;;  %v2600_v10 = vadd.f32 %v2411_v42, %v852_v41 }
 0x11c   : > { %3339 = vst [vmem:[#allocation15_spill] sm:$0xff] %v2592_v60  ;;  %1011 = vst.msk [vmem:[#allocation2 + $0xb0] sm:$0xff] (!%p1875_p7), %vm988_vm3, %v3375_v5 }
 0x11d   : > { %3340 = vst [vmem:[#allocation16_spill] sm:$0xff] %v2600_v10 }
 0x11f   : > { %v2092_v11 = vpop.f32.mrb[24].mxu0  ;;  %v2128_v50 = vpop.f32.mrb[24].mxu1 }
 0x120   : > { %v2606_v29 = vadd.f32 %v2092_v11, %v2411_v42  ;;  %v721_v25 = vpop.f32.mrb[25].mxu0  ;;  %v2609_v17 = vadd.f32 %v2128_v50, %v2411_v42  ;;  %v865_v41 = vpop.f32.mrb[25].mxu1 }
 0x121   : > { %v2612_v20 = vadd.f32 %v2411_v42, %v721_v25  ;;  %v2093_v61 = vpop.f32.mrb[26].mxu0  ;;  %v2616_v35 = vadd.f32 %v2411_v42, %v865_v41  ;;  %v2129_v11 = vpop.f32.mrb[26].mxu1 }
 0x122   : > { %3341 = vst [vmem:[#allocation17_spill] sm:$0xff] %v2609_v17  ;;  %v2619_v0 = vadd.f32 %v2093_v61, %v2411_v42  ;;  %v724_v62 = vpop.f32.mrb[27].mxu0  ;;  %v2624_v1 = vadd.f32 %v2129_v11, %v2411_v42  ;;  %v868_v57 = vpop.f32.mrb[27].mxu1 }
 0x123   : > { %3342 = vst [vmem:[#allocation18_spill] sm:$0xff] %v2616_v35  ;;  %v2627_v25 = vadd.f32 %v2411_v42, %v724_v62  ;;  %v2632_v61 = vadd.f32 %v2411_v42, %v868_v57 }
 0x124   : > { %3343 = vst [vmem:[#allocation19_spill] sm:$0xff] %v2624_v1 }
 0x125   : > { %3344 = vst [vmem:[#allocation20_spill] sm:$0xff] %v2632_v61 }
 0x127   : > { %v2096_v17 = vpop.f32.mrb[28].mxu0  ;;  %v2132_v62 = vpop.f32.mrb[28].mxu1 }
 0x128   : > { %v2638_v11 = vadd.f32 %v2096_v17, %v2411_v42  ;;  %v737_v46 = vpop.f32.mrb[29].mxu0  ;;  %v2641_v10 = vadd.f32 %v2132_v62, %v2411_v42  ;;  %v881_v57 = vpop.f32.mrb[29].mxu1 }
 0x129   : > { %v2644_v22 = vadd.f32 %v2411_v42, %v737_v46  ;;  %v2097_v41 = vpop.f32.mrb[30].mxu0  ;;  %v2648_v51 = vadd.f32 %v2411_v42, %v881_v57  ;;  %v2133_v17 = vpop.f32.mrb[30].mxu1 }
 0x12a   : > { %3345 = vst [vmem:[#allocation21_spill] sm:$0xff] %v2641_v10  ;;  %v2651_v50 = vadd.f32 %v2097_v41, %v2411_v42  ;;  %v740_v1 = vpop.f32.mrb[31].mxu0  ;;  %v2656_v35 = vadd.f32 %v2133_v17, %v2411_v42  ;;  %v884_v56 = vpop.f32.mrb[31].mxu1 }
 0x12b   : > { %3346 = vst [vmem:[#allocation22_spill] sm:$0xff] %v2648_v51  ;;  %v2659_v46 = vadd.f32 %v2411_v42, %v740_v1  ;;  %v2664_v41 = vadd.f32 %v2411_v42, %v884_v56  ;;  %v3381_v5 = vmax.f32 (!%p1875_p7), %v2644_v22, 0.0 }
 0x12c   : > { %3347 = vst [vmem:[#allocation23_spill] sm:$0xff] %v2656_v35 }
 0x12d   : > { %3348 = vst [vmem:[#allocation24_spill] sm:$0xff] %v2664_v41  ;;  %1017 = vst.msk [vmem:[#allocation2 + $0xe0] sm:$0xff] (!%p1875_p7), %vm988_vm3, %v3381_v5  ;;  %v3387_v5 = vmax.f32 (!%p1875_p7), %v2424_v52, 0.0 }
 0x12f   : > { %v2100_v10 = vpop.f32.mrb[32].mxu0  ;;  %v2136_v1 = vpop.f32.mrb[32].mxu1  ;;  %987 = sbr.rel (%p1875_p7) target bundleno = 341 (0x155), region = 36  ;;  %1025 = vst.msk [vmem:[#allocation2 + $0x120] sm:$0xff] (!%p1875_p7), %vm988_vm3, %v3387_v5  ;;  %v3393_v5 = vmax.f32 (!%p1875_p7), %v2449_v7, 0.0 }
 0x130   : > { %v2670_v17 = vadd.f32 %v2100_v10, %v2411_v42  ;;  %v753_v16 = vpop.f32.mrb[33].mxu0  ;;  %v2673_v26 = vadd.f32 %v2136_v1, %v2411_v42  ;;  %v897_v56 = vpop.f32.mrb[33].mxu1  ;;  %v3358_v1 = vmax.f32 (!%p1875_p7), %v2467_v19, 0.0 }
 0x131   : > { %v2676_v60 = vadd.f32 %v2411_v42, %v753_v16  ;;  %v2101_v57 = vpop.f32.mrb[34].mxu0  ;;  %v2680_v61 = vadd.f32 %v2411_v42, %v897_v56  ;;  %v2137_v10 = vpop.f32.mrb[34].mxu1  ;;  %1031 = vst.msk [vmem:[#allocation2 + $0x150] sm:$0xff] (!%p1875_p7), %vm988_vm3, %v3393_v5  ;;  %v3399_v5 = vmax.f32 (!%p1875_p7), %v2520_v30, 0.0 }
 0x132   : > { %3349 = vst [vmem:[#allocation25_spill] sm:$0xff] %v2673_v26  ;;  %v2683_v62 = vadd.f32 %v2101_v57, %v2411_v42  ;;  %v756_v35 = vpop.f32.mrb[35].mxu0  ;;  %v2688_v51 = vadd.f32 %v2137_v10, %v2411_v42  ;;  %v900_v21 = vpop.f32.mrb[35].mxu1  ;;  %v3354_v10 = vmax.f32 (!%p1875_p7), %v2435_v59, 0.0  ;;  %994 = vst.msk [vmem:[#allocation2 + $0x28] sm:$0xff] (!%p1875_p7), %vm988_vm3, %v3358_v1  ;;  %v3364_v1 = vmax.f32 (!%p1875_p7), %v2491_v37, 0.0 }
 0x133   : > { %3350 = vst [vmem:[#allocation26_spill] sm:$0xff] %v2680_v61  ;;  %v2691_v16 = vadd.f32 %v2411_v42, %v756_v35  ;;  %v2696_v57 = vadd.f32 %v2411_v42, %v900_v21  ;;  %v3353_v35 = vmax.f32 (!%p1875_p7), %v2420_v48, 0.0  ;;  %v3355_v42 = vmax.f32 (!%p1875_p7), %v2414_v44, 0.0  ;;  %1037 = vst.msk [vmem:[#allocation2 + $0x180] sm:$0xff] (!%p1875_p7), %vm988_vm3, %v3399_v5  ;;  %v3408_v5 = vld [vmem:[#allocation9_spill] sm:$0xff] (!%p1875_p7) }
 0x134   : > { %3351 = vst [vmem:[#allocation27_spill] sm:$0xff] %v2688_v51  ;;  %v3316_v56 = vmax.f32 %v2683_v62, 0.0  ;;  %990 = vst.msk [vmem:[#allocation2 + $0x8] sm:$0xff] (!%p1875_p7), %vm988_vm3, %v3354_v10  ;;  %v3356_v21 = vmax.f32 (!%p1875_p7), %v2427_v53, 0.0  ;;  %v3360_v10 = vmax.f32 (!%p1875_p7), %v2459_v13, 0.0 }
 0x135   : > { %3352 = vst [vmem:[#allocation28_spill] sm:$0xff] %v2696_v57  ;;  %v3317_v41 = vmax.f32 %v2691_v16, 0.0  ;;  %989 = vst.msk [vmem:[#allocation2] sm:$0xff] (!%p1875_p7), %vm988_vm3, %v3353_v35  ;;  %v3359_v35 = vmax.f32 (!%p1875_p7), %v2446_v4, 0.0 }
 0x136   : > { %991 = vst.msk [vmem:[#allocation2 + $0x10] sm:$0xff] %vm988_vm3, %v3355_v42  ;;  %992 = vst.msk [vmem:[#allocation2 + $0x18] sm:$0xff] %vm988_vm3, %v3356_v21  ;;  %v3361_v42 = vmax.f32 %v2484_v32, 0.0  ;;  %v3362_v21 = vmax.f32 %v2499_v45, 0.0 }
 0x137   : > { %995 = vst.msk [vmem:[#allocation2 + $0x30] sm:$0xff] %vm988_vm3, %v3359_v35  ;;  %996 = vst.msk [vmem:[#allocation2 + $0x38] sm:$0xff] %vm988_vm3, %v3360_v10  ;;  %v3365_v35 = vmax.f32 %v2516_v15, 0.0  ;;  %v3366_v10 = vmax.f32 %v2531_v9, 0.0 }
 0x138   : > { %997 = vst.msk [vmem:[#allocation2 + $0x40] sm:$0xff] %vm988_vm3, %v3361_v42  ;;  %998 = vst.msk [vmem:[#allocation2 + $0x48] sm:$0xff] %vm988_vm3, %v3362_v21  ;;  %v3367_v42 = vmax.f32 %v2510_v6, 0.0  ;;  %v3368_v21 = vmax.f32 %v2523_v33, 0.0 }
 0x139   : > { %1000 = vst.msk [vmem:[#allocation2 + $0x58] sm:$0xff] %vm988_vm3, %v3364_v1  ;;  %1001 = vst.msk [vmem:[#allocation2 + $0x60] sm:$0xff] %vm988_vm3, %v3365_v35  ;;  %v3370_v1 = vmax.f32 %v2563_v24, 0.0  ;;  %v3371_v35 = vmax.f32 %v2542_v34, 0.0 }
 0x13a   : > { %1002 = vst.msk [vmem:[#allocation2 + $0x68] sm:$0xff] %vm988_vm3, %v3366_v10  ;;  %1003 = vst.msk [vmem:[#allocation2 + $0x70] sm:$0xff] %vm988_vm3, %v3367_v42  ;;  %v3372_v10 = vmax.f32 %v2555_v3, 0.0  ;;  %v3373_v42 = vmax.f32 %v2580_v40, 0.0 }
 0x13b   : > { %1004 = vst.msk [vmem:[#allocation2 + $0x78] sm:$0xff] %vm988_vm3, %v3368_v21  ;;  %1006 = vst.msk [vmem:[#allocation2 + $0x88] sm:$0xff] %vm988_vm3, %v3370_v1  ;;  %v3374_v21 = vmax.f32 %v2595_v39, 0.0  ;;  %v3376_v1 = vmax.f32 %v2587_v38, 0.0 }
 0x13c   : > { %1007 = vst.msk [vmem:[#allocation2 + $0x90] sm:$0xff] %vm988_vm3, %v3371_v35  ;;  %1008 = vst.msk [vmem:[#allocation2 + $0x98] sm:$0xff] %vm988_vm3, %v3372_v10  ;;  %v3377_v35 = vmax.f32 %v2612_v20, 0.0  ;;  %v3378_v10 = vmax.f32 %v2627_v25, 0.0 }
 0x13d   : > { %1009 = vst.msk [vmem:[#allocation2 + $0xa0] sm:$0xff] %vm988_vm3, %v3373_v42  ;;  %1010 = vst.msk [vmem:[#allocation2 + $0xa8] sm:$0xff] %vm988_vm3, %v3374_v21  ;;  %v3379_v42 = vmax.f32 %v2606_v29, 0.0  ;;  %v3380_v21 = vmax.f32 %v2619_v0, 0.0 }
 0x13e   : > { %1012 = vst.msk [vmem:[#allocation2 + $0xb8] sm:$0xff] %vm988_vm3, %v3376_v1  ;;  %1013 = vst.msk [vmem:[#allocation2 + $0xc0] sm:$0xff] %vm988_vm3, %v3377_v35  ;;  %v3382_v1 = vmax.f32 %v2659_v46, 0.0  ;;  %v3383_v35 = vmax.f32 %v2638_v11, 0.0 }
 0x13f   : > { %1014 = vst.msk [vmem:[#allocation2 + $0xc8] sm:$0xff] %vm988_vm3, %v3378_v10  ;;  %1015 = vst.msk [vmem:[#allocation2 + $0xd0] sm:$0xff] %vm988_vm3, %v3379_v42  ;;  %v3384_v10 = vmax.f32 %v2651_v50, 0.0  ;;  %v3385_v42 = vmax.f32 %v2676_v60, 0.0 }
 0x140   : > { %1016 = vst.msk [vmem:[#allocation2 + $0xd8] sm:$0xff] %vm988_vm3, %v3380_v21  ;;  %1018 = vst.msk [vmem:[#allocation2 + $0xe8] sm:$0xff] %vm988_vm3, %v3382_v1  ;;  %v3386_v21 = vmax.f32 %v2670_v17, 0.0  ;;  %v3388_v1 = vmax.f32 %v2440_v63, 0.0 }
 0x141   : > { %1019 = vst.msk [vmem:[#allocation2 + $0xf0] sm:$0xff] %vm988_vm3, %v3383_v35  ;;  %1020 = vst.msk [vmem:[#allocation2 + $0xf8] sm:$0xff] %vm988_vm3, %v3384_v10  ;;  %v3389_v35 = vmax.f32 %v2417_v47, 0.0  ;;  %v3390_v10 = vmax.f32 %v2432_v58, 0.0 }
 0x142   : > { %1021 = vst.msk [vmem:[#allocation2 + $0x100] sm:$0xff] %vm988_vm3, %v3385_v42  ;;  %1022 = vst.msk [vmem:[#allocation2 + $0x108] sm:$0xff] %vm988_vm3, %v3317_v41  ;;  %v3391_v42 = vmax.f32 %v2456_v12, 0.0 }
 0x143   : > { %1023 = vst.msk [vmem:[#allocation2 + $0x110] sm:$0xff] %vm988_vm3, %v3386_v21  ;;  %1024 = vst.msk [vmem:[#allocation2 + $0x118] sm:$0xff] %vm988_vm3, %v3316_v56  ;;  %v3392_v21 = vmax.f32 %v2472_v23, 0.0 }
 0x144   : > { %1026 = vst.msk [vmem:[#allocation2 + $0x128] sm:$0xff] %vm988_vm3, %v3388_v1  ;;  %1027 = vst.msk [vmem:[#allocation2 + $0x130] sm:$0xff] %vm988_vm3, %v3389_v35  ;;  %v3394_v1 = vmax.f32 %v2464_v18, 0.0  ;;  %v3395_v35 = vmax.f32 %v2488_v36, 0.0 }
 0x145   : > { %1028 = vst.msk [vmem:[#allocation2 + $0x138] sm:$0xff] %vm988_vm3, %v3390_v10  ;;  %1029 = vst.msk [vmem:[#allocation2 + $0x140] sm:$0xff] %vm988_vm3, %v3391_v42  ;;  %v3396_v10 = vmax.f32 %v2504_v54, 0.0  ;;  %v3397_v42 = vmax.f32 %v2481_v31, 0.0 }
 0x146   : > { %1030 = vst.msk [vmem:[#allocation2 + $0x148] sm:$0xff] %vm988_vm3, %v3392_v21  ;;  %1032 = vst.msk [vmem:[#allocation2 + $0x158] sm:$0xff] %vm988_vm3, %v3394_v1  ;;  %v3398_v21 = vmax.f32 %v2496_v43, 0.0  ;;  %v3400_v1 = vmax.f32 %v2536_v27, 0.0  ;;  %v3409_v27 = vmax.f32 %v3408_v5, 0.0 }
 0x147   : > { %1033 = vst.msk [vmem:[#allocation2 + $0x160] sm:$0xff] %vm988_vm3, %v3395_v35  ;;  %1034 = vst.msk [vmem:[#allocation2 + $0x168] sm:$0xff] %vm988_vm3, %v3396_v10  ;;  %v3401_v35 = vmax.f32 %v2513_v14, 0.0  ;;  %v3402_v10 = vld [vmem:[#allocation7_spill] sm:$0xff] }
 0x148   : > { %1035 = vst.msk [vmem:[#allocation2 + $0x170] sm:$0xff] %vm988_vm3, %v3397_v42  ;;  %1036 = vst.msk [vmem:[#allocation2 + $0x178] sm:$0xff] %vm988_vm3, %v3398_v21  ;;  %v3403_v56 = vmax.f32 %v3402_v10, 0.0  ;;  %v3404_v42 = vld [vmem:[#allocation10_spill] sm:$0xff]  ;;  %v3406_v21 = vld [vmem:[#allocation12_spill] sm:$0xff] }
 0x149   : > { %1038 = vst.msk [vmem:[#allocation2 + $0x188] sm:$0xff] %vm988_vm3, %v3400_v1  ;;  %1039 = vst.msk [vmem:[#allocation2 + $0x190] sm:$0xff] %vm988_vm3, %v3401_v35  ;;  %v3405_v41 = vmax.f32 %v3404_v42, 0.0  ;;  %v3407_v2 = vmax.f32 %v3406_v21, 0.0  ;;  %v3410_v1 = vld [vmem:[#allocation11_spill] sm:$0xff]  ;;  %v3412_v35 = vld [vmem:[#allocation14_spill] sm:$0xff] }
 0x14a   : > { %1040 = vst.msk [vmem:[#allocation2 + $0x198] sm:$0xff] %vm988_vm3, %v3403_v56  ;;  %1043 = vst.msk [vmem:[#allocation2 + $0x1b0] sm:$0xff] %vm988_vm3, %v3409_v27  ;;  %v3411_v14 = vmax.f32 %v3410_v1, 0.0  ;;  %v3413_v10 = vmax.f32 %v3412_v35, 0.0  ;;  %v3414_v56 = vld [vmem:[#allocation16_spill] sm:$0xff]  ;;  %v3420_v27 = vld [vmem:[#allocation18_spill] sm:$0xff] }
 0x14b   : > { %1041 = vst.msk [vmem:[#allocation2 + $0x1a0] sm:$0xff] %vm988_vm3, %v3405_v41  ;;  %1042 = vst.msk [vmem:[#allocation2 + $0x1a8] sm:$0xff] %vm988_vm3, %v3407_v2  ;;  %v3415_v42 = vmax.f32 %v3414_v56, 0.0  ;;  %v3416_v41 = vld [vmem:[#allocation13_spill] sm:$0xff]  ;;  %v3418_v2 = vld [vmem:[#allocation15_spill] sm:$0xff]  ;;  %v3421_v1 = vmax.f32 %v3420_v27, 0.0 }
 0x14c   : > { %1044 = vst.msk [vmem:[#allocation2 + $0x1b8] sm:$0xff] %vm988_vm3, %v3411_v14  ;;  %1045 = vst.msk [vmem:[#allocation2 + $0x1c0] sm:$0xff] %vm988_vm3, %v3413_v10  ;;  %v3417_v21 = vmax.f32 %v3416_v41, 0.0  ;;  %v3419_v5 = vmax.f32 %v3418_v2, 0.0  ;;  %v3422_v14 = vld [vmem:[#allocation20_spill] sm:$0xff]  ;;  %v3424_v10 = vld [vmem:[#allocation17_spill] sm:$0xff] }
 0x14d   : > { %1046 = vst.msk [vmem:[#allocation2 + $0x1c8] sm:$0xff] %vm988_vm3, %v3415_v42  ;;  %1049 = vst.msk [vmem:[#allocation2 + $0x1e0] sm:$0xff] %vm988_vm3, %v3421_v1  ;;  %v3423_v35 = vmax.f32 %v3422_v14, 0.0  ;;  %v3425_v56 = vmax.f32 %v3424_v10, 0.0  ;;  %v3426_v42 = vld [vmem:[#allocation19_spill] sm:$0xff]  ;;  %v3432_v1 = vld [vmem:[#allocation21_spill] sm:$0xff] }
 0x14e   : > { %1047 = vst.msk [vmem:[#allocation2 + $0x1d0] sm:$0xff] %vm988_vm3, %v3417_v21  ;;  %1048 = vst.msk [vmem:[#allocation2 + $0x1d8] sm:$0xff] %vm988_vm3, %v3419_v5  ;;  %v3427_v41 = vmax.f32 %v3426_v42, 0.0  ;;  %v3428_v21 = vld [vmem:[#allocation22_spill] sm:$0xff]  ;;  %v3430_v5 = vld [vmem:[#allocation24_spill] sm:$0xff]  ;;  %v3433_v14 = vmax.f32 %v3432_v1, 0.0 }
 0x14f   : > { %1050 = vst.msk [vmem:[#allocation2 + $0x1e8] sm:$0xff] %vm988_vm3, %v3423_v35  ;;  %1051 = vst.msk [vmem:[#allocation2 + $0x1f0] sm:$0xff] %vm988_vm3, %v3425_v56  ;;  %v3429_v2 = vmax.f32 %v3428_v21, 0.0  ;;  %v3431_v27 = vmax.f32 %v3430_v5, 0.0  ;;  %v3434_v35 = vld [vmem:[#allocation23_spill] sm:$0xff]  ;;  %v3436_v56 = vmax.f32 %v2680_v61, 0.0 }
 0x150   : > { %1052 = vst.msk [vmem:[#allocation2 + $0x1f8] sm:$0xff] %vm988_vm3, %v3427_v41  ;;  %1055 = vst.msk [vmem:[#allocation2 + $0x210] sm:$0xff] %vm988_vm3, %v3433_v14  ;;  %v3435_v10 = vmax.f32 %v3434_v35, 0.0  ;;  %v3437_v42 = vmax.f32 %v2696_v57, 0.0  ;;  %v3438_v41 = vmax.f32 %v2673_v26, 0.0  ;;  %v3439_v21 = vmax.f32 %v2688_v51, 0.0 }
 0x151   : > { %1053 = vst.msk [vmem:[#allocation2 + $0x200] sm:$0xff] %vm988_vm3, %v3429_v2  ;;  %1054 = vst.msk [vmem:[#allocation2 + $0x208] sm:$0xff] %vm988_vm3, %v3431_v27 }
 0x152   : > { %1056 = vst.msk [vmem:[#allocation2 + $0x218] sm:$0xff] %vm988_vm3, %v3435_v10  ;;  %1057 = vst.msk [vmem:[#allocation2 + $0x220] sm:$0xff] %vm988_vm3, %v3436_v56 }
 0x153   : > { %1058 = vst.msk [vmem:[#allocation2 + $0x228] sm:$0xff] %vm988_vm3, %v3437_v42  ;;  %1059 = vst.msk [vmem:[#allocation2 + $0x230] sm:$0xff] %vm988_vm3, %v3438_v41 }
 0x154   : > { %1060 = vst.msk [vmem:[#allocation2 + $0x238] sm:$0xff] %vm988_vm3, %v3439_v21 }
 0x155 PF: > { %p1876_p8 = scmp.eq.s32.totalorder %s2244_s12, 0 }
 0x156   : > { %vm1209_vm4 = vcmask (!%p1876_p8), 130048   ;;  %v3440_v1 = vmax.f32 (!%p1876_p8), %v2420_v48, 0.0  ;;  %v3441_v35 = vmax.f32 (!%p1876_p8), %v2435_v59, 0.0  ;;  %v3442_v56 = vmax.f32 (!%p1876_p8), %v2414_v44, 0.0  ;;  %v1069_v51 = vld [vmem:[#allocation2 + $0x20] sm:$0xff] (!%p1876_p8)  ;;  %v1071_v48 = vld [vmem:[#allocation2 + $0x30] sm:$0xff] (!%p1876_p8) }
 0x157   : > { %1064 = sbr.rel (%p1876_p8) target bundleno = 391 (0x187), region = 40  ;;  %v3443_v26 = vmax.f32 (!%p1876_p8), %v2427_v53, 0.0  ;;  %v3444_v61 = vmax.f32 (!%p1876_p8), %v2452_v8, 0.0  ;;  %v3445_v43 = vmax.f32 (!%p1876_p8), %v2467_v19, 0.0  ;;  %v3446_v44 = vmax.f32 (!%p1876_p8), %v2446_v4, 0.0  ;;  %v1074_v19 = vld [vmem:[#allocation2 + $0x48] sm:$0xff] (!%p1876_p8) }
 0x158   : > { %v1070_v21 = vld [vmem:[#allocation2 + $0x28] sm:$0xff] (!%p1876_p8)  ;;  %v3447_v53 = vmax.f32 (!%p1876_p8), %v2459_v13, 0.0  ;;  %v3450_v4 = vmax.f32 (!%p1876_p8), %v2478_v28, 0.0  ;;  %v3451_v13 = vmax.f32 (!%p1876_p8), %v2491_v37, 0.0  ;;  %v3454_v28 = vmax.f32 (!%p1876_p8), %v2510_v6, 0.0  ;;  %v1080_v37 = vld [vmem:[#allocation2 + $0x78] sm:$0xff] (!%p1876_p8) }
 0x159   : > { %v1141_v30 = vmax.f32 (!%p1876_p8), %v1069_v51, %v3444_v61  ;;  %v1142_v31 = vmax.f32 (!%p1876_p8), %v1070_v21, %v3445_v43  ;;  %v1143_v59 = vmax.f32 (!%p1876_p8), %v1071_v48, %v3446_v44  ;;  %v3448_v51 = vmax.f32 (!%p1876_p8), %v2484_v32, 0.0  ;;  %v1075_v43 = vld [vmem:[#allocation2 + $0x50] sm:$0xff] (!%p1876_p8)  ;;  %v1076_v61 = vld [vmem:[#allocation2 + $0x58] sm:$0xff] (!%p1876_p8)  ;;  %v1077_v32 = vld [vmem:[#allocation2 + $0x60] sm:$0xff] (!%p1876_p8) }
 0x15a   : > { %v1066_v5 = vld [vmem:[#allocation2 + $0x8] sm:$0xff] (!%p1876_p8)  ;;  %v3455_v48 = vmax.f32 (!%p1876_p8), %v2523_v33, 0.0  ;;  %v1083_v6 = vld [vmem:[#allocation2 + $0x90] sm:$0xff] (!%p1876_p8)  ;;  %v3459_v33 = vmax.f32 (!%p1876_p8), %v2555_v3, 0.0  ;;  %v3463_v3 = vmax.f32 (!%p1876_p8), %v2587_v38, 0.0  ;;  %v1092_v38 = vld [vmem:[#allocation2 + $0xd8] sm:$0xff] (!%p1876_p8) }
 0x15b   : > { %v1065_v2 = vld [vmem:[#allocation2] sm:$0xff] (!%p1876_p8)  ;;  %v1138_v10 = vmax.f32 (!%p1876_p8), %v1066_v5, %v3441_v35  ;;  %1214 = vst.msk [vmem:[#allocation2 + $0x20] sm:$0xff] (!%p1876_p8), %vm1209_vm4, %v1141_v30  ;;  %1215 = vst.msk [vmem:[#allocation2 + $0x28] sm:$0xff] (!%p1876_p8), %vm1209_vm4, %v1142_v31  ;;  %v3449_v5 = vmax.f32 (!%p1876_p8), %v2499_v45, 0.0  ;;  %v1148_v35 = vmax.f32 (!%p1876_p8), %v1076_v61, %v3451_v13  ;;  %v3452_v31 = vmax.f32 (!%p1876_p8), %v2516_v15, 0.0  ;;  %v1082_v21 = vld [vmem:[#allocation2 + $0x88] sm:$0xff] (!%p1876_p8) }
 0x15c   : > { %v1067_v27 = vld [vmem:[#allocation2 + $0x10] sm:$0xff] (!%p1876_p8)  ;;  %v1137_v14 = vmax.f32 (!%p1876_p8), %v1065_v2, %v3440_v1  ;;  %v1068_v41 = vld [vmem:[#allocation2 + $0x18] sm:$0xff] (!%p1876_p8)  ;;  %v1073_v1 = vld [vmem:[#allocation2 + $0x40] sm:$0xff] (!%p1876_p8)  ;;  %1216 = vst.msk [vmem:[#allocation2 + $0x30] sm:$0xff] (!%p1876_p8), %vm1209_vm4, %v1143_v59  ;;  %v3453_v45 = vmax.f32 (!%p1876_p8), %v2531_v9, 0.0  ;;  %v3456_v15 = vmax.f32 (!%p1876_p8), %v2548_v55, 0.0 }
 0x15d   : > { %v1139_v42 = vmax.f32 (!%p1876_p8), %v1067_v27, %v3442_v56  ;;  %v1140_v57 = vmax.f32 (!%p1876_p8), %v1068_v41, %v3443_v26  ;;  %v1072_v2 = vld [vmem:[#allocation2 + $0x38] sm:$0xff] (!%p1876_p8)  ;;  %1211 = vst.msk [vmem:[#allocation2 + $0x8] sm:$0xff] (!%p1876_p8), %vm1209_vm4, %v1138_v10  ;;  %v1145_v8 = vmax.f32 (!%p1876_p8), %v1073_v1, %v3448_v51  ;;  %v1146_v27 = vmax.f32 (!%p1876_p8), %v1074_v19, %v3449_v5  ;;  %v1078_v10 = vld [vmem:[#allocation2 + $0x68] sm:$0xff] (!%p1876_p8)  ;;  %v1079_v56 = vld [vmem:[#allocation2 + $0x70] sm:$0xff] (!%p1876_p8) }
 0x15e   : > { %1210 = vst.msk [vmem:[#allocation2] sm:$0xff] %vm1209_vm4, %v1137_v14  ;;  %v1144_v26 = vmax.f32 %v1072_v2, %v3447_v53  ;;  %v1147_v14 = vmax.f32 %v1075_v43, %v3450_v4  ;;  %v1149_v30 = vmax.f32 %v1077_v32, %v3452_v31  ;;  %v1081_v41 = vld [vmem:[#allocation2 + $0x80] sm:$0xff]  ;;  %1221 = vst.msk [vmem:[#allocation2 + $0x58] sm:$0xff] %vm1209_vm4, %v1148_v35  ;;  %v3457_v9 = vmax.f32 %v2563_v24, 0.0  ;;  %v1084_v59 = vld [vmem:[#allocation2 + $0x98] sm:$0xff] }
 0x15f   : > { %1212 = vst.msk [vmem:[#allocation2 + $0x10] sm:$0xff] %vm1209_vm4, %v1139_v42  ;;  %1213 = vst.msk [vmem:[#allocation2 + $0x18] sm:$0xff] %vm1209_vm4, %v1140_v57  ;;  %v1150_v57 = vmax.f32 %v1078_v10, %v3453_v45  ;;  %v1151_v42 = vmax.f32 %v1079_v56, %v3454_v28  ;;  %v1152_v2 = vmax.f32 %v1080_v37, %v3455_v48  ;;  %v1085_v53 = vld [vmem:[#allocation2 + $0xa0] sm:$0xff]  ;;  %v3460_v55 = vmax.f32 %v2580_v40, 0.0  ;;  %v1086_v24 = vld [vmem:[#allocation2 + $0xa8] sm:$0xff] }
 0x160   : > { %1217 = vst.msk [vmem:[#allocation2 + $0x38] sm:$0xff] %vm1209_vm4, %v1144_v26  ;;  %1218 = vst.msk [vmem:[#allocation2 + $0x40] sm:$0xff] %vm1209_vm4, %v1145_v8  ;;  %v1153_v1 = vmax.f32 %v1081_v41, %v3456_v15  ;;  %v1154_v44 = vmax.f32 %v1082_v21, %v3457_v9  ;;  %v3458_v26 = vmax.f32 %v2542_v34, 0.0  ;;  %v1156_v8 = vmax.f32 %v1084_v59, %v3459_v33  ;;  %v1087_v43 = vld [vmem:[#allocation2 + $0xb0] sm:$0xff]  ;;  %v1088_v61 = vld [vmem:[#allocation2 + $0xb8] sm:$0xff] }
 0x161   : > { %1219 = vst.msk [vmem:[#allocation2 + $0x48] sm:$0xff] %vm1209_vm4, %v1146_v27  ;;  %1220 = vst.msk [vmem:[#allocation2 + $0x50] sm:$0xff] %vm1209_vm4, %v1147_v14  ;;  %v1157_v19 = vmax.f32 %v1085_v53, %v3460_v55  ;;  %v3461_v5 = vmax.f32 %v2595_v39, 0.0  ;;  %v3462_v34 = vmax.f32 %v2574_v49, 0.0  ;;  %v1160_v14 = vmax.f32 %v1088_v61, %v3463_v3  ;;  %v1089_v40 = vld [vmem:[#allocation2 + $0xc0] sm:$0xff]  ;;  %v1090_v13 = vld [vmem:[#allocation2 + $0xc8] sm:$0xff] }
 0x162   : > { %1222 = vst.msk [vmem:[#allocation2 + $0x60] sm:$0xff] %vm1209_vm4, %v1149_v30  ;;  %1223 = vst.msk [vmem:[#allocation2 + $0x68] sm:$0xff] %vm1209_vm4, %v1150_v57  ;;  %v1155_v51 = vmax.f32 %v1083_v6, %v3458_v26  ;;  %v1091_v35 = vld [vmem:[#allocation2 + $0xd0] sm:$0xff]  ;;  %v3464_v32 = vmax.f32 %v2612_v20, 0.0  ;;  %v3465_v39 = vmax.f32 %v2627_v25, 0.0  ;;  %v3466_v49 = vmax.f32 %v2606_v29, 0.0 }
 0x163   : > { %1224 = vst.msk [vmem:[#allocation2 + $0x70] sm:$0xff] %vm1209_vm4, %v1151_v42  ;;  %1225 = vst.msk [vmem:[#allocation2 + $0x78] sm:$0xff] %vm1209_vm4, %v1152_v2  ;;  %v1158_v27 = vmax.f32 %v1086_v24, %v3461_v5  ;;  %v1159_v4 = vmax.f32 %v1087_v43, %v3462_v34  ;;  %v1093_v30 = vld [vmem:[#allocation2 + $0xe0] sm:$0xff]  ;;  %v1094_v45 = vld [vmem:[#allocation2 + $0xe8] sm:$0xff]  ;;  %v3467_v57 = vmax.f32 %v2619_v0, 0.0  ;;  %v3468_v20 = vmax.f32 %v2644_v22, 0.0 }
 0x164   : > { %1226 = vst.msk [vmem:[#allocation2 + $0x80] sm:$0xff] %vm1209_vm4, %v1153_v1  ;;  %1227 = vst.msk [vmem:[#allocation2 + $0x88] sm:$0xff] %vm1209_vm4, %v1154_v44  ;;  %v1161_v10 = vmax.f32 %v1089_v40, %v3464_v32  ;;  %v1162_v56 = vmax.f32 %v1090_v13, %v3465_v39  ;;  %v1163_v31 = vmax.f32 %v1091_v35, %v3466_v49  ;;  %v3469_v25 = vmax.f32 %v2659_v46, 0.0  ;;  %v1095_v29 = vld [vmem:[#allocation2 + $0xf0] sm:$0xff]  ;;  %v1096_v41 = vld [vmem:[#allocation2 + $0xf8] sm:$0xff] }
 0x165   : > { %1228 = vst.msk [vmem:[#allocation2 + $0x90] sm:$0xff] %vm1209_vm4, %v1155_v51  ;;  %1229 = vst.msk [vmem:[#allocation2 + $0x98] sm:$0xff] %vm1209_vm4, %v1156_v8  ;;  %v1164_v28 = vmax.f32 %v1092_v38, %v3467_v57  ;;  %v1165_v42 = vmax.f32 %v1093_v30, %v3468_v20  ;;  %v1097_v21 = vld [vmem:[#allocation2 + $0x100] sm:$0xff]  ;;  %v3470_v48 = vmax.f32 %v2638_v11, 0.0  ;;  %v3471_v0 = vmax.f32 %v2651_v50, 0.0  ;;  %v1098_v46 = vld [vmem:[#allocation2 + $0x108] sm:$0xff] }
 0x166   : > { %1230 = vst.msk [vmem:[#allocation2 + $0xa0] sm:$0xff] %vm1209_vm4, %v1157_v19  ;;  %1231 = vst.msk [vmem:[#allocation2 + $0xa8] sm:$0xff] %vm1209_vm4, %v1158_v27  ;;  %v1166_v37 = vmax.f32 %v1094_v45, %v3469_v25  ;;  %v3472_v22 = vmax.f32 %v2676_v60, 0.0  ;;  %v1099_v9 = vld [vmem:[#allocation2 + $0x110] sm:$0xff]  ;;  %v1100_v44 = vld [vmem:[#allocation2 + $0x118] sm:$0xff]  ;;  %v3473_v6 = vmax.f32 %v2691_v16, 0.0 }
 0x167   : > { %1232 = vst.msk [vmem:[#allocation2 + $0xb0] sm:$0xff] %vm1209_vm4, %v1159_v4  ;;  %1233 = vst.msk [vmem:[#allocation2 + $0xb8] sm:$0xff] %vm1209_vm4, %v1160_v14  ;;  %v1167_v2 = vmax.f32 %v1095_v29, %v3470_v48  ;;  %v1168_v15 = vmax.f32 %v1096_v41, %v3471_v0  ;;  %v3474_v11 = vmax.f32 %v2670_v17, 0.0  ;;  %v3475_v50 = vmax.f32 %v2683_v62, 0.0  ;;  %v1101_v60 = vld [vmem:[#allocation2 + $0x120] sm:$0xff]  ;;  %v1102_v51 = vld [vmem:[#allocation2 + $0x128] sm:$0xff] }
 0x168   : > { %1234 = vst.msk [vmem:[#allocation2 + $0xc0] sm:$0xff] %vm1209_vm4, %v1161_v10  ;;  %1235 = vst.msk [vmem:[#allocation2 + $0xc8] sm:$0xff] %vm1209_vm4, %v1162_v56  ;;  %v1169_v1 = vmax.f32 %v1097_v21, %v3472_v22  ;;  %v1170_v59 = vmax.f32 %v1098_v46, %v3473_v6  ;;  %v1103_v33 = vld [vmem:[#allocation2 + $0x130] sm:$0xff]  ;;  %v3476_v8 = vmax.f32 %v2424_v52, 0.0  ;;  %v3477_v16 = vmax.f32 %v2440_v63, 0.0  ;;  %v1104_v62 = vld [vmem:[#allocation2 + $0x138] sm:$0xff] }
 0x169   : > { %1236 = vst.msk [vmem:[#allocation2 + $0xd0] sm:$0xff] %vm1209_vm4, %v1163_v31  ;;  %1237 = vst.msk [vmem:[#allocation2 + $0xd8] sm:$0xff] %vm1209_vm4, %v1164_v28  ;;  %v1171_v53 = vmax.f32 %v1099_v9, %v3474_v11  ;;  %v1172_v26 = vmax.f32 %v1100_v44, %v3475_v50  ;;  %v3478_v17 = vmax.f32 %v2417_v47, 0.0  ;;  %v1105_v43 = vld [vmem:[#allocation2 + $0x140] sm:$0xff]  ;;  %v1106_v61 = vld [vmem:[#allocation2 + $0x148] sm:$0xff]  ;;  %v3479_v5 = vmax.f32 %v2432_v58, 0.0 }
 0x16a   : > { %1238 = vst.msk [vmem:[#allocation2 + $0xe0] sm:$0xff] %vm1209_vm4, %v1165_v42  ;;  %1239 = vst.msk [vmem:[#allocation2 + $0xe8] sm:$0xff] %vm1209_vm4, %v1166_v37  ;;  %v1173_v55 = vmax.f32 %v1101_v60, %v3476_v8  ;;  %v1174_v19 = vmax.f32 %v1102_v51, %v3477_v16  ;;  %v3480_v52 = vmax.f32 %v2456_v12, 0.0  ;;  %v3481_v63 = vmax.f32 %v2472_v23, 0.0  ;;  %v1107_v47 = vld [vmem:[#allocation2 + $0x150] sm:$0xff]  ;;  %v1108_v3 = vld [vmem:[#allocation2 + $0x158] sm:$0xff] }
 0x16b   : > { %1240 = vst.msk [vmem:[#allocation2 + $0xf0] sm:$0xff] %vm1209_vm4, %v1167_v2  ;;  %1241 = vst.msk [vmem:[#allocation2 + $0xf8] sm:$0xff] %vm1209_vm4, %v1168_v15  ;;  %v1175_v24 = vmax.f32 %v1103_v33, %v3478_v17  ;;  %v1176_v27 = vmax.f32 %v1104_v62, %v3479_v5  ;;  %v1109_v14 = vld [vmem:[#allocation2 + $0x160] sm:$0xff]  ;;  %v3482_v40 = vmax.f32 %v2449_v7, 0.0  ;;  %v3483_v58 = vmax.f32 %v2464_v18, 0.0  ;;  %v1110_v23 = vld [vmem:[#allocation2 + $0x168] sm:$0xff] }
 0x16c   : > { %1242 = vst.msk [vmem:[#allocation2 + $0x100] sm:$0xff] %vm1209_vm4, %v1169_v1  ;;  %1243 = vst.msk [vmem:[#allocation2 + $0x108] sm:$0xff] %vm1209_vm4, %v1170_v59  ;;  %v1177_v34 = vmax.f32 %v1105_v43, %v3480_v52  ;;  %v1178_v4 = vmax.f32 %v1106_v61, %v3481_v63  ;;  %v3484_v12 = vmax.f32 %v2488_v36, 0.0  ;;  %v1111_v10 = vld [vmem:[#allocation2 + $0x170] sm:$0xff]  ;;  %v1112_v39 = vld [vmem:[#allocation2 + $0x178] sm:$0xff]  ;;  %v3485_v56 = vmax.f32 %v2504_v54, 0.0 }
 0x16d   : > { %1244 = vst.msk [vmem:[#allocation2 + $0x110] sm:$0xff] %vm1209_vm4, %v1171_v53  ;;  %1245 = vst.msk [vmem:[#allocation2 + $0x118] sm:$0xff] %vm1209_vm4, %v1172_v26  ;;  %v1179_v13 = vmax.f32 %v1107_v47, %v3482_v40  ;;  %v1180_v35 = vmax.f32 %v1108_v3, %v3483_v58  ;;  %v3486_v7 = vld [vmem:[#allocation3_spill] sm:$0xff]  ;;  %v3488_v18 = vld [vmem:[#allocation4_spill] sm:$0xff] }
 0x16e   : > { %1246 = vst.msk [vmem:[#allocation2 + $0x120] sm:$0xff] %vm1209_vm4, %v1173_v55  ;;  %1247 = vst.msk [vmem:[#allocation2 + $0x128] sm:$0xff] %vm1209_vm4, %v1174_v19  ;;  %v1181_v32 = vmax.f32 %v1109_v14, %v3484_v12  ;;  %v1182_v49 = vmax.f32 %v1110_v23, %v3485_v56  ;;  %v3487_v31 = vmax.f32 %v3486_v7, 0.0  ;;  %v3489_v30 = vmax.f32 %v3488_v18, 0.0  ;;  %v1113_v36 = vld [vmem:[#allocation2 + $0x180] sm:$0xff]  ;;  %v1114_v57 = vld [vmem:[#allocation2 + $0x188] sm:$0xff] }
 0x16f   : > { %1248 = vst.msk [vmem:[#allocation2 + $0x130] sm:$0xff] %vm1209_vm4, %v1175_v24  ;;  %1249 = vst.msk [vmem:[#allocation2 + $0x138] sm:$0xff] %vm1209_vm4, %v1176_v27  ;;  %v1115_v28 = vld [vmem:[#allocation2 + $0x190] sm:$0xff]  ;;  %v3490_v20 = vld [vmem:[#allocation6_spill] sm:$0xff] }
 0x170   : > { %1250 = vst.msk [vmem:[#allocation2 + $0x140] sm:$0xff] %vm1209_vm4, %v1177_v34  ;;  %1251 = vst.msk [vmem:[#allocation2 + $0x148] sm:$0xff] %vm1209_vm4, %v1178_v4  ;;  %v1183_v38 = vmax.f32 %v1111_v10, %v3487_v31  ;;  %v1184_v45 = vmax.f32 %v1112_v39, %v3489_v30  ;;  %v3491_v42 = vmax.f32 %v3490_v20, 0.0  ;;  %v3492_v54 = vld [vmem:[#allocation8_spill] sm:$0xff]  ;;  %v3494_v41 = vld [vmem:[#allocation5_spill] sm:$0xff] }
 0x171   : > { %1252 = vst.msk [vmem:[#allocation2 + $0x150] sm:$0xff] %vm1209_vm4, %v1179_v13  ;;  %1253 = vst.msk [vmem:[#allocation2 + $0x158] sm:$0xff] %vm1209_vm4, %v1180_v35  ;;  %v3493_v37 = vmax.f32 %v3492_v54, 0.0  ;;  %v3495_v21 = vmax.f32 %v3494_v41, 0.0  ;;  %v1116_v2 = vld [vmem:[#allocation2 + $0x198] sm:$0xff]  ;;  %v1117_v0 = vld [vmem:[#allocation2 + $0x1a0] sm:$0xff] }
 0x172   : > { %1254 = vst.msk [vmem:[#allocation2 + $0x160] sm:$0xff] %vm1209_vm4, %v1181_v32  ;;  %v1185_v25 = vmax.f32 %v1113_v36, %v3491_v42  ;;  %v1118_v15 = vld [vmem:[#allocation2 + $0x1a8] sm:$0xff]  ;;  %1255 = vst.msk [vmem:[#allocation2 + $0x168] sm:$0xff] %vm1209_vm4, %v1182_v49  ;;  %v3496_v22 = vld [vmem:[#allocation7_spill] sm:$0xff] }
 0x173   : > { %v1186_v29 = vmax.f32 %v1114_v57, %v3493_v37  ;;  %v1187_v48 = vmax.f32 %v1115_v28, %v3495_v21  ;;  %1256 = vst.msk [vmem:[#allocation2 + $0x170] sm:$0xff] %vm1209_vm4, %v1183_v38  ;;  %1257 = vst.msk [vmem:[#allocation2 + $0x178] sm:$0xff] %vm1209_vm4, %v1184_v45  ;;  %v3497_v1 = vmax.f32 %v3496_v22, 0.0  ;;  %v3498_v9 = vld [vmem:[#allocation10_spill] sm:$0xff]  ;;  %v3500_v59 = vld [vmem:[#allocation12_spill] sm:$0xff] }
 0x174   : > { %v3499_v44 = vmax.f32 %v3498_v9, 0.0  ;;  %v3501_v11 = vmax.f32 %v3500_v59, 0.0  ;;  %v1119_v50 = vld [vmem:[#allocation2 + $0x1b0] sm:$0xff]  ;;  %v1120_v26 = vld [vmem:[#allocation2 + $0x1b8] sm:$0xff]  ;;  %v1121_v60 = vld [vmem:[#allocation2 + $0x1c0] sm:$0xff]  ;;  %1258 = vst.msk [vmem:[#allocation2 + $0x180] sm:$0xff] %vm1209_vm4, %v1185_v25 }
 0x175   : > { %v1188_v46 = vmax.f32 %v1116_v2, %v3497_v1  ;;  %1259 = vst.msk [vmem:[#allocation2 + $0x188] sm:$0xff] %vm1209_vm4, %v1186_v29  ;;  %1260 = vst.msk [vmem:[#allocation2 + $0x190] sm:$0xff] %vm1209_vm4, %v1187_v48  ;;  %v3502_v51 = vld [vmem:[#allocation9_spill] sm:$0xff]  ;;  %v3504_v55 = vld [vmem:[#allocation11_spill] sm:$0xff] }
 0x176   : > { %v1189_v6 = vmax.f32 %v1117_v0, %v3499_v44  ;;  %v1190_v53 = vmax.f32 %v1118_v15, %v3501_v11  ;;  %v3503_v33 = vmax.f32 %v3502_v51, 0.0  ;;  %v3505_v16 = vmax.f32 %v3504_v55, 0.0  ;;  %v3506_v17 = vld [vmem:[#allocation14_spill] sm:$0xff]  ;;  %v1122_v43 = vld [vmem:[#allocation2 + $0x1c8] sm:$0xff]  ;;  %v1123_v61 = vld [vmem:[#allocation2 + $0x1d0] sm:$0xff] }
 0x177   : > { %v3507_v24 = vmax.f32 %v3506_v17, 0.0  ;;  %v1124_v5 = vld [vmem:[#allocation2 + $0x1d8] sm:$0xff]  ;;  %1261 = vst.msk [vmem:[#allocation2 + $0x198] sm:$0xff] %vm1209_vm4, %v1188_v46  ;;  %v3508_v27 = vld [vmem:[#allocation16_spill] sm:$0xff]  ;;  %v3510_v63 = vld [vmem:[#allocation13_spill] sm:$0xff] }
 0x178   : > { %v1191_v8 = vmax.f32 %v1119_v50, %v3503_v33  ;;  %v1192_v19 = vmax.f32 %v1120_v26, %v3505_v16  ;;  %1262 = vst.msk [vmem:[#allocation2 + $0x1a0] sm:$0xff] %vm1209_vm4, %v1189_v6  ;;  %1263 = vst.msk [vmem:[#allocation2 + $0x1a8] sm:$0xff] %vm1209_vm4, %v1190_v53  ;;  %v3509_v52 = vmax.f32 %v3508_v27, 0.0  ;;  %v3511_v4 = vmax.f32 %v3510_v63, 0.0  ;;  %v3512_v3 = vld [vmem:[#allocation15_spill] sm:$0xff]  ;;  %v1126_v58 = vld [vmem:[#allocation2 + $0x1e8] sm:$0xff] }
 0x179   : > { %v1193_v62 = vmax.f32 %v1121_v60, %v3507_v24  ;;  %v3513_v14 = vmax.f32 %v3512_v3, 0.0  ;;  %v1125_v13 = vld [vmem:[#allocation2 + $0x1e0] sm:$0xff]  ;;  %v1127_v35 = vld [vmem:[#allocation2 + $0x1f0] sm:$0xff]  ;;  %v3514_v12 = vld [vmem:[#allocation18_spill] sm:$0xff] }
 0x17a   : > { %v1194_v34 = vmax.f32 %v1122_v43, %v3509_v52  ;;  %v1195_v47 = vmax.f32 %v1123_v61, %v3511_v4  ;;  %1264 = vst.msk [vmem:[#allocation2 + $0x1b0] sm:$0xff] %vm1209_vm4, %v1191_v8  ;;  %1265 = vst.msk [vmem:[#allocation2 + $0x1b8] sm:$0xff] %vm1209_vm4, %v1192_v19  ;;  %v3515_v32 = vmax.f32 %v3514_v12, 0.0  ;;  %v3516_v10 = vld [vmem:[#allocation20_spill] sm:$0xff]  ;;  %v3518_v49 = vld [vmem:[#allocation17_spill] sm:$0xff] }
 0x17b   : > { %v1196_v40 = vmax.f32 %v1124_v5, %v3513_v14  ;;  %1266 = vst.msk [vmem:[#allocation2 + $0x1c0] sm:$0xff] %vm1209_vm4, %v1193_v62  ;;  %v3517_v39 = vmax.f32 %v3516_v10, 0.0  ;;  %v3519_v7 = vmax.f32 %v3518_v49, 0.0  ;;  %v1128_v38 = vld [vmem:[#allocation2 + $0x1f8] sm:$0xff]  ;;  %v1129_v18 = vld [vmem:[#allocation2 + $0x200] sm:$0xff]  ;;  %v1130_v30 = vld [vmem:[#allocation2 + $0x208] sm:$0xff] }
 0x17c   : > { %v1197_v23 = vmax.f32 %v1125_v13, %v3515_v32  ;;  %1267 = vst.msk [vmem:[#allocation2 + $0x1c8] sm:$0xff] %vm1209_vm4, %v1194_v34  ;;  %1268 = vst.msk [vmem:[#allocation2 + $0x1d0] sm:$0xff] %vm1209_vm4, %v1195_v47  ;;  %v3520_v45 = vld [vmem:[#allocation19_spill] sm:$0xff]  ;;  %v3522_v28 = vld [vmem:[#allocation22_spill] sm:$0xff] }
 0x17d   : > { %v1198_v56 = vmax.f32 %v1126_v58, %v3517_v39  ;;  %v1199_v31 = vmax.f32 %v1127_v35, %v3519_v7  ;;  %1269 = vst.msk [vmem:[#allocation2 + $0x1d8] sm:$0xff] %vm1209_vm4, %v1196_v40  ;;  %v3521_v36 = vmax.f32 %v3520_v45, 0.0  ;;  %v3523_v20 = vmax.f32 %v3522_v28, 0.0  ;;  %v3524_v25 = vld [vmem:[#allocation24_spill] sm:$0xff]  ;;  %v1131_v29 = vld [vmem:[#allocation2 + $0x210] sm:$0xff]  ;;  %v1132_v41 = vld [vmem:[#allocation2 + $0x218] sm:$0xff] }
 0x17e   : > { %v3525_v54 = vmax.f32 %v3524_v25, 0.0  ;;  %v1133_v21 = vld [vmem:[#allocation2 + $0x220] sm:$0xff]  ;;  %1270 = vst.msk [vmem:[#allocation2 + $0x1e0] sm:$0xff] %vm1209_vm4, %v1197_v23  ;;  %v3526_v48 = vld [vmem:[#allocation21_spill] sm:$0xff]  ;;  %v3530_v46 = vld [vmem:[#allocation26_spill] sm:$0xff] }
 0x17f   : > { %v1200_v57 = vmax.f32 %v1128_v38, %v3521_v36  ;;  %v1201_v42 = vmax.f32 %v1129_v18, %v3523_v20  ;;  %1271 = vst.msk [vmem:[#allocation2 + $0x1e8] sm:$0xff] %vm1209_vm4, %v1198_v56  ;;  %1272 = vst.msk [vmem:[#allocation2 + $0x1f0] sm:$0xff] %vm1209_vm4, %v1199_v31  ;;  %v3527_v2 = vmax.f32 %v3526_v48, 0.0  ;;  %v3528_v15 = vld [vmem:[#allocation23_spill] sm:$0xff]  ;;  %v3531_v9 = vmax.f32 %v3530_v46, 0.0  ;;  %v1134_v6 = vld [vmem:[#allocation2 + $0x228] sm:$0xff] }
 0x180   : > { %v1202_v37 = vmax.f32 %v1130_v30, %v3525_v54  ;;  %v3529_v22 = vmax.f32 %v3528_v15, 0.0  ;;  %v1135_v59 = vld [vmem:[#allocation2 + $0x230] sm:$0xff]  ;;  %v1136_v11 = vld [vmem:[#allocation2 + $0x238] sm:$0xff]  ;;  %v3532_v53 = vld [vmem:[#allocation28_spill] sm:$0xff] }
 0x181   : > { %v1203_v0 = vmax.f32 %v1131_v29, %v3527_v2  ;;  %v1205_v44 = vmax.f32 %v1133_v21, %v3531_v9  ;;  %1273 = vst.msk [vmem:[#allocation2 + $0x1f8] sm:$0xff] %vm1209_vm4, %v1200_v57  ;;  %1274 = vst.msk [vmem:[#allocation2 + $0x200] sm:$0xff] %vm1209_vm4, %v1201_v42  ;;  %v3533_v50 = vmax.f32 %v3532_v53, 0.0  ;;  %v3534_v60 = vld [vmem:[#allocation25_spill] sm:$0xff]  ;;  %v3536_v8 = vld [vmem:[#allocation27_spill] sm:$0xff] }
 0x182   : > { %v1204_v1 = vmax.f32 %v1132_v41, %v3529_v22  ;;  %1275 = vst.msk [vmem:[#allocation2 + $0x208] sm:$0xff] %vm1209_vm4, %v1202_v37  ;;  %v3535_v51 = vmax.f32 %v3534_v60, 0.0  ;;  %v3537_v55 = vmax.f32 %v3536_v8, 0.0 }
 0x183   : > { %v1206_v26 = vmax.f32 %v1134_v6, %v3533_v50  ;;  %1276 = vst.msk [vmem:[#allocation2 + $0x210] sm:$0xff] %vm1209_vm4, %v1203_v0  ;;  %1278 = vst.msk [vmem:[#allocation2 + $0x220] sm:$0xff] %vm1209_vm4, %v1205_v44 }
 0x184   : > { %v1207_v33 = vmax.f32 %v1135_v59, %v3535_v51  ;;  %v1208_v16 = vmax.f32 %v1136_v11, %v3537_v55  ;;  %1277 = vst.msk [vmem:[#allocation2 + $0x218] sm:$0xff] %vm1209_vm4, %v1204_v1 }
 0x185   : > { %1279 = vst.msk [vmem:[#allocation2 + $0x228] sm:$0xff] %vm1209_vm4, %v1206_v26 }
 0x186   : > { %1280 = vst.msk [vmem:[#allocation2 + $0x230] sm:$0xff] %vm1209_vm4, %v1207_v33  ;;  %1281 = vst.msk [vmem:[#allocation2 + $0x238] sm:$0xff] %vm1209_vm4, %v1208_v16 }
 0x187 PF: > { %p1877_p9 = scmp.ne.s32.totalorder %s2244_s12, 3 }
 0x188   : > { %vm1646_vm5 = vcmask (!%p1877_p9), 125952   ;;  %v1288_v24 = vld [vmem:[#allocation2 + $0x10] sm:$0xff] (!%p1877_p9)  ;;  %v1289_v5 = vld [vmem:[#allocation2 + $0x18] sm:$0xff] (!%p1877_p9)  ;;  %v1294_v14 = vld [vmem:[#allocation2 + $0x40] sm:$0xff] (!%p1877_p9) }
 0x189   : > { %1285 = sbr.rel (%p1877_p9) target bundleno = 432 (0x1b0), region = 44  ;;  %v1954_v61 = vpack.c.bf16 (!%p1877_p9), %v1288_v24, %v1288_v24  ;;  %v1955_v34 = vpack.c.bf16 (!%p1877_p9), %v1289_v5, %v1289_v5  ;;  %v1293_v3 = vld [vmem:[#allocation2 + $0x38] sm:$0xff] (!%p1877_p9)  ;;  %v1960_v58 = vpack.c.bf16 (!%p1877_p9), %v1294_v14, %v1294_v14  ;;  %v1295_v35 = vld [vmem:[#allocation2 + $0x48] sm:$0xff] (!%p1877_p9)  ;;  %v1296_v12 = vld [vmem:[#allocation2 + $0x50] sm:$0xff] (!%p1877_p9) }
 0x18a   : > { %v1959_v13 = vpack.c.bf16 (!%p1877_p9), %v1293_v3, %v1293_v3  ;;  %v1961_v23 = vpack.c.bf16 (!%p1877_p9), %v1295_v35, %v1295_v35  ;;  %v1962_v10 = vpack.c.bf16 (!%p1877_p9), %v1296_v12, %v1296_v12  ;;  %v1298_v56 = vld [vmem:[#allocation2 + $0x60] sm:$0xff] (!%p1877_p9)  ;;  %v1299_v49 = vld [vmem:[#allocation2 + $0x68] sm:$0xff] (!%p1877_p9)  ;;  %v1300_v7 = vld [vmem:[#allocation2 + $0x70] sm:$0xff] (!%p1877_p9) }
 0x18b   : > { %v1290_v27 = vld [vmem:[#allocation2 + $0x20] sm:$0xff] (!%p1877_p9)  ;;  %v1291_v52 = vld [vmem:[#allocation2 + $0x28] sm:$0xff] (!%p1877_p9)  ;;  %1649 = vst.msk [vmem:[%s2329_s4 + $0x8] sm:$0xf] (!%p1877_p9), %vm1646_vm5, %v1954_v61  ;;  %1650 = vst.msk [vmem:[%s2329_s4 + $0xc] sm:$0xf] (!%p1877_p9), %vm1646_vm5, %v1955_v34  ;;  %v1964_v31 = vpack.c.bf16 (!%p1877_p9), %v1298_v56, %v1298_v56  ;;  %v1965_v38 = vpack.c.bf16 (!%p1877_p9), %v1299_v49, %v1299_v49  ;;  %v1966_v18 = vpack.c.bf16 (!%p1877_p9), %v1300_v7, %v1300_v7 }
 0x18c   : > { %v1956_v63 = vpack.c.bf16 (!%p1877_p9), %v1290_v27, %v1290_v27  ;;  %v1957_v4 = vpack.c.bf16 (!%p1877_p9), %v1291_v52, %v1291_v52  ;;  %v1292_v47 = vld [vmem:[#allocation2 + $0x30] sm:$0xff] (!%p1877_p9)  ;;  %1654 = vst.msk [vmem:[%s2329_s4 + $0x1c] sm:$0xf] (!%p1877_p9), %vm1646_vm5, %v1959_v13  ;;  %1655 = vst.msk [vmem:[%s2329_s4 + $0x20] sm:$0xf] (!%p1877_p9), %vm1646_vm5, %v1960_v58  ;;  %v1301_v30 = vld [vmem:[#allocation2 + $0x78] sm:$0xff] (!%p1877_p9) }
 0x18d   : > { %v1287_v17 = vld [vmem:[#allocation2 + $0x8] sm:$0xff] (!%p1877_p9)  ;;  %v1958_v40 = vpack.c.bf16 (!%p1877_p9), %v1292_v47, %v1292_v47  ;;  %v1302_v45 = vld [vmem:[#allocation2 + $0x80] sm:$0xff] (!%p1877_p9)  ;;  %1656 = vst.msk [vmem:[%s2329_s4 + $0x24] sm:$0xf] (!%p1877_p9), %vm1646_vm5, %v1961_v23  ;;  %1657 = vst.msk [vmem:[%s2329_s4 + $0x28] sm:$0xf] (!%p1877_p9), %vm1646_vm5, %v1962_v10  ;;  %v1967_v57 = vpack.c.bf16 (!%p1877_p9), %v1301_v30, %v1301_v30 }
 0x18e   : > { %v1286_v19 = vld [vmem:[#allocation2] sm:$0xff] (!%p1877_p9)  ;;  %v1953_v43 = vpack.c.bf16 (!%p1877_p9), %v1287_v17, %v1287_v17  ;;  %v1297_v32 = vld [vmem:[#allocation2 + $0x58] sm:$0xff] (!%p1877_p9)  ;;  %1651 = vst.msk [vmem:[%s2329_s4 + $0x10] sm:$0xf] (!%p1877_p9), %vm1646_vm5, %v1956_v63  ;;  %1652 = vst.msk [vmem:[%s2329_s4 + $0x14] sm:$0xf] (!%p1877_p9), %vm1646_vm5, %v1957_v4  ;;  %v1968_v28 = vpack.c.bf16 (!%p1877_p9), %v1302_v45, %v1302_v45 }
 0x18f   : > { %v1952_v62 = vpack.c.bf16 (!%p1877_p9), %v1286_v19, %v1286_v19  ;;  %v1963_v39 = vpack.c.bf16 (!%p1877_p9), %v1297_v32, %v1297_v32  ;;  %1653 = vst.msk [vmem:[%s2329_s4 + $0x18] sm:$0xf] (!%p1877_p9), %vm1646_vm5, %v1958_v40  ;;  %v1303_v36 = vld [vmem:[#allocation2 + $0x88] sm:$0xff] (!%p1877_p9)  ;;  %v1304_v42 = vld [vmem:[#allocation2 + $0x90] sm:$0xff] (!%p1877_p9)  ;;  %v1305_v25 = vld [vmem:[#allocation2 + $0x98] sm:$0xff] (!%p1877_p9) }
 0x190   : > { %1648 = vst.msk [vmem:[%s2329_s4 + $0x4] sm:$0xf] %vm1646_vm5, %v1953_v43  ;;  %v1969_v20 = vpack.c.bf16 %v1303_v36, %v1303_v36  ;;  %v1306_v54 = vld [vmem:[#allocation2 + $0xa0] sm:$0xff]  ;;  %1659 = vst.msk [vmem:[%s2329_s4 + $0x30] sm:$0xf] %vm1646_vm5, %v1964_v31  ;;  %v1970_v37 = vpack.c.bf16 %v1304_v42, %v1304_v42  ;;  %v1971_v29 = vpack.c.bf16 %v1305_v25, %v1305_v25  ;;  %v1307_v21 = vld [vmem:[#allocation2 + $0xa8] sm:$0xff] }
 0x191   : > { %1647 = vst.msk [vmem:[%s2329_s4] sm:$0xf] %vm1646_vm5, %v1952_v62  ;;  %1658 = vst.msk [vmem:[%s2329_s4 + $0x2c] sm:$0xf] %vm1646_vm5, %v1963_v39  ;;  %v1972_v41 = vpack.c.bf16 %v1306_v54, %v1306_v54  ;;  %v1308_v48 = vld [vmem:[#allocation2 + $0xb0] sm:$0xff]  ;;  %v1309_v2 = vld [vmem:[#allocation2 + $0xb8] sm:$0xff]  ;;  %v1973_v0 = vpack.c.bf16 %v1307_v21, %v1307_v21 }
 0x192   : > { %1660 = vst.msk [vmem:[%s2329_s4 + $0x34] sm:$0xf] %vm1646_vm5, %v1965_v38  ;;  %1661 = vst.msk [vmem:[%s2329_s4 + $0x38] sm:$0xf] %vm1646_vm5, %v1966_v18  ;;  %v1974_v15 = vpack.c.bf16 %v1308_v48, %v1308_v48  ;;  %v1975_v22 = vpack.c.bf16 %v1309_v2, %v1309_v2  ;;  %v1310_v1 = vld [vmem:[#allocation2 + $0xc0] sm:$0xff]  ;;  %v1311_v46 = vld [vmem:[#allocation2 + $0xc8] sm:$0xff] }
 0x193   : > { %1662 = vst.msk [vmem:[%s2329_s4 + $0x3c] sm:$0xf] %vm1646_vm5, %v1967_v57  ;;  %1663 = vst.msk [vmem:[%s2329_s4 + $0x40] sm:$0xf] %vm1646_vm5, %v1968_v28  ;;  %v1312_v9 = vld [vmem:[#allocation2 + $0xd0] sm:$0xff]  ;;  %v1976_v44 = vpack.c.bf16 %v1310_v1, %v1310_v1  ;;  %v1977_v6 = vpack.c.bf16 %v1311_v46, %v1311_v46  ;;  %v1313_v11 = vld [vmem:[#allocation2 + $0xd8] sm:$0xff] }
 0x194   : > { %1664 = vst.msk [vmem:[%s2329_s4 + $0x44] sm:$0xf] %vm1646_vm5, %v1969_v20  ;;  %1665 = vst.msk [vmem:[%s2329_s4 + $0x48] sm:$0xf] %vm1646_vm5, %v1970_v37  ;;  %v1978_v59 = vpack.c.bf16 %v1312_v9, %v1312_v9  ;;  %v1314_v53 = vld [vmem:[#allocation2 + $0xe0] sm:$0xff]  ;;  %v1315_v50 = vld [vmem:[#allocation2 + $0xe8] sm:$0xff]  ;;  %v1979_v26 = vpack.c.bf16 %v1313_v11, %v1313_v11 }
 0x195   : > { %1666 = vst.msk [vmem:[%s2329_s4 + $0x4c] sm:$0xf] %vm1646_vm5, %v1971_v29  ;;  %1667 = vst.msk [vmem:[%s2329_s4 + $0x50] sm:$0xf] %vm1646_vm5, %v1972_v41  ;;  %v1980_v60 = vpack.c.bf16 %v1314_v53, %v1314_v53  ;;  %v1981_v51 = vpack.c.bf16 %v1315_v50, %v1315_v50  ;;  %v1316_v33 = vld [vmem:[#allocation2 + $0xf0] sm:$0xff]  ;;  %v1317_v8 = vld [vmem:[#allocation2 + $0xf8] sm:$0xff] }
 0x196   : > { %1668 = vst.msk [vmem:[%s2329_s4 + $0x54] sm:$0xf] %vm1646_vm5, %v1973_v0  ;;  %1669 = vst.msk [vmem:[%s2329_s4 + $0x58] sm:$0xf] %vm1646_vm5, %v1974_v15  ;;  %v1318_v55 = vld [vmem:[#allocation2 + $0x100] sm:$0xff]  ;;  %v1982_v16 = vpack.c.bf16 %v1316_v33, %v1316_v33  ;;  %v1983_v19 = vpack.c.bf16 %v1317_v8, %v1317_v8  ;;  %v1319_v24 = vld [vmem:[#allocation2 + $0x108] sm:$0xff] }
 0x197   : > { %1670 = vst.msk [vmem:[%s2329_s4 + $0x5c] sm:$0xf] %vm1646_vm5, %v1975_v22  ;;  %1671 = vst.msk [vmem:[%s2329_s4 + $0x60] sm:$0xf] %vm1646_vm5, %v1976_v44  ;;  %v1984_v17 = vpack.c.bf16 %v1318_v55, %v1318_v55  ;;  %v1320_v62 = vld [vmem:[#allocation2 + $0x110] sm:$0xff]  ;;  %v1321_v43 = vld [vmem:[#allocation2 + $0x118] sm:$0xff]  ;;  %v1985_v61 = vpack.c.bf16 %v1319_v24, %v1319_v24 }
 0x198   : > { %1672 = vst.msk [vmem:[%s2329_s4 + $0x64] sm:$0xf] %vm1646_vm5, %v1977_v6  ;;  %1673 = vst.msk [vmem:[%s2329_s4 + $0x68] sm:$0xf] %vm1646_vm5, %v1978_v59  ;;  %v1986_v5 = vpack.c.bf16 %v1320_v62, %v1320_v62  ;;  %v1987_v27 = vpack.c.bf16 %v1321_v43, %v1321_v43  ;;  %v1322_v52 = vld [vmem:[#allocation2 + $0x120] sm:$0xff]  ;;  %v1323_v34 = vld [vmem:[#allocation2 + $0x128] sm:$0xff] }
 0x199   : > { %1674 = vst.msk [vmem:[%s2329_s4 + $0x6c] sm:$0xf] %vm1646_vm5, %v1979_v26  ;;  %1675 = vst.msk [vmem:[%s2329_s4 + $0x70] sm:$0xf] %vm1646_vm5, %v1980_v60  ;;  %v1324_v63 = vld [vmem:[#allocation2 + $0x130] sm:$0xff]  ;;  %v1988_v4 = vpack.c.bf16 %v1322_v52, %v1322_v52  ;;  %v1989_v47 = vpack.c.bf16 %v1323_v34, %v1323_v34  ;;  %v1325_v14 = vld [vmem:[#allocation2 + $0x138] sm:$0xff] }
 0x19a   : > { %1676 = vst.msk [vmem:[%s2329_s4 + $0x74] sm:$0xf] %vm1646_vm5, %v1981_v51  ;;  %1677 = vst.msk [vmem:[%s2329_s4 + $0x78] sm:$0xf] %vm1646_vm5, %v1982_v16  ;;  %v1990_v3 = vpack.c.bf16 %v1324_v63, %v1324_v63  ;;  %v1326_v40 = vld [vmem:[#allocation2 + $0x140] sm:$0xff]  ;;  %v1327_v13 = vld [vmem:[#allocation2 + $0x148] sm:$0xff]  ;;  %v1991_v58 = vpack.c.bf16 %v1325_v14, %v1325_v14 }
 0x19b   : > { %1678 = vst.msk [vmem:[%s2329_s4 + $0x7c] sm:$0xf] %vm1646_vm5, %v1983_v19  ;;  %1679 = vst.msk [vmem:[%s2329_s4 + $0x80] sm:$0xf] %vm1646_vm5, %v1984_v17  ;;  %v1992_v35 = vpack.c.bf16 %v1326_v40, %v1326_v40  ;;  %v1993_v12 = vpack.c.bf16 %v1327_v13, %v1327_v13  ;;  %v1328_v32 = vld [vmem:[#allocation2 + $0x150] sm:$0xff]  ;;  %v1329_v23 = vld [vmem:[#allocation2 + $0x158] sm:$0xff] }
 0x19c   : > { %1680 = vst.msk [vmem:[%s2329_s4 + $0x84] sm:$0xf] %vm1646_vm5, %v1985_v61  ;;  %1681 = vst.msk [vmem:[%s2329_s4 + $0x88] sm:$0xf] %vm1646_vm5, %v1986_v5  ;;  %v1330_v10 = vld [vmem:[#allocation2 + $0x160] sm:$0xff]  ;;  %v1994_v39 = vpack.c.bf16 %v1328_v32, %v1328_v32  ;;  %v1995_v56 = vpack.c.bf16 %v1329_v23, %v1329_v23  ;;  %v1331_v7 = vld [vmem:[#allocation2 + $0x168] sm:$0xff] }
 0x19d   : > { %1682 = vst.msk [vmem:[%s2329_s4 + $0x8c] sm:$0xf] %vm1646_vm5, %v1987_v27  ;;  %1683 = vst.msk [vmem:[%s2329_s4 + $0x90] sm:$0xf] %vm1646_vm5, %v1988_v4  ;;  %v1996_v49 = vpack.c.bf16 %v1330_v10, %v1330_v10  ;;  %v1332_v31 = vld [vmem:[#allocation2 + $0x170] sm:$0xff]  ;;  %v1333_v38 = vld [vmem:[#allocation2 + $0x178] sm:$0xff]  ;;  %v1997_v18 = vpack.c.bf16 %v1331_v7, %v1331_v7 }
 0x19e   : > { %1684 = vst.msk [vmem:[%s2329_s4 + $0x94] sm:$0xf] %vm1646_vm5, %v1989_v47  ;;  %1685 = vst.msk [vmem:[%s2329_s4 + $0x98] sm:$0xf] %vm1646_vm5, %v1990_v3  ;;  %v1998_v30 = vpack.c.bf16 %v1332_v31, %v1332_v31  ;;  %v1999_v45 = vpack.c.bf16 %v1333_v38, %v1333_v38  ;;  %v1334_v36 = vld [vmem:[#allocation2 + $0x180] sm:$0xff]  ;;  %v1335_v57 = vld [vmem:[#allocation2 + $0x188] sm:$0xff] }
 0x19f   : > { %1686 = vst.msk [vmem:[%s2329_s4 + $0x9c] sm:$0xf] %vm1646_vm5, %v1991_v58  ;;  %1687 = vst.msk [vmem:[%s2329_s4 + $0xa0] sm:$0xf] %vm1646_vm5, %v1992_v35  ;;  %v1336_v28 = vld [vmem:[#allocation2 + $0x190] sm:$0xff]  ;;  %v2000_v20 = vpack.c.bf16 %v1334_v36, %v1334_v36  ;;  %v2001_v42 = vpack.c.bf16 %v1335_v57, %v1335_v57  ;;  %v1337_v54 = vld [vmem:[#allocation2 + $0x198] sm:$0xff] }
 0x1a0   : > { %1688 = vst.msk [vmem:[%s2329_s4 + $0xa4] sm:$0xf] %vm1646_vm5, %v1993_v12  ;;  %1689 = vst.msk [vmem:[%s2329_s4 + $0xa8] sm:$0xf] %vm1646_vm5, %v1994_v39  ;;  %v2002_v25 = vpack.c.bf16 %v1336_v28, %v1336_v28  ;;  %v1338_v37 = vld [vmem:[#allocation2 + $0x1a0] sm:$0xff]  ;;  %v1339_v29 = vld [vmem:[#allocation2 + $0x1a8] sm:$0xff]  ;;  %v2003_v41 = vpack.c.bf16 %v1337_v54, %v1337_v54 }
 0x1a1   : > { %1690 = vst.msk [vmem:[%s2329_s4 + $0xac] sm:$0xf] %vm1646_vm5, %v1995_v56  ;;  %1691 = vst.msk [vmem:[%s2329_s4 + $0xb0] sm:$0xf] %vm1646_vm5, %v1996_v49  ;;  %v2004_v21 = vpack.c.bf16 %v1338_v37, %v1338_v37  ;;  %v2005_v48 = vpack.c.bf16 %v1339_v29, %v1339_v29  ;;  %v1340_v2 = vld [vmem:[#allocation2 + $0x1b0] sm:$0xff]  ;;  %v1341_v0 = vld [vmem:[#allocation2 + $0x1b8] sm:$0xff] }
 0x1a2   : > { %1692 = vst.msk [vmem:[%s2329_s4 + $0xb4] sm:$0xf] %vm1646_vm5, %v1997_v18  ;;  %1693 = vst.msk [vmem:[%s2329_s4 + $0xb8] sm:$0xf] %vm1646_vm5, %v1998_v30  ;;  %v1342_v15 = vld [vmem:[#allocation2 + $0x1c0] sm:$0xff]  ;;  %v2006_v22 = vpack.c.bf16 %v1340_v2, %v1340_v2  ;;  %v2007_v1 = vpack.c.bf16 %v1341_v0, %v1341_v0  ;;  %v1343_v9 = vld [vmem:[#allocation2 + $0x1c8] sm:$0xff] }
 0x1a3   : > { %1694 = vst.msk [vmem:[%s2329_s4 + $0xbc] sm:$0xf] %vm1646_vm5, %v1999_v45  ;;  %1695 = vst.msk [vmem:[%s2329_s4 + $0xc0] sm:$0xf] %vm1646_vm5, %v2000_v20  ;;  %v2008_v46 = vpack.c.bf16 %v1342_v15, %v1342_v15  ;;  %v1344_v44 = vld [vmem:[#allocation2 + $0x1d0] sm:$0xff]  ;;  %v1345_v6 = vld [vmem:[#allocation2 + $0x1d8] sm:$0xff]  ;;  %v2009_v59 = vpack.c.bf16 %v1343_v9, %v1343_v9 }
 0x1a4   : > { %1696 = vst.msk [vmem:[%s2329_s4 + $0xc4] sm:$0xf] %vm1646_vm5, %v2001_v42  ;;  %1697 = vst.msk [vmem:[%s2329_s4 + $0xc8] sm:$0xf] %vm1646_vm5, %v2002_v25  ;;  %v2010_v11 = vpack.c.bf16 %v1344_v44, %v1344_v44  ;;  %v2011_v53 = vpack.c.bf16 %v1345_v6, %v1345_v6  ;;  %v1346_v50 = vld [vmem:[#allocation2 + $0x1e0] sm:$0xff]  ;;  %v1347_v26 = vld [vmem:[#allocation2 + $0x1e8] sm:$0xff] }
 0x1a5   : > { %1698 = vst.msk [vmem:[%s2329_s4 + $0xcc] sm:$0xf] %vm1646_vm5, %v2003_v41  ;;  %1699 = vst.msk [vmem:[%s2329_s4 + $0xd0] sm:$0xf] %vm1646_vm5, %v2004_v21  ;;  %v1348_v60 = vld [vmem:[#allocation2 + $0x1f0] sm:$0xff]  ;;  %v2012_v51 = vpack.c.bf16 %v1346_v50, %v1346_v50  ;;  %v2013_v33 = vpack.c.bf16 %v1347_v26, %v1347_v26  ;;  %v1349_v55 = vld [vmem:[#allocation2 + $0x1f8] sm:$0xff] }
 0x1a6   : > { %1700 = vst.msk [vmem:[%s2329_s4 + $0xd4] sm:$0xf] %vm1646_vm5, %v2005_v48  ;;  %1701 = vst.msk [vmem:[%s2329_s4 + $0xd8] sm:$0xf] %vm1646_vm5, %v2006_v22  ;;  %v2014_v8 = vpack.c.bf16 %v1348_v60, %v1348_v60  ;;  %v1350_v16 = vld [vmem:[#allocation2 + $0x200] sm:$0xff]  ;;  %v1351_v19 = vld [vmem:[#allocation2 + $0x208] sm:$0xff]  ;;  %v2015_v17 = vpack.c.bf16 %v1349_v55, %v1349_v55 }
 0x1a7   : > { %1702 = vst.msk [vmem:[%s2329_s4 + $0xdc] sm:$0xf] %vm1646_vm5, %v2007_v1  ;;  %1703 = vst.msk [vmem:[%s2329_s4 + $0xe0] sm:$0xf] %vm1646_vm5, %v2008_v46  ;;  %v2016_v24 = vpack.c.bf16 %v1350_v16, %v1350_v16  ;;  %v2017_v62 = vpack.c.bf16 %v1351_v19, %v1351_v19  ;;  %v1352_v43 = vld [vmem:[#allocation2 + $0x210] sm:$0xff]  ;;  %v1353_v61 = vld [vmem:[#allocation2 + $0x218] sm:$0xff] }
 0x1a8   : > { %1704 = vst.msk [vmem:[%s2329_s4 + $0xe4] sm:$0xf] %vm1646_vm5, %v2009_v59  ;;  %1705 = vst.msk [vmem:[%s2329_s4 + $0xe8] sm:$0xf] %vm1646_vm5, %v2010_v11  ;;  %v1354_v5 = vld [vmem:[#allocation2 + $0x220] sm:$0xff]  ;;  %v2018_v27 = vpack.c.bf16 %v1352_v43, %v1352_v43  ;;  %v2019_v52 = vpack.c.bf16 %v1353_v61, %v1353_v61  ;;  %v1355_v63 = vld [vmem:[#allocation2 + $0x228] sm:$0xff] }
 0x1a9   : > { %1706 = vst.msk [vmem:[%s2329_s4 + $0xec] sm:$0xf] %vm1646_vm5, %v2011_v53  ;;  %1707 = vst.msk [vmem:[%s2329_s4 + $0xf0] sm:$0xf] %vm1646_vm5, %v2012_v51  ;;  %v2020_v34 = vpack.c.bf16 %v1354_v5, %v1354_v5  ;;  %v1356_v4 = vld [vmem:[#allocation2 + $0x230] sm:$0xff]  ;;  %v1357_v47 = vld [vmem:[#allocation2 + $0x238] sm:$0xff]  ;;  %v2021_v3 = vpack.c.bf16 %v1355_v63, %v1355_v63 }
 0x1aa   : > { %1708 = vst.msk [vmem:[%s2329_s4 + $0xf4] sm:$0xf] %vm1646_vm5, %v2013_v33  ;;  %1709 = vst.msk [vmem:[%s2329_s4 + $0xf8] sm:$0xf] %vm1646_vm5, %v2014_v8  ;;  %v2022_v14 = vpack.c.bf16 %v1356_v4, %v1356_v4  ;;  %v2023_v40 = vpack.c.bf16 %v1357_v47, %v1357_v47 }
 0x1ab   : > { %1710 = vst.msk [vmem:[%s2329_s4 + $0xfc] sm:$0xf] %vm1646_vm5, %v2015_v17  ;;  %1711 = vst.msk [vmem:[%s2329_s4 + $0x100] sm:$0xf] %vm1646_vm5, %v2016_v24 }
 0x1ac   : > { %1712 = vst.msk [vmem:[%s2329_s4 + $0x104] sm:$0xf] %vm1646_vm5, %v2017_v62  ;;  %1713 = vst.msk [vmem:[%s2329_s4 + $0x108] sm:$0xf] %vm1646_vm5, %v2018_v27 }
 0x1ad   : > { %1714 = vst.msk [vmem:[%s2329_s4 + $0x10c] sm:$0xf] %vm1646_vm5, %v2019_v52  ;;  %1715 = vst.msk [vmem:[%s2329_s4 + $0x110] sm:$0xf] %vm1646_vm5, %v2020_v34 }
 0x1ae   : > { %1716 = vst.msk [vmem:[%s2329_s4 + $0x114] sm:$0xf] %vm1646_vm5, %v2021_v3  ;;  %1717 = vst.msk [vmem:[%s2329_s4 + $0x118] sm:$0xf] %vm1646_vm5, %v2022_v14 }
 0x1af   : > { %1718 = vst.msk [vmem:[%s2329_s4 + $0x11c] sm:$0xf] %vm1646_vm5, %v2023_v40 }
 0x1b0 PF: > { %s13_s16 = sadd.s32 1, %s2260_s16   ;;  %s3538_s12 = smov %s2252_s14 }
 0x1b1   : > { %p10_p10 = scmp.ge.s32.totalorder %s13_s16, 10   ;;  %s3539_s13 = smov %s2256_s15 }
 0x1b2   : > { %s3540_s14 = smov %s3543_s17  ;;  %s3541_s15 = smov %s3547_s18 }
 0x1b3   :  { %12 = sbr.rel (!%p10_p10) target bundleno = 3 (0x3), region = 74 }

// kernel: cnn_forward.5
= control target key start
LH: loop header
LB: loop body
LE: loop exit
PB: predicated region body
PF: predicated region fallthrough
CT: control target
= control target key end

     0   :  { %s1048_s12 = smov 0   ;;  %s1050_s13 = smov 0   ;;  %s1356_s0 = inlined_call_operand.vmem [shape: bf16[4,288,144], index: 0, kind: input, shape index: {}]   ;;  %s1357_s1 = inlined_call_operand.vmem [shape: bf16[144,32], index: 1, kind: input, shape index: {}]   ;;  %s1358_s2 = inlined_call_operand.vmem [shape: f32[1,32], index: 2, kind: input, shape index: {}]   ;;  %s1359_s3 = inlined_call_operand.vmem [shape: bf16[288,32], index: 3, kind: output, shape index: {}]  }
   0x1   :  { %s1052_s14 = smov 0   ;;  %s1054_s15 = smov 0  }
   0x2   :  { %s1056_s16 = smov 0  }
   0x3 LB: > { %s22_s17 = sadd.s32 1, %s1017_s14  ;;  %s25_s18 = sadd.s32 1, %s1021_s15  ;;  %s1025_s16 = sphi %s1056_s16, %s13_s16   ;;  %s1021_s15 = sphi %s1054_s15, %s1363_s15   ;;  %s1017_s14 = sphi %s1052_s14, %s1362_s14   ;;  %s1013_s13 = sphi %s1050_s13, %s1361_s13   ;;  %s1009_s12 = sphi %s1048_s12, %s1360_s12  }
   0x4   : > { %p23_p0 = scmp.ge.s32.totalorder %s22_s17, 4  ;;  %p809_p1 = scmp.ge.s32.totalorder %s1025_s16, 1 }
   0x5   : > { %p157_p2 = scmp.lt.s32.totalorder %s1025_s16, 9 }
   0x6   : > { %s1365_s17 = smov (%p23_p0, %s22_s17), 0  ;;  %s1367_s18 = smov (!%p23_p0, %s25_s18), %s1021_s15 }
   0x7   : > { %p158_p3 = pnand %p809_p1, %p157_p2  ;;  %p27_p4 = scmp.ge.s32.totalorder %s1367_s18, 2 }
   0x8   : > { %v951_v0 = vld [vmem:[%s1357_s1] sm:$0xff] (!%p158_p3)   ;;  %v1027_v1 = vmov (!%p158_p3), 0   ;;  %s186_s21 = smul.u32 (!%p158_p3), 18, %s1013_s13  ;;  %v952_v2 = vld [vmem:[%s1357_s1 + $0x8] sm:$0xff] (!%p158_p3)   ;;  %p187_p5 = scmp.lt.s32.totalorder (!%p158_p3), %s1009_s12, 3  ;;  %v953_v3 = vld [vmem:[%s1357_s1 + $0x10] sm:$0xff] (!%p158_p3)  }
   0x9   : > { %s1369_s18 = smov (%p27_p4, %s1367_s18), 0  ;;  %161 = sbr.rel (%p158_p3) target bundleno = 325 (0x145), region = 32 }
   0xa   : > { %410 = vmatprep.subr.bf16.mxu0 (!%p158_p3), %v1027_v1  ;;  %891 = vmatprep.subr.bf16.mxu1 (!%p158_p3), %v1027_v1  ;;  %p189_p6 = scmp.lt.s32.totalorder (!%p158_p3), %s186_s21, 35  ;;  %v954_v4 = vld [vmem:[%s1357_s1 + $0x18] sm:$0xff] (!%p158_p3)   ;;  %vm382_vm0 = vcmask (!%p158_p3), 130048   ;;  %v955_v7 = vld [vmem:[%s1357_s1 + $0x20] sm:$0xff] (!%p158_p3)   ;;  %v956_v8 = vld [vmem:[%s1357_s1 + $0x28] sm:$0xff] (!%p158_p3)   ;;  %p850_p7 = scmp.ne.s32.totalorder (!%p158_p3), %s1009_s12, 0 }
   0xb   : > { %411 = vmatpush1.bf16.msra.mxu0 (!%p158_p3), %v951_v0  ;;  %900 = vmatpush1.bf16.msra.mxu1 (!%p158_p3), %v951_v0  ;;  %v957_v9 = vld [vmem:[%s1357_s1 + $0x30] sm:$0xff] (!%p158_p3)   ;;  %v958_v10 = vld [vmem:[%s1357_s1 + $0x38] sm:$0xff] (!%p158_p3)   ;;  %v959_v11 = vld [vmem:[%s1357_s1 + $0x40] sm:$0xff] (!%p158_p3)  }
   0xc   : > { %412 = vmatprep.subr.bf16.mxu0 (!%p158_p3), %v1027_v1  ;;  %892 = vmatprep.subr.bf16.mxu1 (!%p158_p3), %v1027_v1  ;;  %v1149_v28 = vld [vmem:[%s1358_s2] ss:$0 sm:$0xff] (!%p158_p3) }
   0xf   : > { %413 = vmatpush1.bf16.msra.mxu0 (!%p158_p3), %v952_v2  ;;  %901 = vmatpush1.bf16.msra.mxu1 (!%p158_p3), %v952_v2 }
  0x10   : > { %s188_s24 = scalar_select %p187_p5, %s1009_s12, 3  ;;  %414 = vmatprep.subr.bf16.mxu0 %v1027_v1  ;;  %893 = vmatprep.subr.bf16.mxu1 %v1027_v1 }
  0x11   : > { %s1371_s21 = smov (!%p189_p6, %s186_s21), 35  ;;  %vm537_vm1 = vcmask (!%p850_p7), 261120  }
  0x12   : > { %s909_s27 = smul.u32 72, %s188_s24  ;;  %s810_s28 = sshll.u32 %s1371_s21, 1 }
  0x13   : > { %s812_s30 = sshll.u32 %s1371_s21, 2  ;;  %415 = vmatpush1.bf16.msra.mxu0 %v953_v3  ;;  %902 = vmatpush1.bf16.msra.mxu1 %v953_v3 }
  0x14   : > { %s193_s29 = sadd.s32 %s909_s27, %s810_s28  ;;  %s1094_s7 = scalar_lea.vmem %s1359_s3, %s812_s30  ;;  %416 = vmatprep.subr.bf16.mxu0 %v1027_v1  ;;  %894 = vmatprep.subr.bf16.mxu1 %v1027_v1 }
  0x15   : > { %s811_s4 = sshll.u32 %s193_s29, 2 }
  0x16   : > { %s1102_s13 = scalar_lea.vmem %s1356_s0, %s811_s4 }
  0x17   : > { %v962_v5 = vld [vmem:[%s1102_s13 + $0x4] ss:$8 sps:$4 sm:$0xff]   ;;  %v965_v6 = vld [vmem:[%s1102_s13 + $0x54] ss:$8 sps:$4 sm:$0xff]   ;;  %417 = vmatpush1.bf16.msra.mxu0 %v954_v4  ;;  %903 = vmatpush1.bf16.msra.mxu1 %v954_v4  ;;  %v960_v12 = vld [vmem:[%s1102_s13] ss:$8 sps:$4 sm:$0xff]  }
  0x18   : > { %418 = vmatprep.subr.bf16.mxu0 %v1027_v1  ;;  %895 = vmatprep.subr.bf16.mxu1 %v1027_v1  ;;  %v963_v13 = vld [vmem:[%s1102_s13 + $0x50] ss:$8 sps:$4 sm:$0xff]   ;;  %v966_v14 = vld [vmem:[%s1102_s13 + $0x14] ss:$8 sps:$4 sm:$0xff]   ;;  %v969_v15 = vld [vmem:[%s1102_s13 + $0x64] ss:$8 sps:$4 sm:$0xff]  }
  0x19   : > { %841 = vmatprep.mubr.msk.bf16.mxu0 %vm382_vm0, %v962_v5  ;;  %846 = vmatprep.mubr.msk.bf16.mxu1 %vm382_vm0, %v965_v6  ;;  %v968_v16 = vld [vmem:[%s1102_s13 + $0x10] ss:$8 sps:$4 sm:$0xff]   ;;  %v971_v17 = vld [vmem:[%s1102_s13 + $0x60] ss:$8 sps:$4 sm:$0xff]   ;;  %v972_v18 = vld [vmem:[%s1102_s13 + $0x24] ss:$8 sps:$4 sm:$0xff]  }
  0x1a   : > { %v975_v19 = vld [vmem:[%s1102_s13 + $0x74] ss:$8 sps:$4 sm:$0xff]   ;;  %v974_v20 = vld [vmem:[%s1102_s13 + $0x20] ss:$8 sps:$4 sm:$0xff]   ;;  %v977_v21 = vld [vmem:[%s1102_s13 + $0x70] ss:$8 sps:$4 sm:$0xff]  }
  0x1b   : > { %419 = vmatpush1.bf16.msra.mxu0 %v955_v7  ;;  %904 = vmatpush1.bf16.msra.mxu1 %v955_v7  ;;  %v978_v22 = vld [vmem:[%s1102_s13 + $0x34] ss:$8 sps:$4 sm:$0xff]   ;;  %v981_v23 = vld [vmem:[%s1102_s13 + $0x84] ss:$8 sps:$4 sm:$0xff]   ;;  %v980_v24 = vld [vmem:[%s1102_s13 + $0x30] ss:$8 sps:$4 sm:$0xff]  }
  0x1c   : > { %420 = vmatprep.subr.bf16.mxu0 %v1027_v1  ;;  %896 = vmatprep.subr.bf16.mxu1 %v1027_v1  ;;  %v983_v25 = vld [vmem:[%s1102_s13 + $0x80] ss:$8 sps:$4 sm:$0xff]   ;;  %v984_v26 = vld [vmem:[%s1102_s13 + $0x44] ss:$8 sps:$4 sm:$0xff]  }
  0x1d   : > { %v986_v27 = vld [vmem:[%s1102_s13 + $0x40] ss:$8 sps:$4 sm:$0xff]  }
  0x1f   : > { %421 = vmatpush1.bf16.msra.mxu0 %v956_v8  ;;  %905 = vmatpush1.bf16.msra.mxu1 %v956_v8 }
  0x20   : > { %422 = vmatprep.subr.bf16.mxu0 %v1027_v1  ;;  %897 = vmatprep.subr.bf16.mxu1 %v1027_v1 }
  0x23   : > { %423 = vmatpush1.bf16.msra.mxu0 %v957_v9  ;;  %906 = vmatpush1.bf16.msra.mxu1 %v957_v9 }
  0x24   : > { %424 = vmatprep.subr.bf16.mxu0 %v1027_v1  ;;  %898 = vmatprep.subr.bf16.mxu1 %v1027_v1 }
  0x27   : > { %425 = vmatpush1.bf16.msra.mxu0 %v958_v10  ;;  %907 = vmatpush1.bf16.msra.mxu1 %v958_v10 }
  0x28   : > { %426 = vmatprep.subr.bf16.mxu0 %v1027_v1  ;;  %899 = vmatprep.subr.bf16.mxu1 %v1027_v1 }
  0x2b   : > { %427 = vmatpush1.bf16.msra.mxu0 %v959_v11  ;;  %908 = vmatpush1.bf16.msra.mxu1 %v959_v11 }
  0x2e   : > { %443 = vmatmul.mubr.bf16.vlgmr.msra.gmra.mrb[0].mxu0 %v960_v12  ;;  %483 = vmatmul.mubr.bf16.vlgmr.msra.gmra.mrb[0].mxu1 %v963_v13 }
  0x2f   : > { %842 = vmatprep.mubr.msk.bf16.mxu0 %vm382_vm0, %v966_v14  ;;  %847 = vmatprep.mubr.msk.bf16.mxu1 %vm382_vm0, %v969_v15 }
  0x36   : > { %451 = vmatmul.mubr.bf16.gmra.mrb[4].mxu0 %v968_v16  ;;  %491 = vmatmul.mubr.bf16.gmra.mrb[4].mxu1 %v971_v17 }
  0x37   : > { %843 = vmatprep.mubr.msk.bf16.mxu0 %vm382_vm0, %v972_v18  ;;  %848 = vmatprep.mubr.msk.bf16.mxu1 %vm382_vm0, %v975_v19 }
  0x3e   : > { %459 = vmatmul.mubr.bf16.gmra.mrb[8].mxu0 %v974_v20  ;;  %499 = vmatmul.mubr.bf16.gmra.mrb[8].mxu1 %v977_v21 }
  0x3f   : > { %844 = vmatprep.mubr.msk.bf16.mxu0 %vm382_vm0, %v978_v22  ;;  %849 = vmatprep.mubr.msk.bf16.mxu1 %vm382_vm0, %v981_v23 }
  0x46   : > { %467 = vmatmul.mubr.bf16.gmra.mrb[12].mxu0 %v980_v24  ;;  %507 = vmatmul.mubr.bf16.gmra.mrb[12].mxu1 %v983_v25 }
  0x47   : > { %845 = vmatprep.mubr.msk.bf16.mxu0 %vm382_vm0, %v984_v26 }
  0x4e   : > { %475 = vmatmul.mubr.bf16.gmra.mrb[16].mxu0 %v986_v27 }
 0x101   : > { %v444_v29 = vpop.f32.mrb[0].mxu0  ;;  %v484_v30 = vpop.f32.mrb[0].mxu1 }
 0x102   : > { %v1152_v31 = vadd.f32 %v1149_v28, %v444_v29  ;;  %v446_v32 = vpop.f32.mrb[1].mxu0  ;;  %v1155_v33 = vadd.f32 %v1149_v28, %v484_v30  ;;  %v486_v34 = vpop.f32.mrb[1].mxu1 }
 0x103   : > { %v447_v35 = vpop.f32.mrb[2].mxu0  ;;  %v487_v36 = vpop.f32.mrb[2].mxu1 }
 0x104   : > { %v515_v37 = vmax.f32 %v1152_v31, 0.0  ;;  %v1159_v38 = vadd.f32 %v1149_v28, %v447_v35  ;;  %v449_v39 = vpop.f32.mrb[3].mxu0  ;;  %v525_v40 = vmax.f32 %v1155_v33, 0.0  ;;  %v1163_v41 = vadd.f32 %v1149_v28, %v487_v36  ;;  %v489_v42 = vpop.f32.mrb[3].mxu1 }
 0x106   : > { %v516_v43 = vmax.f32 %v1159_v38, 0.0  ;;  %v526_v44 = vmax.f32 %v1163_v41, 0.0  ;;  %538 = vst.msk [vmem:[#allocation2] sm:$0xff] (!%p850_p7), %vm537_vm1, %v515_v37  ;;  %548 = vst.msk [vmem:[#allocation2 + $0x50] sm:$0xff] (!%p850_p7), %vm537_vm1, %v525_v40 }
 0x108   : > { %539 = vst.msk [vmem:[#allocation2 + $0x8] sm:$0xff] (!%p850_p7), %vm537_vm1, %v516_v43  ;;  %549 = vst.msk [vmem:[#allocation2 + $0x58] sm:$0xff] (!%p850_p7), %vm537_vm1, %v526_v44 }
 0x109   : > { %v452_v45 = vpop.f32.mrb[4].mxu0  ;;  %v492_v46 = vpop.f32.mrb[4].mxu1 }
 0x10a   : > { %v1168_v47 = vadd.f32 %v1149_v28, %v452_v45  ;;  %v454_v48 = vpop.f32.mrb[5].mxu0  ;;  %v1171_v49 = vadd.f32 %v1149_v28, %v492_v46  ;;  %v494_v50 = vpop.f32.mrb[5].mxu1 }
 0x10b   : > { %v455_v51 = vpop.f32.mrb[6].mxu0  ;;  %v495_v52 = vpop.f32.mrb[6].mxu1 }
 0x10c   : > { %v517_v53 = vmax.f32 %v1168_v47, 0.0  ;;  %v1175_v54 = vadd.f32 %v1149_v28, %v455_v51  ;;  %v457_v55 = vpop.f32.mrb[7].mxu0  ;;  %v527_v56 = vmax.f32 %v1171_v49, 0.0  ;;  %v1179_v57 = vadd.f32 %v1149_v28, %v495_v52  ;;  %v497_v58 = vpop.f32.mrb[7].mxu1 }
 0x10e   : > { %v518_v59 = vmax.f32 %v1175_v54, 0.0  ;;  %v528_v60 = vmax.f32 %v1179_v57, 0.0  ;;  %540 = vst.msk [vmem:[#allocation2 + $0x10] sm:$0xff] (!%p850_p7), %vm537_vm1, %v517_v53  ;;  %550 = vst.msk [vmem:[#allocation2 + $0x60] sm:$0xff] (!%p850_p7), %vm537_vm1, %v527_v56 }
 0x110   : > { %541 = vst.msk [vmem:[#allocation2 + $0x18] sm:$0xff] (!%p850_p7), %vm537_vm1, %v518_v59  ;;  %551 = vst.msk [vmem:[#allocation2 + $0x68] sm:$0xff] (!%p850_p7), %vm537_vm1, %v528_v60 }
 0x111   : > { %v460_v61 = vpop.f32.mrb[8].mxu0  ;;  %v500_v62 = vpop.f32.mrb[8].mxu1 }
 0x112   : > { %v1184_v63 = vadd.f32 %v1149_v28, %v460_v61  ;;  %v462_v0 = vpop.f32.mrb[9].mxu0  ;;  %v1187_v1 = vadd.f32 %v1149_v28, %v500_v62  ;;  %v502_v2 = vpop.f32.mrb[9].mxu1 }
 0x113   : > { %v463_v3 = vpop.f32.mrb[10].mxu0  ;;  %v503_v4 = vpop.f32.mrb[10].mxu1 }
 0x114   : > { %v519_v5 = vmax.f32 %v1184_v63, 0.0  ;;  %v1191_v6 = vadd.f32 %v1149_v28, %v463_v3  ;;  %v465_v7 = vpop.f32.mrb[11].mxu0  ;;  %v529_v8 = vmax.f32 %v1187_v1, 0.0  ;;  %v1195_v9 = vadd.f32 %v1149_v28, %v503_v4  ;;  %v505_v10 = vpop.f32.mrb[11].mxu1 }
 0x116   : > { %v520_v11 = vmax.f32 %v1191_v6, 0.0  ;;  %v530_v12 = vmax.f32 %v1195_v9, 0.0  ;;  %542 = vst.msk [vmem:[#allocation2 + $0x20] sm:$0xff] (!%p850_p7), %vm537_vm1, %v519_v5  ;;  %552 = vst.msk [vmem:[#allocation2 + $0x70] sm:$0xff] (!%p850_p7), %vm537_vm1, %v529_v8 }
 0x118   : > { %543 = vst.msk [vmem:[#allocation2 + $0x28] sm:$0xff] (!%p850_p7), %vm537_vm1, %v520_v11  ;;  %553 = vst.msk [vmem:[#allocation2 + $0x78] sm:$0xff] (!%p850_p7), %vm537_vm1, %v530_v12 }
 0x119   : > { %v468_v13 = vpop.f32.mrb[12].mxu0  ;;  %v508_v14 = vpop.f32.mrb[12].mxu1 }
 0x11a   : > { %v1200_v15 = vadd.f32 %v1149_v28, %v468_v13  ;;  %v470_v16 = vpop.f32.mrb[13].mxu0  ;;  %v1203_v17 = vadd.f32 %v1149_v28, %v508_v14  ;;  %v510_v18 = vpop.f32.mrb[13].mxu1 }
 0x11b   : > { %v471_v19 = vpop.f32.mrb[14].mxu0  ;;  %v511_v20 = vpop.f32.mrb[14].mxu1 }
 0x11c   : > { %v521_v21 = vmax.f32 %v1200_v15, 0.0  ;;  %v472_v22 = vadd.f32 %v1149_v28, %v471_v19  ;;  %v473_v23 = vpop.f32.mrb[15].mxu0  ;;  %v531_v24 = vmax.f32 %v1203_v17, 0.0  ;;  %v1209_v25 = vadd.f32 %v1149_v28, %v511_v20  ;;  %v513_v26 = vpop.f32.mrb[15].mxu1 }
 0x11e   : > { %v522_v27 = vmax.f32 %v472_v22, 0.0  ;;  %v532_v29 = vmax.f32 %v1209_v25, 0.0  ;;  %544 = vst.msk [vmem:[#allocation2 + $0x30] sm:$0xff] (!%p850_p7), %vm537_vm1, %v521_v21  ;;  %554 = vst.msk [vmem:[#allocation2 + $0x80] sm:$0xff] (!%p850_p7), %vm537_vm1, %v531_v24 }
 0x120   : > { %536 = sbr.rel (%p850_p7) target bundleno = 297 (0x129), region = 36  ;;  %545 = vst.msk [vmem:[#allocation2 + $0x38] sm:$0xff] (!%p850_p7), %vm537_vm1, %v522_v27  ;;  %555 = vst.msk [vmem:[#allocation2 + $0x88] sm:$0xff] (!%p850_p7), %vm537_vm1, %v532_v29 }
 0x121   : > { %v476_v30 = vpop.f32.mrb[16].mxu0 }
 0x122   : > { %v477_v32 = vadd.f32 %v1149_v28, %v476_v30  ;;  %v478_v34 = vpop.f32.mrb[17].mxu0 }
 0x123   : > { %v479_v35 = vpop.f32.mrb[18].mxu0 }
 0x124   : > { %v523_v36 = vmax.f32 %v477_v32, 0.0  ;;  %v480_v39 = vadd.f32 %v1149_v28, %v479_v35  ;;  %v481_v42 = vpop.f32.mrb[19].mxu0 }
 0x126   : > { %v524_v45 = vmax.f32 %v480_v39, 0.0  ;;  %546 = vst.msk [vmem:[#allocation2 + $0x40] sm:$0xff] (!%p850_p7), %vm537_vm1, %v523_v36 }
 0x128   : > { %547 = vst.msk [vmem:[#allocation2 + $0x48] sm:$0xff] %vm537_vm1, %v524_v45 }
 0x129 PF: > { %p851_p8 = scmp.eq.s32.totalorder %s1009_s12, 0 }
 0x12a   : > { %v560_v28 = vld [vmem:[#allocation2] sm:$0xff] (!%p851_p8)  ;;  %vm596_vm2 = vcmask (!%p851_p8), 261120   ;;  %v561_v46 = vld [vmem:[#allocation2 + $0x8] sm:$0xff] (!%p851_p8)  ;;  %v562_v48 = vld [vmem:[#allocation2 + $0x10] sm:$0xff] (!%p851_p8) }
 0x12b   : > { %559 = sbr.rel (%p851_p8) target bundleno = 310 (0x136), region = 40  ;;  %v578_v50 = vmax.f32 (!%p851_p8), %v560_v28, %v515_v37  ;;  %v579_v51 = vmax.f32 (!%p851_p8), %v561_v46, %v516_v43  ;;  %v580_v52 = vmax.f32 (!%p851_p8), %v562_v48, %v517_v53  ;;  %v563_v55 = vld [vmem:[#allocation2 + $0x18] sm:$0xff] (!%p851_p8)  ;;  %v564_v58 = vld [vmem:[#allocation2 + $0x20] sm:$0xff] (!%p851_p8)  ;;  %v565_v61 = vld [vmem:[#allocation2 + $0x28] sm:$0xff] (!%p851_p8) }
 0x12c   : > { %v581_v62 = vmax.f32 (!%p851_p8), %v563_v55, %v518_v59  ;;  %v582_v0 = vmax.f32 (!%p851_p8), %v564_v58, %v519_v5  ;;  %v583_v2 = vmax.f32 (!%p851_p8), %v565_v61, %v520_v11  ;;  %v566_v3 = vld [vmem:[#allocation2 + $0x30] sm:$0xff] (!%p851_p8)  ;;  %v567_v4 = vld [vmem:[#allocation2 + $0x38] sm:$0xff] (!%p851_p8)  ;;  %v572_v6 = vld [vmem:[#allocation2 + $0x60] sm:$0xff] (!%p851_p8) }
 0x12d   : > { %597 = vst.msk [vmem:[#allocation2] sm:$0xff] (!%p851_p8), %vm596_vm2, %v578_v50  ;;  %598 = vst.msk [vmem:[#allocation2 + $0x8] sm:$0xff] (!%p851_p8), %vm596_vm2, %v579_v51  ;;  %v584_v37 = vmax.f32 (!%p851_p8), %v566_v3, %v521_v21  ;;  %v585_v38 = vmax.f32 (!%p851_p8), %v567_v4, %v522_v27  ;;  %v570_v53 = vld [vmem:[#allocation2 + $0x50] sm:$0xff] (!%p851_p8)  ;;  %v571_v54 = vld [vmem:[#allocation2 + $0x58] sm:$0xff] (!%p851_p8)  ;;  %v590_v11 = vmax.f32 (!%p851_p8), %v572_v6, %v527_v56 }
 0x12e   : > { %599 = vst.msk [vmem:[#allocation2 + $0x10] sm:$0xff] (!%p851_p8), %vm596_vm2, %v580_v52  ;;  %600 = vst.msk [vmem:[#allocation2 + $0x18] sm:$0xff] (!%p851_p8), %vm596_vm2, %v581_v62  ;;  %v588_v63 = vmax.f32 (!%p851_p8), %v570_v53, %v525_v40  ;;  %v589_v5 = vmax.f32 (!%p851_p8), %v571_v54, %v526_v44  ;;  %v573_v7 = vld [vmem:[#allocation2 + $0x68] sm:$0xff] (!%p851_p8)  ;;  %v574_v10 = vld [vmem:[#allocation2 + $0x70] sm:$0xff] (!%p851_p8) }
 0x12f   : > { %v568_v31 = vld [vmem:[#allocation2 + $0x40] sm:$0xff] (!%p851_p8)  ;;  %v569_v47 = vld [vmem:[#allocation2 + $0x48] sm:$0xff] (!%p851_p8)  ;;  %601 = vst.msk [vmem:[#allocation2 + $0x20] sm:$0xff] (!%p851_p8), %vm596_vm2, %v582_v0  ;;  %602 = vst.msk [vmem:[#allocation2 + $0x28] sm:$0xff] (!%p851_p8), %vm596_vm2, %v583_v2  ;;  %v591_v13 = vmax.f32 (!%p851_p8), %v573_v7, %v528_v60  ;;  %v592_v33 = vmax.f32 (!%p851_p8), %v574_v10, %v529_v8 }
 0x130   : > { %v586_v43 = vmax.f32 (!%p851_p8), %v568_v31, %v523_v36  ;;  %v587_v59 = vmax.f32 (!%p851_p8), %v569_v47, %v524_v45  ;;  %603 = vst.msk [vmem:[#allocation2 + $0x30] sm:$0xff] (!%p851_p8), %vm596_vm2, %v584_v37  ;;  %604 = vst.msk [vmem:[#allocation2 + $0x38] sm:$0xff] (!%p851_p8), %vm596_vm2, %v585_v38  ;;  %v575_v40 = vld [vmem:[#allocation2 + $0x78] sm:$0xff] (!%p851_p8)  ;;  %v576_v41 = vld [vmem:[#allocation2 + $0x80] sm:$0xff] (!%p851_p8) }
 0x131   : > { %v577_v44 = vld [vmem:[#allocation2 + $0x88] sm:$0xff] (!%p851_p8)  ;;  %607 = vst.msk [vmem:[#allocation2 + $0x50] sm:$0xff] (!%p851_p8), %vm596_vm2, %v588_v63  ;;  %608 = vst.msk [vmem:[#allocation2 + $0x58] sm:$0xff] (!%p851_p8), %vm596_vm2, %v589_v5  ;;  %v593_v14 = vmax.f32 (!%p851_p8), %v575_v40, %v530_v12  ;;  %v594_v49 = vmax.f32 (!%p851_p8), %v576_v41, %v531_v24 }
 0x132   : > { %605 = vst.msk [vmem:[#allocation2 + $0x40] sm:$0xff] %vm596_vm2, %v586_v43  ;;  %606 = vst.msk [vmem:[#allocation2 + $0x48] sm:$0xff] %vm596_vm2, %v587_v59  ;;  %v595_v56 = vmax.f32 %v577_v44, %v532_v29 }
 0x133   : > { %609 = vst.msk [vmem:[#allocation2 + $0x60] sm:$0xff] %vm596_vm2, %v590_v11  ;;  %610 = vst.msk [vmem:[#allocation2 + $0x68] sm:$0xff] %vm596_vm2, %v591_v13 }
 0x134   : > { %611 = vst.msk [vmem:[#allocation2 + $0x70] sm:$0xff] %vm596_vm2, %v592_v33  ;;  %612 = vst.msk [vmem:[#allocation2 + $0x78] sm:$0xff] %vm596_vm2, %v593_v14 }
 0x135   : > { %613 = vst.msk [vmem:[#allocation2 + $0x80] sm:$0xff] %vm596_vm2, %v594_v49  ;;  %614 = vst.msk [vmem:[#allocation2 + $0x88] sm:$0xff] %vm596_vm2, %v595_v56 }
 0x136 PF: > { %p852_p9 = scmp.ne.s32.totalorder %s1009_s12, 3 }
 0x137   : > { %vm709_vm3 = vcmask (!%p852_p9), 257024  }
 0x138   : > { %618 = sbr.rel (%p852_p9) target bundleno = 325 (0x145), region = 44  ;;  %v619_v57 = vld [vmem:[#allocation2] sm:$0xff] (!%p852_p9)  ;;  %v620_v60 = vld [vmem:[#allocation2 + $0x8] sm:$0xff] (!%p852_p9) }
 0x139   : > { %v621_v1 = vld [vmem:[#allocation2 + $0x10] sm:$0xff] (!%p852_p9)  ;;  %v873_v8 = vpack.c.bf16 (!%p852_p9), %v619_v57, %v619_v57  ;;  %v874_v9 = vpack.c.bf16 (!%p852_p9), %v620_v60, %v620_v60  ;;  %v622_v15 = vld [vmem:[#allocation2 + $0x18] sm:$0xff] (!%p852_p9) }
 0x13a   : > { %v875_v12 = vpack.c.bf16 (!%p852_p9), %v621_v1, %v621_v1  ;;  %v623_v16 = vld [vmem:[#allocation2 + $0x20] sm:$0xff] (!%p852_p9)  ;;  %v624_v17 = vld [vmem:[#allocation2 + $0x28] sm:$0xff] (!%p852_p9)  ;;  %v876_v18 = vpack.c.bf16 (!%p852_p9), %v622_v15, %v622_v15 }
 0x13b   : > { %v877_v19 = vpack.c.bf16 (!%p852_p9), %v623_v16, %v623_v16  ;;  %v878_v20 = vpack.c.bf16 (!%p852_p9), %v624_v17, %v624_v17  ;;  %v625_v21 = vld [vmem:[#allocation2 + $0x30] sm:$0xff] (!%p852_p9)  ;;  %v626_v22 = vld [vmem:[#allocation2 + $0x38] sm:$0xff] (!%p852_p9)  ;;  %710 = vst.msk [vmem:[%s1094_s7] sm:$0xf] (!%p852_p9), %vm709_vm3, %v873_v8  ;;  %711 = vst.msk [vmem:[%s1094_s7 + $0x4] sm:$0xf] (!%p852_p9), %vm709_vm3, %v874_v9 }
 0x13c   : > { %712 = vst.msk [vmem:[%s1094_s7 + $0x8] sm:$0xf] (!%p852_p9), %vm709_vm3, %v875_v12  ;;  %v879_v24 = vpack.c.bf16 (!%p852_p9), %v625_v21, %v625_v21  ;;  %v880_v25 = vpack.c.bf16 (!%p852_p9), %v626_v22, %v626_v22  ;;  %v629_v29 = vld [vmem:[#allocation2 + $0x50] sm:$0xff] (!%p852_p9)  ;;  %v630_v30 = vld [vmem:[#allocation2 + $0x58] sm:$0xff] (!%p852_p9)  ;;  %713 = vst.msk [vmem:[%s1094_s7 + $0xc] sm:$0xf] (!%p852_p9), %vm709_vm3, %v876_v18 }
 0x13d   : > { %v627_v23 = vld [vmem:[#allocation2 + $0x40] sm:$0xff] (!%p852_p9)  ;;  %v628_v27 = vld [vmem:[#allocation2 + $0x48] sm:$0xff] (!%p852_p9)  ;;  %714 = vst.msk [vmem:[%s1094_s7 + $0x10] sm:$0xf] (!%p852_p9), %vm709_vm3, %v877_v19  ;;  %715 = vst.msk [vmem:[%s1094_s7 + $0x14] sm:$0xf] (!%p852_p9), %vm709_vm3, %v878_v20  ;;  %v883_v34 = vpack.c.bf16 (!%p852_p9), %v629_v29, %v629_v29  ;;  %v884_v35 = vpack.c.bf16 (!%p852_p9), %v630_v30, %v630_v30 }
 0x13e   : > { %v881_v26 = vpack.c.bf16 (!%p852_p9), %v627_v23, %v627_v23  ;;  %v882_v32 = vpack.c.bf16 (!%p852_p9), %v628_v27, %v628_v27  ;;  %v631_v36 = vld [vmem:[#allocation2 + $0x60] sm:$0xff] (!%p852_p9)  ;;  %v632_v39 = vld [vmem:[#allocation2 + $0x68] sm:$0xff] (!%p852_p9)  ;;  %v633_v42 = vld [vmem:[#allocation2 + $0x70] sm:$0xff] (!%p852_p9)  ;;  %716 = vst.msk [vmem:[%s1094_s7 + $0x18] sm:$0xf] (!%p852_p9), %vm709_vm3, %v879_v24 }
 0x13f   : > { %717 = vst.msk [vmem:[%s1094_s7 + $0x1c] sm:$0xf] %vm709_vm3, %v880_v25  ;;  %v885_v45 = vpack.c.bf16 %v631_v36, %v631_v36  ;;  %v886_v28 = vpack.c.bf16 %v632_v39, %v632_v39  ;;  %v887_v46 = vpack.c.bf16 %v633_v42, %v633_v42  ;;  %v634_v48 = vld [vmem:[#allocation2 + $0x78] sm:$0xff]  ;;  %v635_v50 = vld [vmem:[#allocation2 + $0x80] sm:$0xff]  ;;  %v636_v51 = vld [vmem:[#allocation2 + $0x88] sm:$0xff] }
 0x140   : > { %718 = vst.msk [vmem:[%s1094_s7 + $0x20] sm:$0xf] %vm709_vm3, %v881_v26  ;;  %719 = vst.msk [vmem:[%s1094_s7 + $0x24] sm:$0xf] %vm709_vm3, %v882_v32  ;;  %v888_v52 = vpack.c.bf16 %v634_v48, %v634_v48  ;;  %v889_v55 = vpack.c.bf16 %v635_v50, %v635_v50  ;;  %v890_v58 = vpack.c.bf16 %v636_v51, %v636_v51 }
 0x141   : > { %720 = vst.msk [vmem:[%s1094_s7 + $0x28] sm:$0xf] %vm709_vm3, %v883_v34  ;;  %721 = vst.msk [vmem:[%s1094_s7 + $0x2c] sm:$0xf] %vm709_vm3, %v884_v35 }
 0x142   : > { %722 = vst.msk [vmem:[%s1094_s7 + $0x30] sm:$0xf] %vm709_vm3, %v885_v45  ;;  %723 = vst.msk [vmem:[%s1094_s7 + $0x34] sm:$0xf] %vm709_vm3, %v886_v28 }
 0x143   : > { %724 = vst.msk [vmem:[%s1094_s7 + $0x38] sm:$0xf] %vm709_vm3, %v887_v46  ;;  %725 = vst.msk [vmem:[%s1094_s7 + $0x3c] sm:$0xf] %vm709_vm3, %v888_v52 }
 0x144   : > { %726 = vst.msk [vmem:[%s1094_s7 + $0x40] sm:$0xf] %vm709_vm3, %v889_v55  ;;  %727 = vst.msk [vmem:[%s1094_s7 + $0x44] sm:$0xf] %vm709_vm3, %v890_v58 }
 0x145 PF: > { %s13_s16 = sadd.s32 1, %s1025_s16   ;;  %s1360_s12 = smov %s1017_s14 }
 0x146   : > { %p10_p10 = scmp.ge.s32.totalorder %s13_s16, 10   ;;  %s1361_s13 = smov %s1021_s15 }
 0x147   : > { %s1362_s14 = smov %s1365_s17  ;;  %s1363_s15 = smov %s1369_s18 }
 0x148   :  { %12 = sbr.rel (!%p10_p10) target bundleno = 3 (0x3), region = 74 }

// kernel: cnn_forward.6
= control target key start
LH: loop header
LB: loop body
LE: loop exit
PB: predicated region body
PF: predicated region fallthrough
CT: control target
= control target key end

     0   :  { %s1045_s12 = smov 0   ;;  %s1047_s13 = smov 0   ;;  %s1248_s0 = inlined_call_operand.vmem [shape: bf16[4,72,288], index: 0, kind: input, shape index: {}]   ;;  %s1249_s1 = inlined_call_operand.vmem [shape: bf16[288,64], index: 1, kind: input, shape index: {}]   ;;  %s1250_s2 = inlined_call_operand.vmem [shape: f32[1,64], index: 2, kind: input, shape index: {}]   ;;  %s1251_s3 = inlined_call_operand.vmem [shape: bf16[72,64], index: 3, kind: output, shape index: {}]  }
   0x1   :  { %s1049_s14 = smov 0  }
   0x2 LB: > { %s22_s15 = sadd.s32 1, %s1017_s13  ;;  %p792_p0 = scmp.ge.s32.totalorder %s1021_s14, 1  ;;  %s1021_s14 = sphi %s1049_s14, %s13_s14   ;;  %s1017_s13 = sphi %s1047_s13, %s1253_s13   ;;  %s1013_s12 = sphi %s1045_s12, %s1252_s12  }
   0x3   : > { %p23_p1 = scmp.ge.s32.totalorder %s22_s15, 4  ;;  %p157_p2 = scmp.lt.s32.totalorder %s1021_s14, 5 }
   0x5   : > { %s1255_s15 = smov (%p23_p1, %s22_s15), 0  ;;  %p158_p3 = pnand %p792_p0, %p157_p2 }
   0x6   : > { %v962_v0 = vld [vmem:[%s1249_s1 + $0x40] sm:$0xff] (!%p158_p3)   ;;  %v1023_v2 = vmov (!%p158_p3), 0.0   ;;  %v964_v3 = vld [vmem:[%s1249_s1 + $0x48] sm:$0xff] (!%p158_p3)   ;;  %p187_p4 = scmp.lt.s32.totalorder (!%p158_p3), %s1013_s12, 3  ;;  %vm1024_vm0 = vmmov (!%p158_p3), 0   ;;  %v966_v5 = vld [vmem:[%s1249_s1 + $0x50] sm:$0xff] (!%p158_p3)  }
   0x7   : > { %161 = sbr.rel (%p158_p3) target bundleno = 313 (0x139), region = 32  ;;  %v963_v1 = vld [vmem:[%s1249_s1] sm:$0xff] (!%p158_p3)   ;;  %911 = vmatprep.subr.bf16.mxu1 (!%p158_p3), %v1023_v2  ;;  %858 = vmatprep.subr.bf16.mxu0 (!%p158_p3), %v962_v0  ;;  %v965_v4 = vld [vmem:[%s1249_s1 + $0x8] sm:$0xff] (!%p158_p3)   ;;  %v967_v6 = vld [vmem:[%s1249_s1 + $0x10] sm:$0xff] (!%p158_p3)   ;;  %vm443_vm1 = vcmask (!%p158_p3), 261120   ;;  %p833_p5 = scmp.ne.s32.totalorder (!%p158_p3), %s1013_s12, 0 }
   0x8   : > { %859 = vmatpush3.bf16.msra.mxu0 (!%p158_p3), %v963_v1  ;;  %915 = vmatprep.mubr.msk.bf16.mxu1 (!%p158_p3), %vm1024_vm0, %v1023_v2  ;;  %v968_v7 = vld [vmem:[%s1249_s1 + $0x58] sm:$0xff] (!%p158_p3)   ;;  %v970_v9 = vld [vmem:[%s1249_s1 + $0x60] sm:$0xff] (!%p158_p3)   ;;  %v972_v12 = vld [vmem:[%s1249_s1 + $0x68] sm:$0xff] (!%p158_p3)  }
   0x9   : > { %860 = vmatprep.subr.bf16.mxu0 (!%p158_p3), %v964_v3  ;;  %v969_v8 = vld [vmem:[%s1249_s1 + $0x18] sm:$0xff] (!%p158_p3)   ;;  %v976_v10 = vld [vmem:[%s1249_s1 + $0x80] sm:$0xff] (!%p158_p3)   ;;  %v973_v13 = vld [vmem:[%s1249_s1 + $0x28] sm:$0xff] (!%p158_p3)  }
   0xa   : > { %v971_v11 = vld [vmem:[%s1249_s1 + $0x20] sm:$0xff] (!%p158_p3)   ;;  %912 = vmatpush3.bf16.msra.mxu1 (!%p158_p3), %v976_v10  ;;  %v974_v14 = vld [vmem:[%s1249_s1 + $0x70] sm:$0xff] (!%p158_p3)   ;;  %v982_v16 = vld [vmem:[%s1249_s1 + $0x88] sm:$0xff] (!%p158_p3)  }
   0xb   : > { %913 = vmatprep.subr.bf16.mxu1 (!%p158_p3), %v1023_v2  ;;  %v975_v18 = vld [vmem:[%s1249_s1 + $0x30] sm:$0xff] (!%p158_p3)   ;;  %v977_v19 = vld [vmem:[%s1249_s1 + $0x78] sm:$0xff] (!%p158_p3)   ;;  %v1160_v44 = vld [vmem:[%s1250_s2] ss:$0 sm:$0xff] (!%p158_p3) }
   0xc   : > { %861 = vmatpush3.bf16.msra.mxu0 (!%p158_p3), %v965_v4  ;;  %v978_v20 = vld [vmem:[%s1249_s1 + $0x38] sm:$0xff] (!%p158_p3)  }
   0xd   : > { %862 = vmatprep.subr.bf16.mxu0 (!%p158_p3), %v966_v5 }
   0xe   : > { %s188_s28 = scalar_select %p187_p4, %s1013_s12, 3  ;;  %914 = vmatpush3.bf16.msra.mxu1 %v982_v16 }
   0xf   : > { %vm616_vm2 = vcmask (!%p833_p5), 523264  }
  0x10   : > { %863 = vmatpush3.bf16.msra.mxu0 %v967_v6  ;;  %s935_s6 = smul.u32 108, %s188_s28 }
  0x11   : > { %864 = vmatprep.subr.bf16.mxu0 %v968_v7 }
  0x12   : > { %s1106_s19 = scalar_lea.vmem %s1248_s0, %s935_s6 }
  0x13   : > { %v981_v15 = vld [vmem:[%s1106_s19 + $0x4] ss:$12 sps:$4 sm:$0xff]   ;;  %v983_v17 = vld [vmem:[%s1106_s19 + $0x8] ss:$12 sps:$4 sm:$0xff]   ;;  %v987_v21 = vld [vmem:[%s1106_s19 + $0x20] ss:$12 sps:$4 sm:$0xff]  }
  0x14   : > { %865 = vmatpush3.bf16.msra.mxu0 %v969_v8  ;;  %491 = vmatprep.mubr.bf16.mxu0 %v981_v15  ;;  %v979_v22 = vld [vmem:[%s1106_s19] ss:$12 sps:$4 sm:$0xff]   ;;  %v984_v23 = vld [vmem:[%s1106_s19 + $0x1c] ss:$12 sps:$4 sm:$0xff]   ;;  %v991_v24 = vld [vmem:[%s1106_s19 + $0x38] ss:$12 sps:$4 sm:$0xff]  }
  0x15   : > { %866 = vmatprep.subr.bf16.mxu0 %v970_v9  ;;  %916 = vmatmul.mubr.msk.bf16.vlgmr.msra.gmra.mrb[0].mxu1 %vm443_vm1, %v983_v17  ;;  %v986_v25 = vld [vmem:[%s1106_s19 + $0x18] ss:$12 sps:$4 sm:$0xff]   ;;  %v988_v26 = vld [vmem:[%s1106_s19 + $0x34] ss:$12 sps:$4 sm:$0xff]   ;;  %v995_v27 = vld [vmem:[%s1106_s19 + $0x50] ss:$12 sps:$4 sm:$0xff]  }
  0x16   : > { %919 = vmatprep.mubr.msk.bf16.mxu1 %vm1024_vm0, %v1023_v2  ;;  %v990_v28 = vld [vmem:[%s1106_s19 + $0x30] ss:$12 sps:$4 sm:$0xff]   ;;  %v992_v29 = vld [vmem:[%s1106_s19 + $0x4c] ss:$12 sps:$4 sm:$0xff]   ;;  %v220_v30 = vld [vmem:[%s1106_s19 + $0x60] sm:$0xff] }
  0x17   : > { %v998_v31 = vld [vmem:[%s1106_s19 + $0x68] ss:$0 sps:$4 sm:$0xff]   ;;  %v808_v33 = vcombine.high %v220_v30, %v220_v30  ;;  %v807_v34 = vcombine.low %v220_v30, %v220_v30 }
  0x18   : > { %867 = vmatpush3.bf16.msra.mxu0 %v971_v11  ;;  %v994_v32 = vld [vmem:[%s1106_s19 + $0x48] ss:$12 sps:$4 sm:$0xff]  }
  0x19   : > { %868 = vmatprep.subr.bf16.mxu0 %v972_v12 }
  0x1c   : > { %869 = vmatpush3.bf16.msra.mxu0 %v973_v13 }
  0x1d   : > { %870 = vmatprep.subr.bf16.mxu0 %v974_v14  ;;  %920 = vmatmul.mubr.msk.bf16.gmra.mrb[4].mxu1 %vm443_vm1, %v987_v21 }
  0x1e   : > { %923 = vmatprep.mubr.msk.bf16.mxu1 %vm1024_vm0, %v1023_v2 }
  0x20   : > { %871 = vmatpush3.bf16.msra.mxu0 %v975_v18 }
  0x21   : > { %872 = vmatprep.subr.bf16.mxu0 %v977_v19 }
  0x24   : > { %873 = vmatpush3.bf16.msra.mxu0 %v978_v20 }
  0x25   : > { %924 = vmatmul.mubr.msk.bf16.gmra.mrb[8].mxu1 %vm443_vm1, %v991_v24 }
  0x26   : > { %927 = vmatprep.mubr.msk.bf16.mxu1 %vm1024_vm0, %v1023_v2 }
  0x27   : > { %492 = vmatmul.mubr.bf16.vlgmr.msra.gmra.mrb[0].mxu0 %v979_v22 }
  0x28   : > { %499 = vmatprep.mubr.bf16.mxu0 %v984_v23 }
  0x2d   : > { %928 = vmatmul.mubr.msk.bf16.gmra.mrb[12].mxu1 %vm443_vm1, %v995_v27 }
  0x2e   : > { %931 = vmatprep.mubr.msk.bf16.mxu1 %vm1024_vm0, %v1023_v2 }
  0x2f   : > { %500 = vmatmul.mubr.bf16.gmra.mrb[4].mxu0 %v986_v25 }
  0x30   : > { %507 = vmatprep.mubr.bf16.mxu0 %v988_v26 }
  0x35   : > { %932 = vmatmul.mubr.msk.bf16.gmra.mrb[16].mxu1 %vm443_vm1, %v998_v31 }
  0x37   : > { %508 = vmatmul.mubr.bf16.gmra.mrb[8].mxu0 %v990_v28 }
  0x38   : > { %515 = vmatprep.mubr.bf16.mxu0 %v992_v29 }
  0x3f   : > { %516 = vmatmul.mubr.bf16.gmra.mrb[12].mxu0 %v994_v32 }
  0x40   : > { %523 = vmatprep.mubr.bf16.mxu0 %v808_v33 }
  0x47   : > { %524 = vmatmul.mubr.bf16.gmra.mrb[16].mxu0 %v807_v34 }
  0xe8   : > { %v565_v35 = vpop.f32.mrb[0].mxu1 }
  0xe9   : > { %v917_v36 = vpop.f32.mrb[1].mxu1 }
  0xea   : > { %v568_v37 = vpop.f32.mrb[2].mxu1 }
  0xeb   : > { %v918_v38 = vpop.f32.mrb[3].mxu1 }
  0xf0   : > { %v573_v39 = vpop.f32.mrb[4].mxu1 }
  0xf1   : > { %v921_v40 = vpop.f32.mrb[5].mxu1 }
  0xf2   : > { %v576_v42 = vpop.f32.mrb[6].mxu1 }
  0xf3   : > { %v922_v45 = vpop.f32.mrb[7].mxu1 }
  0xf8   : > { %v581_v53 = vpop.f32.mrb[8].mxu1 }
  0xf9   : > { %v925_v54 = vpop.f32.mrb[9].mxu1 }
  0xfa   : > { %v874_v41 = vpop.f32.mrb[0].mxu0  ;;  %v584_v58 = vpop.f32.mrb[10].mxu1 }
  0xfb   : > { %v875_v43 = vpop.f32.mrb[1].mxu0  ;;  %v926_v60 = vpop.f32.mrb[11].mxu1 }
  0xfc   : > { %v876_v46 = vadd.f32 %v875_v43, %v874_v41  ;;  %v877_v47 = vpop.f32.mrb[2].mxu0 }
  0xfd   : > { %v878_v48 = vpop.f32.mrb[3].mxu0 }
  0xfe   : > { %v494_v49 = vadd.f32 %v876_v46, %v1160_v44  ;;  %v879_v50 = vadd.f32 %v878_v48, %v877_v47 }
 0x100   : > { %v1163_v51 = vadd.f32 %v565_v35, %v494_v49  ;;  %v497_v52 = vadd.f32 %v879_v50, %v1160_v44  ;;  %v589_v5 = vpop.f32.mrb[12].mxu1 }
 0x101   : > { %v929_v6 = vpop.f32.mrb[13].mxu1 }
 0x102   : > { %v603_v55 = vmax.f32 %v1163_v51, 0.0  ;;  %v1167_v56 = vadd.f32 %v568_v37, %v497_v52  ;;  %v880_v57 = vpop.f32.mrb[4].mxu0  ;;  %v592_v10 = vpop.f32.mrb[14].mxu1 }
 0x103   : > { %v881_v59 = vpop.f32.mrb[5].mxu0  ;;  %v930_v12 = vpop.f32.mrb[15].mxu1 }
 0x104   : > { %v604_v61 = vmax.f32 %v1167_v56, 0.0  ;;  %v882_v62 = vadd.f32 %v881_v59, %v880_v57  ;;  %v883_v63 = vpop.f32.mrb[6].mxu0  ;;  %617 = vst.msk [vmem:[#allocation2] sm:$0xff] (!%p833_p5), %vm616_vm2, %v603_v55 }
 0x105   : > { %v884_v0 = vpop.f32.mrb[7].mxu0 }
 0x106   : > { %v502_v1 = vadd.f32 %v882_v62, %v1160_v44  ;;  %v885_v2 = vadd.f32 %v884_v0, %v883_v63  ;;  %618 = vst.msk [vmem:[#allocation2 + $0x8] sm:$0xff] (!%p833_p5), %vm616_vm2, %v604_v61 }
 0x108   : > { %v1171_v3 = vadd.f32 %v573_v39, %v502_v1  ;;  %v505_v4 = vadd.f32 %v885_v2, %v1160_v44  ;;  %v597_v21 = vpop.f32.mrb[16].mxu1 }
 0x109   : > { %v933_v22 = vpop.f32.mrb[17].mxu1 }
 0x10a   : > { %v605_v7 = vmax.f32 %v1171_v3, 0.0  ;;  %v1175_v8 = vadd.f32 %v576_v42, %v505_v4  ;;  %v886_v9 = vpop.f32.mrb[8].mxu0  ;;  %v600_v26 = vpop.f32.mrb[18].mxu1 }
 0x10b   : > { %v887_v11 = vpop.f32.mrb[9].mxu0  ;;  %v934_v28 = vpop.f32.mrb[19].mxu1 }
 0x10c   : > { %v606_v13 = vmax.f32 %v1175_v8, 0.0  ;;  %v888_v14 = vadd.f32 %v887_v11, %v886_v9  ;;  %v889_v15 = vpop.f32.mrb[10].mxu0  ;;  %619 = vst.msk [vmem:[#allocation2 + $0x10] sm:$0xff] (!%p833_p5), %vm616_vm2, %v605_v7 }
 0x10d   : > { %v890_v16 = vpop.f32.mrb[11].mxu0 }
 0x10e   : > { %v510_v17 = vadd.f32 %v888_v14, %v1160_v44  ;;  %v891_v18 = vadd.f32 %v890_v16, %v889_v15  ;;  %620 = vst.msk [vmem:[#allocation2 + $0x18] sm:$0xff] (!%p833_p5), %vm616_vm2, %v606_v13 }
 0x110   : > { %v582_v19 = vadd.f32 %v581_v53, %v510_v17  ;;  %v513_v20 = vadd.f32 %v891_v18, %v1160_v44 }
 0x112   : > { %v607_v23 = vmax.f32 %v582_v19, 0.0  ;;  %v585_v24 = vadd.f32 %v584_v58, %v513_v20  ;;  %v892_v25 = vpop.f32.mrb[12].mxu0 }
 0x113   : > { %v893_v27 = vpop.f32.mrb[13].mxu0 }
 0x114   : > { %v608_v29 = vmax.f32 %v585_v24, 0.0  ;;  %v894_v30 = vadd.f32 %v893_v27, %v892_v25  ;;  %v895_v31 = vpop.f32.mrb[14].mxu0  ;;  %621 = vst.msk [vmem:[#allocation2 + $0x20] sm:$0xff] (!%p833_p5), %vm616_vm2, %v607_v23 }
 0x115   : > { %v896_v32 = vpop.f32.mrb[15].mxu0 }
 0x116   : > { %v518_v33 = vadd.f32 %v894_v30, %v1160_v44  ;;  %v897_v34 = vadd.f32 %v896_v32, %v895_v31  ;;  %622 = vst.msk [vmem:[#allocation2 + $0x28] sm:$0xff] (!%p833_p5), %vm616_vm2, %v608_v29 }
 0x118   : > { %v590_v35 = vadd.f32 %v589_v5, %v518_v33  ;;  %v521_v36 = vadd.f32 %v897_v34, %v1160_v44 }
 0x11a   : > { %v609_v37 = vmax.f32 %v590_v35, 0.0  ;;  %v593_v38 = vadd.f32 %v592_v10, %v521_v36  ;;  %v898_v39 = vpop.f32.mrb[16].mxu0 }
 0x11b   : > { %v899_v40 = vpop.f32.mrb[17].mxu0 }
 0x11c   : > { %v610_v41 = vmax.f32 %v593_v38, 0.0  ;;  %v900_v42 = vadd.f32 %v899_v40, %v898_v39  ;;  %v901_v43 = vpop.f32.mrb[18].mxu0  ;;  %615 = sbr.rel (%p833_p5) target bundleno = 293 (0x125), region = 36  ;;  %623 = vst.msk [vmem:[#allocation2 + $0x30] sm:$0xff] (!%p833_p5), %vm616_vm2, %v609_v37 }
 0x11d   : > { %v902_v45 = vpop.f32.mrb[19].mxu0 }
 0x11e   : > { %v526_v46 = vadd.f32 %v900_v42, %v1160_v44  ;;  %624 = vst.msk [vmem:[#allocation2 + $0x38] sm:$0xff] (!%p833_p5), %vm616_vm2, %v610_v41 }
 0x120   : > { %v598_v47 = vadd.f32 %v597_v21, %v526_v46 }
 0x122   : > { %v611_v48 = vmax.f32 %v598_v47, 0.0 }
 0x124   : > { %625 = vst.msk [vmem:[#allocation2 + $0x40] sm:$0xff] %vm616_vm2, %v611_v48 }
 0x125 PF: > { %p834_p6 = scmp.eq.s32.totalorder %s1013_s12, 0 }
 0x126   : > { %v630_v44 = vld [vmem:[#allocation2] sm:$0xff] (!%p834_p6)  ;;  %vm648_vm3 = vcmask (!%p834_p6), 523264   ;;  %v631_v49 = vld [vmem:[#allocation2 + $0x8] sm:$0xff] (!%p834_p6)  ;;  %v632_v50 = vld [vmem:[#allocation2 + $0x10] sm:$0xff] (!%p834_p6) }
 0x127   : > { %629 = sbr.rel (%p834_p6) target bundleno = 303 (0x12f), region = 40  ;;  %v639_v52 = vmax.f32 (!%p834_p6), %v630_v44, %v603_v55  ;;  %v640_v53 = vmax.f32 (!%p834_p6), %v631_v49, %v604_v61  ;;  %v641_v54 = vmax.f32 (!%p834_p6), %v632_v50, %v605_v7  ;;  %v633_v57 = vld [vmem:[#allocation2 + $0x18] sm:$0xff] (!%p834_p6)  ;;  %v634_v58 = vld [vmem:[#allocation2 + $0x20] sm:$0xff] (!%p834_p6)  ;;  %v635_v59 = vld [vmem:[#allocation2 + $0x28] sm:$0xff] (!%p834_p6) }
 0x128   : > { %v642_v60 = vmax.f32 (!%p834_p6), %v633_v57, %v606_v13  ;;  %v643_v62 = vmax.f32 (!%p834_p6), %v634_v58, %v607_v23  ;;  %v644_v63 = vmax.f32 (!%p834_p6), %v635_v59, %v608_v29  ;;  %v636_v0 = vld [vmem:[#allocation2 + $0x30] sm:$0xff] (!%p834_p6)  ;;  %v637_v1 = vld [vmem:[#allocation2 + $0x38] sm:$0xff] (!%p834_p6) }
 0x129   : > { %649 = vst.msk [vmem:[#allocation2] sm:$0xff] (!%p834_p6), %vm648_vm3, %v639_v52  ;;  %650 = vst.msk [vmem:[#allocation2 + $0x8] sm:$0xff] (!%p834_p6), %vm648_vm3, %v640_v53  ;;  %v645_v51 = vmax.f32 (!%p834_p6), %v636_v0, %v609_v37  ;;  %v646_v55 = vmax.f32 (!%p834_p6), %v637_v1, %v610_v41 }
 0x12a   : > { %651 = vst.msk [vmem:[#allocation2 + $0x10] sm:$0xff] (!%p834_p6), %vm648_vm3, %v641_v54  ;;  %652 = vst.msk [vmem:[#allocation2 + $0x18] sm:$0xff] (!%p834_p6), %vm648_vm3, %v642_v60 }
 0x12b   : > { %v638_v2 = vld [vmem:[#allocation2 + $0x40] sm:$0xff] (!%p834_p6)  ;;  %653 = vst.msk [vmem:[#allocation2 + $0x20] sm:$0xff] (!%p834_p6), %vm648_vm3, %v643_v62  ;;  %654 = vst.msk [vmem:[#allocation2 + $0x28] sm:$0xff] (!%p834_p6), %vm648_vm3, %v644_v63 }
 0x12c   : > { %v647_v56 = vmax.f32 (!%p834_p6), %v638_v2, %v611_v48  ;;  %655 = vst.msk [vmem:[#allocation2 + $0x30] sm:$0xff] (!%p834_p6), %vm648_vm3, %v645_v51  ;;  %656 = vst.msk [vmem:[#allocation2 + $0x38] sm:$0xff] (!%p834_p6), %vm648_vm3, %v646_v55 }
 0x12e   : > { %657 = vst.msk [vmem:[#allocation2 + $0x40] sm:$0xff] %vm648_vm3, %v647_v56 }
 0x12f PF: > { %p835_p7 = scmp.ne.s32.totalorder %s1013_s12, 3 }
 0x130   : > { %vm708_vm4 = vcmask (!%p835_p7), 519168  }
 0x131   : > { %661 = sbr.rel (%p835_p7) target bundleno = 313 (0x139), region = 44  ;;  %v662_v61 = vld [vmem:[#allocation2] sm:$0xff] (!%p835_p7)  ;;  %v663_v3 = vld [vmem:[#allocation2 + $0x8] sm:$0xff] (!%p835_p7) }
 0x132   : > { %v664_v4 = vld [vmem:[#allocation2 + $0x10] sm:$0xff] (!%p835_p7)  ;;  %v849_v5 = vpack.c.bf16 (!%p835_p7), %v662_v61, %v662_v61  ;;  %v850_v6 = vpack.c.bf16 (!%p835_p7), %v663_v3, %v663_v3  ;;  %v665_v8 = vld [vmem:[#allocation2 + $0x18] sm:$0xff] (!%p835_p7) }
 0x133   : > { %v851_v7 = vpack.c.bf16 (!%p835_p7), %v664_v4, %v664_v4  ;;  %v666_v9 = vld [vmem:[#allocation2 + $0x20] sm:$0xff] (!%p835_p7)  ;;  %v667_v10 = vld [vmem:[#allocation2 + $0x28] sm:$0xff] (!%p835_p7)  ;;  %v852_v11 = vpack.c.bf16 (!%p835_p7), %v665_v8, %v665_v8 }
 0x134   : > { %v853_v12 = vpack.c.bf16 (!%p835_p7), %v666_v9, %v666_v9  ;;  %v854_v13 = vpack.c.bf16 (!%p835_p7), %v667_v10, %v667_v10  ;;  %v668_v14 = vld [vmem:[#allocation2 + $0x30] sm:$0xff] (!%p835_p7)  ;;  %v669_v15 = vld [vmem:[#allocation2 + $0x38] sm:$0xff] (!%p835_p7)  ;;  %709 = vst.msk [vmem:[%s1251_s3] sm:$0xf] (!%p835_p7), %vm708_vm4, %v849_v5  ;;  %710 = vst.msk [vmem:[%s1251_s3 + $0x4] sm:$0xf] (!%p835_p7), %vm708_vm4, %v850_v6 }
 0x135   : > { %v670_v16 = vld [vmem:[#allocation2 + $0x40] sm:$0xff] (!%p835_p7)  ;;  %711 = vst.msk [vmem:[%s1251_s3 + $0x8] sm:$0xf] (!%p835_p7), %vm708_vm4, %v851_v7  ;;  %v855_v17 = vpack.c.bf16 (!%p835_p7), %v668_v14, %v668_v14  ;;  %v856_v18 = vpack.c.bf16 (!%p835_p7), %v669_v15, %v669_v15  ;;  %712 = vst.msk [vmem:[%s1251_s3 + $0xc] sm:$0xf] (!%p835_p7), %vm708_vm4, %v852_v11 }
 0x136   : > { %v857_v19 = vpack.c.bf16 (!%p835_p7), %v670_v16, %v670_v16  ;;  %713 = vst.msk [vmem:[%s1251_s3 + $0x10] sm:$0xf] (!%p835_p7), %vm708_vm4, %v853_v12  ;;  %714 = vst.msk [vmem:[%s1251_s3 + $0x14] sm:$0xf] (!%p835_p7), %vm708_vm4, %v854_v13 }
 0x137   : > { %715 = vst.msk [vmem:[%s1251_s3 + $0x18] sm:$0xf] (!%p835_p7), %vm708_vm4, %v855_v17  ;;  %716 = vst.msk [vmem:[%s1251_s3 + $0x1c] sm:$0xf] (!%p835_p7), %vm708_vm4, %v856_v18 }
 0x138   : > { %717 = vst.msk [vmem:[%s1251_s3 + $0x20] sm:$0xf] %vm708_vm4, %v857_v19 }
 0x139 PF: > { %s13_s14 = sadd.s32 1, %s1021_s14   ;;  %s1252_s12 = smov %s1017_s13 }
 0x13a   : > { %p10_p8 = scmp.ge.s32.totalorder %s13_s14, 6   ;;  %s1253_s13 = smov %s1255_s15 }
 0x13c   :  { %12 = sbr.rel (!%p10_p8) target bundleno = 2 (0x2), region = 74 }

// kernel: cnn_forward.7
= control target key start
LH: loop header
LB: loop body
LE: loop exit
PB: predicated region body
PF: predicated region fallthrough
CT: control target
= control target key end

     0   :  { %v333_v27 = vlaneseq  ;;  %v2511_v35 = vmov 1966171168   ;;  %s3096_s0 = inlined_call_operand.vmem [shape: bf16[2,2304], index: 0, kind: input, shape index: {}]   ;;  %s3097_s1 = inlined_call_operand.vmem [shape: bf16[2304,128], index: 1, kind: input, shape index: {}]   ;;  %s3098_s2 = inlined_call_operand.vmem [shape: f32[1,128], index: 2, kind: input, shape index: {}]   ;;  %s3099_s3 = inlined_call_operand.vmem [shape: bf16[128,64], index: 3, kind: input, shape index: {}]   ;;  %s3100_s4 = inlined_call_operand.vmem [shape: f32[1,64], index: 4, kind: input, shape index: {}]   ;;  %s3101_s5 = inlined_call_operand.vmem [shape: bf16[64,7], index: 5, kind: input, shape index: {}]   ;;  %s3102_s6 = inlined_call_operand.vmem [shape: f32[1,7], index: 6, kind: input, shape index: {}]   ;;  %s3103_s7 = inlined_call_operand.hbm [shape: f32[2,7], index: 7, kind: output, shape index: {}]  }
   0x1   :  { %v2325_v0 = vld [vmem:[%s3097_s1 + $0x40] sm:$0xff]   ;;  %v2329_v4 = vld [vmem:[%s3097_s1 + $0x48] sm:$0xff]   ;;  %v2333_v8 = vld [vmem:[%s3097_s1 + $0x50] sm:$0xff]   ;;  %v331_v36 = vunpack.c.l.s4 %v2511_v35 }
   0x2   :  { %v2326_v1 = vld [vmem:[%s3097_s1] sm:$0xff]   ;;  %2077 = vmatprep.subr.bf16.mxu0 %v2325_v0  ;;  %v2330_v5 = vld [vmem:[%s3097_s1 + $0x8] sm:$0xff]   ;;  %v2334_v9 = vld [vmem:[%s3097_s1 + $0x10] sm:$0xff]   ;;  %v334_v32 = vshrl.u32 %v333_v27, 7 }
   0x3   :  { %v2327_v2 = vld [vmem:[%s3097_s1 + $0xc0] sm:$0xff]   ;;  %2078 = vmatpush3.bf16.msra.mxu0 %v2326_v1  ;;  %v2331_v6 = vld [vmem:[%s3097_s1 + $0xc8] sm:$0xff]   ;;  %v2335_v10 = vld [vmem:[%s3097_s1 + $0xd0] sm:$0xff]   ;;  %v332_v39 = vunpack.c.0.s8 %v331_v36 }
   0x4   :  { %v2328_v3 = vld [vmem:[%s3097_s1 + $0x80] sm:$0xff]   ;;  %2099 = vmatprep.subr.bf16.mxu1 %v2327_v2  ;;  %2079 = vmatprep.subr.bf16.mxu0 %v2329_v4  ;;  %v2332_v7 = vld [vmem:[%s3097_s1 + $0x88] sm:$0xff]   ;;  %v2336_v11 = vld [vmem:[%s3097_s1 + $0x90] sm:$0xff]  }
   0x5   :  { %2100 = vmatpush3.bf16.msra.mxu1 %v2328_v3  ;;  %v2337_v12 = vld [vmem:[%s3097_s1 + $0x58] sm:$0xff]   ;;  %v2341_v16 = vld [vmem:[%s3097_s1 + $0x60] sm:$0xff]   ;;  %v2345_v20 = vld [vmem:[%s3097_s1 + $0x68] sm:$0xff]   ;;  %v2660_v41 = vsub.s32 %v332_v39, %v334_v32 }
   0x6   :  { %2101 = vmatprep.subr.bf16.mxu1 %v2331_v6  ;;  %v2338_v13 = vld [vmem:[%s3097_s1 + $0x18] sm:$0xff]   ;;  %v2342_v17 = vld [vmem:[%s3097_s1 + $0x20] sm:$0xff]   ;;  %v2346_v21 = vld [vmem:[%s3097_s1 + $0x28] sm:$0xff]  }
   0x7   :  { %2080 = vmatpush3.bf16.msra.mxu0 %v2330_v5  ;;  %v2339_v14 = vld [vmem:[%s3097_s1 + $0xd8] sm:$0xff]   ;;  %v2343_v18 = vld [vmem:[%s3097_s1 + $0xe0] sm:$0xff]   ;;  %v2347_v22 = vld [vmem:[%s3097_s1 + $0xe8] sm:$0xff]  }
   0x8   :  { %2081 = vmatprep.subr.bf16.mxu0 %v2333_v8  ;;  %v2340_v15 = vld [vmem:[%s3097_s1 + $0x98] sm:$0xff]   ;;  %v2344_v19 = vld [vmem:[%s3097_s1 + $0xa0] sm:$0xff]   ;;  %v2348_v23 = vld [vmem:[%s3097_s1 + $0xa8] sm:$0xff]  }
   0x9   :  { %2102 = vmatpush3.bf16.msra.mxu1 %v2332_v7  ;;  %v2349_v24 = vld [vmem:[%s3097_s1 + $0x70] sm:$0xff]   ;;  %v2353_v29 = vld [vmem:[%s3097_s1 + $0x78] sm:$0xff]   ;;  %v28_v33 = vld [vmem:[%s3096_s0] sm:$0xff] }
   0xa   :  { %2103 = vmatprep.subr.bf16.mxu1 %v2335_v10  ;;  %v2350_v25 = vld [vmem:[%s3097_s1 + $0x30] sm:$0xff]   ;;  %v2354_v30 = vld [vmem:[%s3097_s1 + $0x38] sm:$0xff]   ;;  %v2358_v37 = vld [vmem:[%s3097_s1 + $0x140] sm:$0xff]   ;;  %v329_v38 = vcombine.high %v28_v33, %v28_v33  ;;  %v336_v42 = vrot.slane %v28_v33, %v2660_v41 }
   0xb   :  { %2082 = vmatpush3.bf16.msra.mxu0 %v2334_v9  ;;  %v2351_v26 = vld [vmem:[%s3097_s1 + $0xf0] sm:$0xff]   ;;  %v2355_v31 = vld [vmem:[%s3097_s1 + $0xf8] sm:$0xff]   ;;  %v2360_v40 = vld [vmem:[%s3097_s1 + $0x1c0] sm:$0xff]  }
   0xc   :  { %2083 = vmatprep.subr.bf16.mxu0 %v2337_v12  ;;  %v2352_v28 = vld [vmem:[%s3097_s1 + $0xb0] sm:$0xff]   ;;  %v2357_v34 = vld [vmem:[%s3097_s1 + $0xb8] sm:$0xff]   ;;  %v2664_v43 = vrot.slane %v329_v38, %v2660_v41  ;;  %v344_v44 = vcombine.high %v336_v42, %v336_v42  ;;  %v352_v45 = vrot.slane %v336_v42, %v2660_v41  ;;  %v2359_v48 = vld [vmem:[%s3097_s1 + $0x100] sm:$0xff]  }
   0xd   :  { %2104 = vmatpush3.bf16.msra.mxu1 %v2336_v11  ;;  %v2362_v51 = vld [vmem:[%s3097_s1 + $0x148] sm:$0xff]   ;;  %v2361_v53 = vld [vmem:[%s3097_s1 + $0x180] sm:$0xff]   ;;  %v2366_v57 = vld [vmem:[%s3097_s1 + $0x150] sm:$0xff]  }
   0xe   :  { %2105 = vmatprep.subr.bf16.mxu1 %v2339_v14  ;;  %v345_v46 = vcombine.high %v2664_v43, %v2664_v43  ;;  %v366_v47 = vrot.slane %v344_v44, %v2660_v41  ;;  %v374_v50 = vcombine.high %v352_v45, %v352_v45  ;;  %v2364_v54 = vld [vmem:[%s3097_s1 + $0x1c8] sm:$0xff]   ;;  %v2368_v59 = vld [vmem:[%s3097_s1 + $0x1d0] sm:$0xff]   ;;  %v2370_v61 = vld [vmem:[%s3097_s1 + $0x158] sm:$0xff]  }
   0xf   :  { %2084 = vmatpush3.bf16.msra.mxu0 %v2338_v13  ;;  %v2363_v56 = vld [vmem:[%s3097_s1 + $0x108] sm:$0xff]   ;;  %v2367_v60 = vld [vmem:[%s3097_s1 + $0x110] sm:$0xff]   ;;  %v2372_v63 = vld [vmem:[%s3097_s1 + $0x1d8] sm:$0xff]  }
  0x10   :  { %2085 = vmatprep.subr.bf16.mxu0 %v2341_v16  ;;  %v373_v49 = vrot.slane %v345_v46, %v2660_v41  ;;  %1363 = vmatprep.mubr.bf16.mxu0 %v366_v47  ;;  %v376_v52 = vcombine.high %v366_v47, %v366_v47  ;;  %v2365_v58 = vld [vmem:[%s3097_s1 + $0x188] sm:$0xff]   ;;  %v2369_v62 = vld [vmem:[%s3097_s1 + $0x190] sm:$0xff]   ;;  %v2371_v0 = vld [vmem:[%s3097_s1 + $0x118] sm:$0xff]  }
  0x11   :  { %2106 = vmatpush3.bf16.msra.mxu1 %v2340_v15  ;;  %v2374_v1 = vld [vmem:[%s3097_s1 + $0x160] sm:$0xff]   ;;  %v2373_v2 = vld [vmem:[%s3097_s1 + $0x198] sm:$0xff]   ;;  %v2378_v5 = vld [vmem:[%s3097_s1 + $0x168] sm:$0xff]  }
  0x12   :  { %2107 = vmatprep.subr.bf16.mxu1 %v2343_v18  ;;  %v377_v55 = vcombine.high %v373_v49, %v373_v49  ;;  %1403 = vmatprep.mubr.bf16.mxu1 %v376_v52  ;;  %v2376_v3 = vld [vmem:[%s3097_s1 + $0x1e0] sm:$0xff]   ;;  %v2380_v7 = vld [vmem:[%s3097_s1 + $0x1e8] sm:$0xff]   ;;  %v2382_v9 = vld [vmem:[%s3097_s1 + $0x170] sm:$0xff]  }
  0x13   :  { %2086 = vmatpush3.bf16.msra.mxu0 %v2342_v17  ;;  %v2375_v4 = vld [vmem:[%s3097_s1 + $0x120] sm:$0xff]   ;;  %v2379_v8 = vld [vmem:[%s3097_s1 + $0x128] sm:$0xff]   ;;  %v2384_v11 = vld [vmem:[%s3097_s1 + $0x1f0] sm:$0xff]   ;;  %v359_v17 = vrot.slane %v2664_v43, %v2660_v41 }
  0x14   :  { %2087 = vmatprep.subr.bf16.mxu0 %v2345_v20  ;;  %v2377_v6 = vld [vmem:[%s3097_s1 + $0x1a0] sm:$0xff]   ;;  %v2381_v10 = vld [vmem:[%s3097_s1 + $0x1a8] sm:$0xff]   ;;  %v2383_v12 = vld [vmem:[%s3097_s1 + $0x130] sm:$0xff]  }
  0x15   :  { %2108 = vmatpush3.bf16.msra.mxu1 %v2344_v19  ;;  %v2386_v13 = vld [vmem:[%s3097_s1 + $0x178] sm:$0xff]   ;;  %v2385_v14 = vld [vmem:[%s3097_s1 + $0x1b0] sm:$0xff]   ;;  %v2390_v18 = vld [vmem:[%s3097_s1 + $0x240] sm:$0xff]  }
  0x16   :  { %2109 = vmatprep.subr.bf16.mxu1 %v2347_v22  ;;  %v2388_v15 = vld [vmem:[%s3097_s1 + $0x1f8] sm:$0xff]   ;;  %v2392_v20 = vld [vmem:[%s3097_s1 + $0x2c0] sm:$0xff]   ;;  %v375_v22 = vcombine.high %v359_v17, %v359_v17  ;;  %v2398_v27 = vld [vmem:[%s3097_s1 + $0x250] sm:$0xff]  }
  0x17   :  { %2088 = vmatpush3.bf16.msra.mxu0 %v2346_v21  ;;  %v2387_v16 = vld [vmem:[%s3097_s1 + $0x138] sm:$0xff]   ;;  %v2391_v21 = vld [vmem:[%s3097_s1 + $0x200] sm:$0xff]   ;;  %v2401_v32 = vld [vmem:[%s3097_s1 + $0x290] sm:$0xff]  }
  0x18   :  { %2089 = vmatprep.subr.bf16.mxu0 %v2349_v24  ;;  %v2389_v19 = vld [vmem:[%s3097_s1 + $0x1b8] sm:$0xff]   ;;  %v2393_v24 = vld [vmem:[%s3097_s1 + $0x280] sm:$0xff]   ;;  %v2410_v39 = vld [vmem:[%s3097_s1 + $0x268] sm:$0xff]  }
  0x19   :  { %2110 = vmatpush3.bf16.msra.mxu1 %v2348_v23  ;;  %v2394_v23 = vld [vmem:[%s3097_s1 + $0x248] sm:$0xff]   ;;  %v2404_v33 = vld [vmem:[%s3097_s1 + $0x2d8] sm:$0xff]   ;;  %v2406_v35 = vld [vmem:[%s3097_s1 + $0x260] sm:$0xff]  }
  0x1a   :  { %2111 = vmatprep.subr.bf16.mxu1 %v2351_v26  ;;  %v2395_v26 = vld [vmem:[%s3097_s1 + $0x208] sm:$0xff]   ;;  %v2405_v36 = vld [vmem:[%s3097_s1 + $0x298] sm:$0xff]   ;;  %v2407_v38 = vld [vmem:[%s3097_s1 + $0x220] sm:$0xff]  }
  0x1b   :  { %2090 = vmatpush3.bf16.msra.mxu0 %v2350_v25  ;;  %v2396_v25 = vld [vmem:[%s3097_s1 + $0x2c8] sm:$0xff]   ;;  %v2414_v44 = vld [vmem:[%s3097_s1 + $0x270] sm:$0xff]  }
  0x1c   :  { %2091 = vmatprep.subr.bf16.mxu0 %v2353_v29  ;;  %v2400_v29 = vld [vmem:[%s3097_s1 + $0x2d0] sm:$0xff]   ;;  %v2412_v42 = vld [vmem:[%s3097_s1 + $0x2e8] sm:$0xff]  }
  0x1d   :  { %2112 = vmatpush3.bf16.msra.mxu1 %v2352_v28  ;;  %v2397_v28 = vld [vmem:[%s3097_s1 + $0x288] sm:$0xff]  }
  0x1e   :  { %2113 = vmatprep.subr.bf16.mxu1 %v2355_v31  ;;  %v2402_v31 = vld [vmem:[%s3097_s1 + $0x258] sm:$0xff]   ;;  %v2411_v43 = vld [vmem:[%s3097_s1 + $0x228] sm:$0xff]  }
  0x1f   :  { %2092 = vmatpush3.bf16.msra.mxu0 %v2354_v30  ;;  %v2399_v30 = vld [vmem:[%s3097_s1 + $0x210] sm:$0xff]   ;;  %v2413_v46 = vld [vmem:[%s3097_s1 + $0x2a8] sm:$0xff]  }
  0x20   :  { %2121 = vmatprep.subr.bf16.mxu0 %v2358_v37  ;;  %v2408_v37 = vld [vmem:[%s3097_s1 + $0x2e0] sm:$0xff]  }
  0x21   :  { %2114 = vmatpush3.bf16.msra.mxu1 %v2357_v34  ;;  %v2403_v34 = vld [vmem:[%s3097_s1 + $0x218] sm:$0xff]  }
  0x22   :  { %2143 = vmatprep.subr.bf16.mxu1 %v2360_v40  ;;  %1364 = vmatmul.mubr.bf16.vlgmr.msra.gmra.mrb[0].mxu0 %v352_v45  ;;  %v2409_v40 = vld [vmem:[%s3097_s1 + $0x2a0] sm:$0xff]   ;;  %v29_v45 = vld [vmem:[%s3096_s0 + $0x8] sm:$0xff] }
  0x23   :  { %2122 = vmatpush3.bf16.msra.mxu0 %v2359_v48  ;;  %1443 = vmatprep.mubr.bf16.mxu0 %v373_v49  ;;  %v385_v47 = vrot.slane %v29_v45, %v2660_v41  ;;  %v378_v48 = vcombine.high %v29_v45, %v29_v45  ;;  %v2416_v49 = vld [vmem:[%s3097_s1 + $0x2f0] sm:$0xff]   ;;  %v2462_v45 = vld [vmem:[%s3097_s1 + $0x418] sm:$0xff]  }
  0x24   :  { %1404 = vmatmul.mubr.bf16.vlgmr.msra.gmra.mrb[0].mxu1 %v374_v50  ;;  %2123 = vmatprep.subr.bf16.mxu0 %v2362_v51  ;;  %v2415_v50 = vld [vmem:[%s3097_s1 + $0x230] sm:$0xff]  }
  0x25   :  { %2144 = vmatpush3.bf16.msra.mxu1 %v2361_v53  ;;  %1483 = vmatprep.mubr.bf16.mxu1 %v377_v55  ;;  %v393_v51 = vcombine.high %v385_v47, %v385_v47  ;;  %v2849_v52 = vrot.slane %v378_v48, %v2660_v41  ;;  %v2418_v53 = vld [vmem:[%s3097_s1 + $0x278] sm:$0xff]  }
  0x26   :  { %2145 = vmatprep.subr.bf16.mxu1 %v2364_v54  ;;  %v2417_v54 = vld [vmem:[%s3097_s1 + $0x2b0] sm:$0xff]  }
  0x27   :  { %2124 = vmatpush3.bf16.msra.mxu0 %v2363_v56  ;;  %v415_v55 = vrot.slane %v393_v51, %v2660_v41  ;;  %v394_v56 = vcombine.high %v2849_v52, %v2849_v52 }
  0x28   :  { %2125 = vmatprep.subr.bf16.mxu0 %v2366_v57  ;;  %v2420_v57 = vld [vmem:[%s3097_s1 + $0x2f8] sm:$0xff]  }
  0x29   :  { %2146 = vmatpush3.bf16.msra.mxu1 %v2365_v58  ;;  %v2419_v58 = vld [vmem:[%s3097_s1 + $0x238] sm:$0xff]  }
  0x2a   :  { %2147 = vmatprep.subr.bf16.mxu1 %v2368_v59  ;;  %v425_v59 = vcombine.high %v415_v55, %v415_v55 }
  0x2b   :  { %2126 = vmatpush3.bf16.msra.mxu0 %v2367_v60  ;;  %v401_v60 = vrot.slane %v385_v47, %v2660_v41  ;;  %v2463_v47 = vld [vmem:[%s3097_s1 + $0x460] sm:$0xff]  }
  0x2c   :  { %2127 = vmatprep.subr.bf16.mxu0 %v2370_v61  ;;  %v2422_v61 = vld [vmem:[%s3097_s1 + $0x340] sm:$0xff]  }
  0x2d   :  { %2148 = vmatpush3.bf16.msra.mxu1 %v2369_v62  ;;  %v2421_v62 = vld [vmem:[%s3097_s1 + $0x2b8] sm:$0xff]  }
  0x2e   :  { %2149 = vmatprep.subr.bf16.mxu1 %v2372_v63  ;;  %v422_v63 = vrot.slane %v394_v56, %v2660_v41 }
  0x2f   :  { %2128 = vmatpush3.bf16.msra.mxu0 %v2371_v0  ;;  %v2424_v0 = vld [vmem:[%s3097_s1 + $0x3c0] sm:$0xff]  }
  0x30   :  { %2129 = vmatprep.subr.bf16.mxu0 %v2374_v1  ;;  %v2423_v1 = vld [vmem:[%s3097_s1 + $0x300] sm:$0xff]  }
  0x31   :  { %2150 = vmatpush3.bf16.msra.mxu1 %v2373_v2  ;;  %v423_v2 = vcombine.high %v401_v60, %v401_v60 }
  0x32   :  { %2151 = vmatprep.subr.bf16.mxu1 %v2376_v3  ;;  %v2426_v3 = vld [vmem:[%s3097_s1 + $0x348] sm:$0xff]  }
  0x33   :  { %2130 = vmatpush3.bf16.msra.mxu0 %v2375_v4  ;;  %v2425_v4 = vld [vmem:[%s3097_s1 + $0x380] sm:$0xff]  }
  0x34   :  { %2131 = vmatprep.subr.bf16.mxu0 %v2378_v5  ;;  %v426_v5 = vcombine.high %v422_v63, %v422_v63 }
  0x35   :  { %2152 = vmatpush3.bf16.msra.mxu1 %v2377_v6  ;;  %v2428_v6 = vld [vmem:[%s3097_s1 + $0x3c8] sm:$0xff]  }
  0x36   :  { %2153 = vmatprep.subr.bf16.mxu1 %v2380_v7  ;;  %v2427_v7 = vld [vmem:[%s3097_s1 + $0x308] sm:$0xff]  }
  0x37   :  { %2132 = vmatpush3.bf16.msra.mxu0 %v2379_v8  ;;  %v2430_v8 = vld [vmem:[%s3097_s1 + $0x350] sm:$0xff]  }
  0x38   :  { %2133 = vmatprep.subr.bf16.mxu0 %v2382_v9  ;;  %v2429_v9 = vld [vmem:[%s3097_s1 + $0x388] sm:$0xff]  }
  0x39   :  { %2154 = vmatpush3.bf16.msra.mxu1 %v2381_v10  ;;  %v2432_v10 = vld [vmem:[%s3097_s1 + $0x3d0] sm:$0xff]  }
  0x3a   :  { %2155 = vmatprep.subr.bf16.mxu1 %v2384_v11  ;;  %v2431_v11 = vld [vmem:[%s3097_s1 + $0x310] sm:$0xff]  }
  0x3b   :  { %2134 = vmatpush3.bf16.msra.mxu0 %v2383_v12  ;;  %v2434_v12 = vld [vmem:[%s3097_s1 + $0x358] sm:$0xff]  }
  0x3c   :  { %2135 = vmatprep.subr.bf16.mxu0 %v2386_v13  ;;  %v2433_v13 = vld [vmem:[%s3097_s1 + $0x390] sm:$0xff]  }
  0x3d   :  { %2156 = vmatpush3.bf16.msra.mxu1 %v2385_v14  ;;  %v2436_v14 = vld [vmem:[%s3097_s1 + $0x3d8] sm:$0xff]  }
  0x3e   :  { %2157 = vmatprep.subr.bf16.mxu1 %v2388_v15  ;;  %v2435_v15 = vld [vmem:[%s3097_s1 + $0x318] sm:$0xff]  }
  0x3f   :  { %2136 = vmatpush3.bf16.msra.mxu0 %v2387_v16  ;;  %v2438_v16 = vld [vmem:[%s3097_s1 + $0x360] sm:$0xff]  }
  0x40   :  { %2165 = vmatprep.subr.bf16.mxu0 %v2390_v18  ;;  %v2440_v18 = vld [vmem:[%s3097_s1 + $0x3e0] sm:$0xff]  }
  0x41   :  { %2158 = vmatpush3.bf16.msra.mxu1 %v2389_v19  ;;  %v2439_v19 = vld [vmem:[%s3097_s1 + $0x320] sm:$0xff]  }
  0x42   :  { %1444 = vmatmul.mubr.bf16.vlgmr.msra.gmra.mrb[4].mxu0 %v359_v17  ;;  %2187 = vmatprep.subr.bf16.mxu1 %v2392_v20  ;;  %v2437_v17 = vld [vmem:[%s3097_s1 + $0x398] sm:$0xff]   ;;  %v2442_v20 = vld [vmem:[%s3097_s1 + $0x368] sm:$0xff]  }
  0x43   :  { %2166 = vmatpush3.bf16.msra.mxu0 %v2391_v21  ;;  %1523 = vmatprep.mubr.bf16.mxu0 %v415_v55  ;;  %v2441_v21 = vld [vmem:[%s3097_s1 + $0x3a0] sm:$0xff]  }
  0x44   :  { %1484 = vmatmul.mubr.bf16.vlgmr.msra.gmra.mrb[4].mxu1 %v375_v22  ;;  %2167 = vmatprep.subr.bf16.mxu0 %v2394_v23  ;;  %v2444_v22 = vld [vmem:[%s3097_s1 + $0x3e8] sm:$0xff]  }
  0x45   :  { %2188 = vmatpush3.bf16.msra.mxu1 %v2393_v24  ;;  %1563 = vmatprep.mubr.bf16.mxu1 %v425_v59  ;;  %v2443_v23 = vld [vmem:[%s3097_s1 + $0x328] sm:$0xff]   ;;  %v2446_v24 = vld [vmem:[%s3097_s1 + $0x370] sm:$0xff]  }
  0x46   :  { %2189 = vmatprep.subr.bf16.mxu1 %v2396_v25  ;;  %v2445_v25 = vld [vmem:[%s3097_s1 + $0x3a8] sm:$0xff]  }
  0x47   :  { %2168 = vmatpush3.bf16.msra.mxu0 %v2395_v26  ;;  %v2448_v26 = vld [vmem:[%s3097_s1 + $0x3f0] sm:$0xff]  }
  0x48   :  { %2169 = vmatprep.subr.bf16.mxu0 %v2398_v27  ;;  %v2447_v27 = vld [vmem:[%s3097_s1 + $0x330] sm:$0xff]  }
  0x49   :  { %2190 = vmatpush3.bf16.msra.mxu1 %v2397_v28  ;;  %v2450_v28 = vld [vmem:[%s3097_s1 + $0x378] sm:$0xff]  }
  0x4a   :  { %2191 = vmatprep.subr.bf16.mxu1 %v2400_v29  ;;  %v2449_v29 = vld [vmem:[%s3097_s1 + $0x3b0] sm:$0xff]  }
  0x4b   :  { %2170 = vmatpush3.bf16.msra.mxu0 %v2399_v30  ;;  %v2452_v30 = vld [vmem:[%s3097_s1 + $0x3f8] sm:$0xff]  }
  0x4c   :  { %2171 = vmatprep.subr.bf16.mxu0 %v2402_v31  ;;  %v2451_v31 = vld [vmem:[%s3097_s1 + $0x338] sm:$0xff]  }
  0x4d   :  { %2192 = vmatpush3.bf16.msra.mxu1 %v2401_v32  ;;  %v408_v32 = vrot.slane %v2849_v52, %v2660_v41 }
  0x4e   :  { %2193 = vmatprep.subr.bf16.mxu1 %v2404_v33  ;;  %v2455_v33 = vld [vmem:[%s3097_s1 + $0x440] sm:$0xff]  }
  0x4f   :  { %2172 = vmatpush3.bf16.msra.mxu0 %v2403_v34  ;;  %v2454_v34 = vld [vmem:[%s3097_s1 + $0x3b8] sm:$0xff]  }
  0x50   :  { %2173 = vmatprep.subr.bf16.mxu0 %v2406_v35  ;;  %v2456_v35 = vld [vmem:[%s3097_s1 + $0x400] sm:$0xff]  }
  0x51   :  { %2194 = vmatpush3.bf16.msra.mxu1 %v2405_v36  ;;  %v424_v36 = vcombine.high %v408_v32, %v408_v32 }
  0x52   :  { %2195 = vmatprep.subr.bf16.mxu1 %v2408_v37  ;;  %v2457_v37 = vld [vmem:[%s3097_s1 + $0x448] sm:$0xff]  }
  0x53   :  { %2174 = vmatpush3.bf16.msra.mxu0 %v2407_v38  ;;  %v2458_v38 = vld [vmem:[%s3097_s1 + $0x408] sm:$0xff]  }
  0x54   :  { %2175 = vmatprep.subr.bf16.mxu0 %v2410_v39  ;;  %v2459_v39 = vld [vmem:[%s3097_s1 + $0x450] sm:$0xff]  }
  0x55   :  { %2196 = vmatpush3.bf16.msra.mxu1 %v2409_v40  ;;  %v2460_v40 = vld [vmem:[%s3097_s1 + $0x410] sm:$0xff]  }
  0x56   :  { %2197 = vmatprep.subr.bf16.mxu1 %v2412_v42  ;;  %v2461_v42 = vld [vmem:[%s3097_s1 + $0x458] sm:$0xff]  }
  0x57   :  { %2176 = vmatpush3.bf16.msra.mxu0 %v2411_v43  ;;  %v1917_v43 = vld.sshfl [vmem:[%s3096_s0 + $0x10] sm:$0x11 pattern:$0x75316420] }
  0x58   :  { %2177 = vmatprep.subr.bf16.mxu0 %v2414_v44  ;;  %v434_v44 = vcombine.high %v1917_v43, %v1917_v43 }
  0x59   :  { %2198 = vmatpush3.bf16.msra.mxu1 %v2413_v46 }
  0x5a   :  { %2199 = vmatprep.subr.bf16.mxu1 %v2416_v49  ;;  %v448_v46 = vrot.slane %v434_v44, %v2660_v41 }
  0x5b   :  { %2178 = vmatpush3.bf16.msra.mxu0 %v2415_v50 }
  0x5c   :  { %2179 = vmatprep.subr.bf16.mxu0 %v2418_v53 }
  0x5d   :  { %2200 = vmatpush3.bf16.msra.mxu1 %v2417_v54 }
  0x5e   :  { %2201 = vmatprep.subr.bf16.mxu1 %v2420_v57 }
  0x5f   :  { %2180 = vmatpush3.bf16.msra.mxu0 %v2419_v58 }
  0x60   :  { %2209 = vmatprep.subr.bf16.mxu0 %v2422_v61 }
  0x61   :  { %2202 = vmatpush3.bf16.msra.mxu1 %v2421_v62 }
  0x62   :  { %1524 = vmatmul.mubr.bf16.vlgmr.msra.gmra.mrb[8].mxu0 %v401_v60  ;;  %2231 = vmatprep.subr.bf16.mxu1 %v2424_v0 }
  0x63   :  { %2210 = vmatpush3.bf16.msra.mxu0 %v2423_v1  ;;  %1603 = vmatprep.mubr.bf16.mxu0 %v422_v63 }
  0x64   :  { %1564 = vmatmul.mubr.bf16.vlgmr.msra.gmra.mrb[8].mxu1 %v423_v2  ;;  %2211 = vmatprep.subr.bf16.mxu0 %v2426_v3 }
  0x65   :  { %2232 = vmatpush3.bf16.msra.mxu1 %v2425_v4  ;;  %1643 = vmatprep.mubr.bf16.mxu1 %v426_v5 }
  0x66   :  { %2233 = vmatprep.subr.bf16.mxu1 %v2428_v6 }
  0x67   :  { %2212 = vmatpush3.bf16.msra.mxu0 %v2427_v7 }
  0x68   :  { %2213 = vmatprep.subr.bf16.mxu0 %v2430_v8 }
  0x69   :  { %2234 = vmatpush3.bf16.msra.mxu1 %v2429_v9 }
  0x6a   :  { %2235 = vmatprep.subr.bf16.mxu1 %v2432_v10 }
  0x6b   :  { %2214 = vmatpush3.bf16.msra.mxu0 %v2431_v11 }
  0x6c   :  { %2215 = vmatprep.subr.bf16.mxu0 %v2434_v12 }
  0x6d   :  { %2236 = vmatpush3.bf16.msra.mxu1 %v2433_v13 }
  0x6e   :  { %2237 = vmatprep.subr.bf16.mxu1 %v2436_v14 }
  0x6f   :  { %2216 = vmatpush3.bf16.msra.mxu0 %v2435_v15 }
  0x70   :  { %2217 = vmatprep.subr.bf16.mxu0 %v2438_v16 }
  0x71   :  { %2238 = vmatpush3.bf16.msra.mxu1 %v2437_v17 }
  0x72   :  { %2239 = vmatprep.subr.bf16.mxu1 %v2440_v18 }
  0x73   :  { %2218 = vmatpush3.bf16.msra.mxu0 %v2439_v19 }
  0x74   :  { %2219 = vmatprep.subr.bf16.mxu0 %v2442_v20 }
  0x75   :  { %2240 = vmatpush3.bf16.msra.mxu1 %v2441_v21 }
  0x76   :  { %2241 = vmatprep.subr.bf16.mxu1 %v2444_v22 }
  0x77   :  { %2220 = vmatpush3.bf16.msra.mxu0 %v2443_v23 }
  0x78   :  { %2221 = vmatprep.subr.bf16.mxu0 %v2446_v24 }
  0x79   :  { %2242 = vmatpush3.bf16.msra.mxu1 %v2445_v25 }
  0x7a   :  { %2243 = vmatprep.subr.bf16.mxu1 %v2448_v26 }
  0x7b   :  { %2222 = vmatpush3.bf16.msra.mxu0 %v2447_v27 }
  0x7c   :  { %2223 = vmatprep.subr.bf16.mxu0 %v2450_v28 }
  0x7d   :  { %2244 = vmatpush3.bf16.msra.mxu1 %v2449_v29 }
  0x7e   :  { %2245 = vmatprep.subr.bf16.mxu1 %v2452_v30 }
  0x7f   :  { %2224 = vmatpush3.bf16.msra.mxu0 %v2451_v31 }
  0x80   :  { %2253 = vmatprep.subr.bf16.mxu0 %v2455_v33 }
  0x81   :  { %2246 = vmatpush3.bf16.msra.mxu1 %v2454_v34 }
  0x82   :  { %1604 = vmatmul.mubr.bf16.vlgmr.msra.gmra.mrb[12].mxu0 %v408_v32 }
  0x83   :  { %2254 = vmatpush3.bf16.msra.mxu0 %v2456_v35  ;;  %1683 = vmatprep.mubr.bf16.mxu0 %v448_v46 }
  0x84   :  { %1644 = vmatmul.mubr.bf16.vlgmr.msra.gmra.mrb[12].mxu1 %v424_v36  ;;  %2255 = vmatprep.subr.bf16.mxu0 %v2457_v37 }
  0x87   :  { %2256 = vmatpush3.bf16.msra.mxu0 %v2458_v38 }
  0x88   :  { %2257 = vmatprep.subr.bf16.mxu0 %v2459_v39 }
  0x8b   :  { %2258 = vmatpush3.bf16.msra.mxu0 %v2460_v40 }
  0x8c   :  { %2259 = vmatprep.subr.bf16.mxu0 %v2461_v42 }
  0x8d   :  { %12 = vsyncpa [#allocation3], 0  ;;  %v2464_v48 = vld [vmem:[%s3097_s1 + $0x420] sm:$0xff]   ;;  %v2465_v49 = vld [vmem:[%s3097_s1 + $0x468] sm:$0xff]   ;;  %v441_v55 = vrot.slane %v1917_v43, %v2660_v41  ;;  %v2512_v57 = vmov 0.0   ;;  %vm2513_vm0 = vmmov 0  }
  0x8e   :  { %v2466_v50 = vld [vmem:[%s3097_s1 + $0x428] sm:$0xff]   ;;  %v2467_v51 = vld [vmem:[%s3097_s1 + $0x470] sm:$0xff]   ;;  %v2469_v53 = vld [vmem:[%s3097_s1 + $0x478] sm:$0xff]   ;;  %2289 = vmatprep.subr.bf16.mxu1 %v2512_v57  ;;  %2305 = vmatprep.mubr.msk.bf16.mxu1 %vm2513_vm0, %v2512_v57  ;;  %vm1845_vm1 = vcmask 523264   ;;  %vm1889_vm2 = vcmask 50176  }
  0x8f   :  { %2260 = vmatpush3.bf16.msra.mxu0 %v2462_v45  ;;  %v2468_v52 = vld [vmem:[%s3097_s1 + $0x430] sm:$0xff]   ;;  %v2470_v54 = vld [vmem:[%s3097_s1 + $0x438] sm:$0xff]   ;;  %v2471_v56 = vld [vmem:[%s3099_s3] sm:$0xff]  }
  0x90   :  { %2261 = vmatprep.subr.bf16.mxu0 %v2463_v47  ;;  %2290 = vmatpush3.bf16.msra.mxu1 %v2471_v56  ;;  %v2472_v58 = vld [vmem:[%s3099_s3 + $0x8] sm:$0xff]   ;;  %v2473_v41 = vld [vmem:[%s3099_s3 + $0x10] sm:$0xff]   ;;  %v2474_v59 = vld [vmem:[%s3099_s3 + $0x18] sm:$0xff]  }
  0x91   :  { %2291 = vmatprep.subr.bf16.mxu1 %v2512_v57  ;;  %v2475_v60 = vld [vmem:[%s3099_s3 + $0x20] sm:$0xff]   ;;  %v2476_v61 = vld [vmem:[%s3099_s3 + $0x28] sm:$0xff]   ;;  %v2477_v1 = vld [vmem:[%s3099_s3 + $0x30] sm:$0xff]  }
  0x92   :  { %v1916_v63 = vld [vmem:[%s3098_s2] ss:$0 sm:$0xff]  ;;  %v2478_v11 = vld [vmem:[%s3099_s3 + $0x38] sm:$0xff]   ;;  %v2480_v14 = vld [vmem:[%s3101_s5 + $0x8] sm:$0xff]  }
  0x93   :  { %2262 = vmatpush3.bf16.msra.mxu0 %v2464_v48  ;;  %v2479_v13 = vld [vmem:[%s3101_s5] sm:$0xff]  }
  0x94   :  { %2263 = vmatprep.subr.bf16.mxu0 %v2465_v49  ;;  %2292 = vmatpush3.bf16.msra.mxu1 %v2472_v58 }
  0x95   :  { %2293 = vmatprep.subr.bf16.mxu1 %v2512_v57 }
  0x97   :  { %2264 = vmatpush3.bf16.msra.mxu0 %v2466_v50 }
  0x98   :  { %2265 = vmatprep.subr.bf16.mxu0 %v2467_v51  ;;  %2294 = vmatpush3.bf16.msra.mxu1 %v2473_v41 }
  0x99   :  { %2295 = vmatprep.subr.bf16.mxu1 %v2512_v57 }
  0x9b   :  { %2266 = vmatpush3.bf16.msra.mxu0 %v2468_v52 }
  0x9c   :  { %2267 = vmatprep.subr.bf16.mxu0 %v2469_v53  ;;  %2296 = vmatpush3.bf16.msra.mxu1 %v2474_v59 }
  0x9d   :  { %2297 = vmatprep.subr.bf16.mxu1 %v2512_v57 }
  0x9f   :  { %2268 = vmatpush3.bf16.msra.mxu0 %v2470_v54 }
  0xa0   :  { %2309 = vmatprep.subr.bf16.mxu0 %v2512_v57  ;;  %2298 = vmatpush3.bf16.msra.mxu1 %v2475_v60  ;;  %v2481_v60 = vld [vmem:[%s3101_s5 + $0x10] sm:$0xff]  }
  0xa1   :  { %2299 = vmatprep.subr.bf16.mxu1 %v2512_v57 }
  0xa2   :  { %1684 = vmatmul.mubr.bf16.vlgmr.msra.gmra.mrb[16].mxu0 %v441_v55 }
  0xa3   :  { %2317 = vmatprep.mubr.msk.bf16.mxu0 %vm2513_vm0, %v2512_v57  ;;  %2310 = vmatpush3.bf16.msra.mxu0 %v2479_v13 }
  0xa4   :  { %2300 = vmatpush3.bf16.msra.mxu1 %v2476_v61  ;;  %2311 = vmatprep.subr.bf16.mxu0 %v2512_v57  ;;  %v2482_v61 = vld [vmem:[%s3101_s5 + $0x18] sm:$0xff]  }
  0xa5   :  { %2301 = vmatprep.subr.bf16.mxu1 %v2512_v57 }
  0xa7   :  { %2312 = vmatpush3.bf16.msra.mxu0 %v2480_v14 }
  0xa8   :  { %2302 = vmatpush3.bf16.msra.mxu1 %v2477_v1  ;;  %2313 = vmatprep.subr.bf16.mxu0 %v2512_v57 }
  0xa9   :  { %2303 = vmatprep.subr.bf16.mxu1 %v2512_v57 }
  0xab   :  { %2314 = vmatpush3.bf16.msra.mxu0 %v2481_v60 }
  0xac   :  { %2304 = vmatpush3.bf16.msra.mxu1 %v2478_v11  ;;  %2315 = vmatprep.subr.bf16.mxu0 %v2512_v57  ;;  %v2071_v57 = vld [vmem:[%s3102_s6] ss:$0 sm:$0xff] }
  0xaf   :  { %2316 = vmatpush3.bf16.msra.mxu0 %v2482_v61 }
  0xf5   :  { %v2093_v62 = vpop.f32.mrb[0].mxu0 }
  0xf6   :  { %v2094_v0 = vpop.f32.mrb[1].mxu0 }
  0xf7   :  { %v2095_v2 = vadd.f32 %v2094_v0, %v2093_v62  ;;  %v2096_v3 = vpop.f32.mrb[2].mxu0  ;;  %v2115_v4 = vpop.f32.mrb[0].mxu1  ;;  %v2062_v62 = vld [vmem:[%s3100_s4] ss:$0 sm:$0xff]  ;;  %s2514_s4 = smov [#allocation2]  }
  0xf8   :  { %v2097_v5 = vpop.f32.mrb[3].mxu0  ;;  %v2116_v6 = vpop.f32.mrb[1].mxu1  ;;  %s1908_s5 = sshll.u32 %s2514_s4, 4  ;;  %s1909_s5 = int_to_ptr.vmem [resolvable:$true] %s1908_s5 }
  0xf9   :  { %v1366_v7 = vadd.f32 %v2095_v2, %v1916_v63  ;;  %v2117_v8 = vadd.f32 %v2116_v6, %v2115_v4  ;;  %v2118_v9 = vpop.f32.mrb[2].mxu1  ;;  %s2487_s6 = scalar_lea.vmem %s1909_s5, 32  ;;  %p2492_p1 = scmp.lt.s32.totalorder %s1909_s5, %s1909_s5 }
  0xfa   :  { %v2119_v10 = vpop.f32.mrb[3].mxu1  ;;  %p2488_p0 = scmp.ne.s32.totalorder %s1909_s5, %s2487_s6  ;;  %p2493_p2 = scmp.lt.s32.totalorder %s2487_s6, %s2487_s6 }
  0xfb   :  { %v1406_v12 = vadd.f32 %v2117_v8, %v1366_v7 }
  0xfc   :  { %p2494_p3 = por %p2493_p2, %p2492_p1 }
  0xfe   :  { %p2495_p4 = pnand %p2494_p3, %p2488_p0 }
 0x115   :  { %v2137_v15 = vpop.f32.mrb[4].mxu0 }
 0x116   :  { %v2138_v16 = vpop.f32.mrb[5].mxu0 }
 0x117   :  { %v2139_v17 = vadd.f32 %v2138_v16, %v2137_v15  ;;  %v2140_v18 = vpop.f32.mrb[6].mxu0  ;;  %v2159_v19 = vpop.f32.mrb[4].mxu1 }
 0x118   :  { %v2141_v20 = vpop.f32.mrb[7].mxu0  ;;  %v2160_v21 = vpop.f32.mrb[5].mxu1 }
 0x119   :  { %v1446_v22 = vadd.f32 %v2139_v17, %v1406_v12  ;;  %v2161_v23 = vadd.f32 %v2160_v21, %v2159_v19  ;;  %v2162_v24 = vpop.f32.mrb[6].mxu1 }
 0x11a   :  { %v2163_v25 = vpop.f32.mrb[7].mxu1 }
 0x11b   :  { %v1486_v26 = vadd.f32 %v2161_v23, %v1446_v22 }
 0x135   :  { %v2181_v27 = vpop.f32.mrb[8].mxu0 }
 0x136   :  { %v2182_v28 = vpop.f32.mrb[9].mxu0 }
 0x137   :  { %v2183_v29 = vadd.f32 %v2182_v28, %v2181_v27  ;;  %v2184_v30 = vpop.f32.mrb[10].mxu0  ;;  %v2203_v31 = vpop.f32.mrb[8].mxu1 }
 0x138   :  { %v2185_v32 = vpop.f32.mrb[11].mxu0  ;;  %v2204_v33 = vpop.f32.mrb[9].mxu1 }
 0x139   :  { %v1526_v34 = vadd.f32 %v2183_v29, %v1486_v26  ;;  %v2205_v35 = vadd.f32 %v2204_v33, %v2203_v31  ;;  %v2206_v36 = vpop.f32.mrb[10].mxu1 }
 0x13a   :  { %v2207_v37 = vpop.f32.mrb[11].mxu1 }
 0x13b   :  { %v1566_v38 = vadd.f32 %v2205_v35, %v1526_v34 }
 0x155   :  { %v2225_v39 = vpop.f32.mrb[12].mxu0 }
 0x156   :  { %v2226_v40 = vpop.f32.mrb[13].mxu0 }
 0x157   :  { %v2227_v42 = vadd.f32 %v2226_v40, %v2225_v39  ;;  %v2228_v43 = vpop.f32.mrb[14].mxu0  ;;  %v2247_v44 = vpop.f32.mrb[12].mxu1 }
 0x158   :  { %v2229_v45 = vpop.f32.mrb[15].mxu0  ;;  %v2248_v46 = vpop.f32.mrb[13].mxu1 }
 0x159   :  { %v1606_v47 = vadd.f32 %v2227_v42, %v1566_v38  ;;  %v2249_v48 = vadd.f32 %v2248_v46, %v2247_v44  ;;  %v2250_v49 = vpop.f32.mrb[14].mxu1 }
 0x15a   :  { %v2251_v50 = vpop.f32.mrb[15].mxu1 }
 0x15b   :  { %v1646_v51 = vadd.f32 %v2249_v48, %v1606_v47 }
 0x175   :  { %v2269_v52 = vpop.f32.mrb[16].mxu0 }
 0x176   :  { %v2270_v53 = vpop.f32.mrb[17].mxu0 }
 0x177   :  { %v2271_v54 = vadd.f32 %v2270_v53, %v2269_v52  ;;  %v2272_v55 = vpop.f32.mrb[18].mxu0 }
 0x178   :  { %v2273_v56 = vpop.f32.mrb[19].mxu0 }
 0x179   :  { %v1686_v58 = vadd.f32 %v2271_v54, %v1646_v51 }
 0x17b   :  { %v1691_v41 = vmax.f32 %v1686_v58, 0.0 }
 0x17d   :  { %v1692_v59 = vpack.c.bf16 %v1691_v41, %v1691_v41 }
 0x17f   :  { %2306 = vmatmul.mubr.bf16.vlgmr.msra.gmra.mrb[16].mxu1 %v1692_v59 }
 0x252   :  { %v1798_v63 = vpop.f32.mrb[16].mxu1 }
 0x253   :  { %v1799_v0 = vadd.f32 %v2062_v62, %v1798_v63  ;;  %v2307_v1 = vpop.f32.mrb[17].mxu1 }
 0x254   :  { %v1801_v2 = vpop.f32.mrb[18].mxu1 }
 0x255   :  { %v1804_v3 = vmax.f32 %v1799_v0, 0.0  ;;  %v2308_v4 = vpop.f32.mrb[19].mxu1 }
 0x257   :  { %v1805_v5 = vpack.c.bf16 %v1804_v3, %v1804_v3 }
 0x259   :  { %2318 = vmatmul.mubr.msk.bf16.vlgmr.msra.gmra.mrb[20].mxu0 %vm1845_vm1, %v1805_v5 }
 0x32c   :  { %v1883_v6 = vpop.f32.mrb[20].mxu0 }
 0x32d   :  { %v1884_v7 = vadd.f32 %v2071_v57, %v1883_v6  ;;  %v2319_v8 = vpop.f32.mrb[21].mxu0 }
 0x32e   :  { %v1886_v9 = vpop.f32.mrb[22].mxu0 }
 0x32f   :  { %v2320_v10 = vpop.f32.mrb[23].mxu0  ;;  %v1890_v11 = vsel %vm1889_vm2, %v1884_v7, -inf }
 0x330   :  { %1891 = vmax.xlane.f32.xlu0 %v1890_v11 }
 0x3bd   :  { %v1892_v12 = vpop.xlane.xlu0 %1891 }
 0x3be   :  { %v1893_v13 = vsub.f32 %v1884_v7, %v1892_v12 }
 0x3c0   :  { %v1894_v14 = vmul.f32 1.442695, %v1893_v13 }
 0x3c2   :  { %2483 = vpow2.f32 %v1894_v14 }
 0x3cc   :  { %v2484_v15 = vpop.eup %2483 }
 0x3cd   :  { %v1896_v16 = vsel %vm1889_vm2, %v2484_v15, 0.0 }
 0x3ce   :  { %1897 = vadd.xlane.f32.xlu0 %v1896_v16 }
 0x45b   :  { %v1898_v17 = vpop.xlane.xlu0 %1897 }
 0x45c   :  { %2485 = vrcp.f32 %v1898_v17 }
 0x466   :  { %v2486_v18 = vpop.eup %2485 }
 0x467   :  { %v1900_v19 = vmul.f32 %v2486_v18, %v2484_v15 }
 0x469   :  { %1901 = vst.msk [vmem:[#allocation2] sm:$0x3] %vm1889_vm2, %v1900_v19 }
 0x46a   :  { %2498 = shalt.err (!%p2495_p4)
}
 0x46b   :  { %s2499_s22 = scalar_lea.hbm %s3103_s7, 32 }
 0x46c   :  { %p2500_p5 = scmp.ne.s32.totalorder %s3103_s7, %s2499_s22  ;;  %p2503_p6 = scmp.lt.u32.totalorder %s2499_s22, %s3103_s7 }
 0x46e   :  { %p2505_p7 = pnand %p2503_p6, %p2500_p5 }
 0x470   :  { %2508 = shalt.err (!%p2505_p7)
}
 0x471   :  { %1911 = dma.vmem_to_hbm [thread:$0]  %s1909_s5, 32, %s3103_s7, [#allocation3]  }
 0x472   :  { %2509 = dma.done.wait [#allocation3], 32  }
 0x473   :  { %2510 = vsyncadd [#allocation3], 4294967264 }
 0x474   :  { %1915 = vsyncpa [#allocation3], 1 }

</bundles_post_ra>
